<compile_context>
chip_gen: v7x
topology: tpu7x:2x2x1
jax: 0.10.0
libtpu: 0.0.40
codegen_flags: <defaults>
</compile_context>

<pallas_src>
import functools
import math

import jax
import jax.numpy as jnp
from jax.experimental import pallas as pl
from jax.experimental.pallas import tpu as pltpu

# ----- small but structurally faithful config (HIDDEN stands in for BERT_HIDDEN_SIZE=768) -----
HIDDEN = 128
N_LAYERS = 2
N_HEADS = 2
HEAD_DIM = HIDDEN // N_HEADS
INTERMEDIATE = 4 * HIDDEN
VOCAB = 128
MAX_POS = 64
N_SENTIMENT_CLASSES = 5
LN_EPS = 1e-12


# ----------------------------- in-kernel helpers -----------------------------

def _ln(x, gamma, beta):
    """LayerNorm over the last (hidden) axis; gamma/beta are (1, H)."""
    mu = jnp.mean(x, axis=-1, keepdims=True)
    var = jnp.mean((x - mu) ** 2, axis=-1, keepdims=True)
    return (x - mu) * jax.lax.rsqrt(var + LN_EPS) * gamma + beta


# ----------------------------- fused encoder kernel -----------------------------

def _encoder_kernel(x_ref, m_ref, eg_ref, eb_ref,
                    wqkv_ref, bqkv_ref, wo_ref, bo_ref, ln1g_ref, ln1b_ref,
                    w1_ref, b1_ref, w2_ref, b2_ref, ln2g_ref, ln2b_ref,
                    o_ref, *, n_layers, n_heads, head_dim):
    """One batch element: emb-LN + all encoder layers, activation resident the whole time."""
    S = x_ref.shape[0]
    H = n_heads * head_dim

    # embedding LayerNorm (folded into this kernel; saves a separate launch + HBM round-trip)
    x = _ln(x_ref[...].astype(jnp.float32), eg_ref[...], eb_ref[...])          # (S, H)
    mask = m_ref[0]                                                             # (1, S) additive

    for l in range(n_layers):                                                   # static unroll
        # ---------------- attention block ----------------
        qkv = jnp.dot(x, wqkv_ref[l],
                      preferred_element_type=jnp.float32) + bqkv_ref[l]         # (S, 3H)
        # 128-aligned lane slices, then one reshape to a head axis (single relayout per tensor)
        q = qkv[:, 0 * H:1 * H].reshape(S, n_heads, head_dim).swapaxes(0, 1)    # (nh, S, Dh)
        k = qkv[:, 1 * H:2 * H].reshape(S, n_heads, head_dim).swapaxes(0, 1)
        v = qkv[:, 2 * H:3 * H].reshape(S, n_heads, head_dim).swapaxes(0, 1)

        # 1/sqrt(Dh) scale is pre-folded into the Q columns of wqkv/bqkv
        s = jnp.einsum('hqd,hkd->hqk', q, k,
                       preferred_element_type=jnp.float32)                      # (nh, S, S)
        s = s + mask                                                            # key mask bcast
        s = s - jnp.max(s, axis=-1, keepdims=True)
        p = jnp.exp(s)
        p = p * pl.reciprocal(jnp.sum(p, axis=-1, keepdims=True), approx=True)

        ctx = jnp.einsum('hqk,hkd->hqd', p, v,
                         preferred_element_type=jnp.float32)                    # (nh, S, Dh)
        ctx = ctx.swapaxes(0, 1).reshape(S, H)                                  # concat heads

        # single K=128 output projection on the concatenated context
        attn = jnp.dot(ctx, wo_ref[l], preferred_element_type=jnp.float32) + bo_ref[l]
        x = _ln(attn + x, ln1g_ref[l], ln1b_ref[l])

        # ---------------- FFN block ----------------
        h1 = jnp.dot(x, w1_ref[l], preferred_element_type=jnp.float32) + b1_ref[l]
        # TODO(synk): HF BERT uses exact erf-GELU; tanh approximation kept for TPU lowering safety.
        h1 = jax.nn.gelu(h1, approximate=True)
        f = jnp.dot(h1, w2_ref[l], preferred_element_type=jnp.float32) + b2_ref[l]
        x = _ln(f + x, ln2g_ref[l], ln2b_ref[l])

    o_ref[...] = x.astype(o_ref.dtype)


def bert_encoder(x_emb, ext_mask, emb_g, emb_b, stk, B, S):
    """x_emb: (B*S, H) raw summed embeddings; ext_mask: (B, 1, S) additive.
    Returns the final hidden states (B*S, H) after emb-LN + all encoder layers."""
    H, F, L = HIDDEN, INTERMEDIATE, N_LAYERS

    def full(shape):
        return pl.BlockSpec(shape, lambda b, _n=len(shape): (0,) * _n)

    kernel = functools.partial(_encoder_kernel, n_layers=L, n_heads=N_HEADS, head_dim=HEAD_DIM)
    return pl.pallas_call(
        kernel,
        out_shape=jax.ShapeDtypeStruct((B * S, H), jnp.float32),
        grid=(B,),
        in_specs=[
            pl.BlockSpec((S, H), lambda b: (b, 0)),        # this batch element's rows
            pl.BlockSpec((1, 1, S), lambda b: (b, 0, 0)),  # additive key mask for this batch
            full((1, H)), full((1, H)),                    # embedding LN gamma/beta
            full((L, H, 3 * H)), full((L, 1, 3 * H)),      # fused QKV (scale folded into Q)
            full((L, H, H)), full((L, 1, H)),              # output projection
            full((L, 1, H)), full((L, 1, H)),              # LN1
            full((L, H, F)), full((L, 1, F)),              # FFN w1
            full((L, F, H)), full((L, 1, H)),              # FFN w2
            full((L, 1, H)), full((L, 1, H)),              # LN2
        ],
        out_specs=pl.BlockSpec((S, H), lambda b: (b, 0)),
        compiler_params=pltpu.CompilerParams(dimension_semantics=("parallel",)),
    )(x_emb, ext_mask, emb_g.reshape(1, H), emb_b.reshape(1, H),
      stk["wqkv"], stk["bqkv"], stk["wo"], stk["bo"], stk["ln1_g"], stk["ln1_b"],
      stk["w1"], stk["b1"], stk["w2"], stk["b2"], stk["ln2_g"], stk["ln2_b"])


# ----------------------------- parameters -----------------------------

def init_params(key):
    ks = iter(jax.random.split(key, 64))

    def dense(kin, kout):
        return jax.random.normal(next(ks), (kin, kout), jnp.float32) * 0.02

    params = {
        "word_emb": jax.random.normal(next(ks), (VOCAB, HIDDEN), jnp.float32) * 0.02,
        "pos_emb": jax.random.normal(next(ks), (MAX_POS, HIDDEN), jnp.float32) * 0.02,
        "type_emb": jax.random.normal(next(ks), (2, HIDDEN), jnp.float32) * 0.02,
        "emb_ln_g": jnp.ones((HIDDEN,), jnp.float32),
        "emb_ln_b": jnp.zeros((HIDDEN,), jnp.float32),
        "pooler_w": dense(HIDDEN, HIDDEN),
        "pooler_b": jnp.zeros((HIDDEN,), jnp.float32),
        # task heads (mirror nn.Linear(HIDDEN, 5), nn.Linear(2*HIDDEN, 1) x2)
        "sent_w": dense(HIDDEN, N_SENTIMENT_CLASSES),
        "sent_b": jnp.zeros((N_SENTIMENT_CLASSES,), jnp.float32),
        "para_w": dense(2 * HIDDEN, 1),
        "para_b": jnp.zeros((1,), jnp.float32),
        "sim_w": dense(2 * HIDDEN, 1),
        "sim_b": jnp.zeros((1,), jnp.float32),
        "layers": [],
    }
    for _ in range(N_LAYERS):
        params["layers"].append({
            # fused QKV projection: [wq | wk | wv] stored as one (H, 3H) weight
            "wqkv": dense(HIDDEN, 3 * HIDDEN), "bqkv": jnp.zeros((3 * HIDDEN,), jnp.float32),
            "wo": dense(HIDDEN, HIDDEN), "bo": jnp.zeros((HIDDEN,), jnp.float32),
            "ln1_g": jnp.ones((HIDDEN,), jnp.float32), "ln1_b": jnp.zeros((HIDDEN,), jnp.float32),
            "w1": dense(HIDDEN, INTERMEDIATE), "b1": jnp.zeros((INTERMEDIATE,), jnp.float32),
            "w2": dense(INTERMEDIATE, HIDDEN), "b2": jnp.zeros((HIDDEN,), jnp.float32),
            "ln2_g": jnp.ones((HIDDEN,), jnp.float32), "ln2_b": jnp.zeros((HIDDEN,), jnp.float32),
        })
    # stacked, kernel-ready layer weights with the softmax scale folded into Q
    params["stacked"] = _stack_layers(params["layers"])
    return params


def _stack_layers(layers):
    """Stack per-layer params on a leading L axis and fold 1/sqrt(Dh) into the Q projection."""
    L, H, F = N_LAYERS, HIDDEN, INTERMEDIATE
    scale = 1.0 / math.sqrt(HEAD_DIM)

    def g(name):
        return jnp.stack([p[name] for p in layers])

    wqkv = g("wqkv")                                   # (L, H, 3H)
    bqkv = g("bqkv")                                   # (L, 3H)
    wqkv = wqkv.at[:, :, :H].multiply(scale)           # fold score scale into Q columns
    bqkv = bqkv.at[:, :H].multiply(scale)
    return {
        "wqkv": wqkv,
        "bqkv": bqkv.reshape(L, 1, 3 * H),
        "wo": g("wo"),
        "bo": g("bo").reshape(L, 1, H),
        "ln1_g": g("ln1_g").reshape(L, 1, H),
        "ln1_b": g("ln1_b").reshape(L, 1, H),
        "w1": g("w1"),
        "b1": g("b1").reshape(L, 1, F),
        "w2": g("w2"),
        "b2": g("b2").reshape(L, 1, H),
        "ln2_g": g("ln2_g").reshape(L, 1, H),
        "ln2_b": g("ln2_b").reshape(L, 1, H),
    }


# ----------------------------- model (glue + kernel) -----------------------------

def bert_forward(params, input_ids, attention_mask):
    """Equivalent of MultitaskBERT.forward -> returns pooler_output (B, HIDDEN)."""
    B, S = input_ids.shape
    # embedding gather + sum kept in jnp (no clean Pallas win at this size)
    we = jnp.take(params["word_emb"], input_ids, axis=0)             # (B, S, H)
    pe = params["pos_emb"][:S][None, :, :]
    te = params["type_emb"][0][None, None, :]                        # token_type_ids == 0
    x = (we + pe + te).reshape(B * S, HIDDEN)
    # additive attention mask over key positions: (1 - mask) * -10000
    ext_mask = ((1.0 - attention_mask.astype(jnp.float32)) * -10000.0).reshape(B, 1, S)

    x = bert_encoder(x, ext_mask, params["emb_ln_g"], params["emb_ln_b"],
                     params["stacked"], B, S)

    cls = x.reshape(B, S, HIDDEN)[:, 0, :]                           # [CLS]
    # pooler / task heads are tiny (few rows, narrow outputs) -> plain jnp, let XLA fuse them
    pooled = jnp.tanh(cls @ params["pooler_w"] + params["pooler_b"])
    return pooled


def predict_sentiment(params, input_ids, attention_mask):
    pooled = bert_forward(params, input_ids, attention_mask)
    # dropout: identity at inference
    return pooled @ params["sent_w"] + params["sent_b"]              # (B, 5)


def _pair_pooled(params, ids1, mask1, ids2, mask2):
    """Run both sentences through a SINGLE forward (weights DMA'd once, 2x grid points)."""
    B = ids1.shape[0]
    ids = jnp.concatenate([ids1, ids2], axis=0)
    mask = jnp.concatenate([mask1, mask2], axis=0)
    pooled = bert_forward(params, ids, mask)
    return pooled[:B], pooled[B:]


def predict_paraphrase(params, ids1, mask1, ids2, mask2):
    p1, p2 = _pair_pooled(params, ids1, mask1, ids2, mask2)
    cat = jnp.concatenate([p1, p2], axis=1)                          # (B, 2H)
    return cat @ params["para_w"] + params["para_b"]                 # (B, 1)


def predict_similarity(params, ids1, mask1, ids2, mask2):
    p1, p2 = _pair_pooled(params, ids1, mask1, ids2, mask2)
    cat = jnp.concatenate([p1, p2], axis=1)
    logits = cat @ params["sim_w"] + params["sim_b"]                 # (B, 1)
    return logits * 2.5 + 2.5


# ----------------------------- main -----------------------------

if __name__ == "__main__":
    key = jax.random.PRNGKey(0)
    pkey, dkey = jax.random.split(key)
    params = init_params(pkey)

    B, S = 2, 8
    k1, k2 = jax.random.split(dkey)
    ids1 = jax.random.randint(k1, (B, S), 0, VOCAB, dtype=jnp.int32)
    ids2 = jax.random.randint(k2, (B, S), 0, VOCAB, dtype=jnp.int32)
    mask1 = jnp.ones((B, S), jnp.int32)
    mask2 = jnp.concatenate(
        [jnp.ones((B, S - 2), jnp.int32), jnp.zeros((B, 2), jnp.int32)], axis=1)

    pooled = bert_forward(params, ids1, mask1)
    sent = predict_sentiment(params, ids1, mask1)
    para = predict_paraphrase(params, ids1, mask1, ids2, mask2)
    sim = predict_similarity(params, ids1, mask1, ids2, mask2)
    jax.block_until_ready((pooled, sent, para, sim))

    assert pooled.shape == (B, HIDDEN)
    assert sent.shape == (B, N_SENTIMENT_CLASSES)
    assert para.shape == (B, 1)
    assert sim.shape == (B, 1)
    assert all(bool(jnp.all(jnp.isfinite(t))) for t in (pooled, sent, para, sim))

    print("KERNEL_OK")
</pallas_src>

<mosaic_0001>
module attributes {stable_mosaic.version = 11 : i64} {
  func.func @_encoder_kernel(%arg0: i32, %arg1: memref<8x128xf32, #tpu.memory_space<vmem>>, %arg2: memref<1x1x8xf32, #tpu.memory_space<vmem>>, %arg3: memref<1x128xf32, #tpu.memory_space<vmem>>, %arg4: memref<1x128xf32, #tpu.memory_space<vmem>>, %arg5: memref<2x128x384xf32, #tpu.memory_space<vmem>>, %arg6: memref<2x1x384xf32, #tpu.memory_space<vmem>>, %arg7: memref<2x128x128xf32, #tpu.memory_space<vmem>>, %arg8: memref<2x1x128xf32, #tpu.memory_space<vmem>>, %arg9: memref<2x1x128xf32, #tpu.memory_space<vmem>>, %arg10: memref<2x1x128xf32, #tpu.memory_space<vmem>>, %arg11: memref<2x128x512xf32, #tpu.memory_space<vmem>>, %arg12: memref<2x1x512xf32, #tpu.memory_space<vmem>>, %arg13: memref<2x512x128xf32, #tpu.memory_space<vmem>>, %arg14: memref<2x1x128xf32, #tpu.memory_space<vmem>>, %arg15: memref<2x1x128xf32, #tpu.memory_space<vmem>>, %arg16: memref<2x1x128xf32, #tpu.memory_space<vmem>>, %arg17: memref<8x128xf32, #tpu.memory_space<vmem>>) attributes {dimension_semantics = [#tpu.dimension_semantics<parallel>], iteration_bounds = array<i64: 2>, scalar_prefetch = 0 : i64, scratch_operands = 0 : i64, tpu.core_type = #tpu.core_type<tc>, window_params = [{transform_indices = @transform_0, window_bounds = array<i64: 8, 128>}, {transform_indices = @transform_1, window_bounds = array<i64: 1, 1, 8>}, {pipeline_mode = #tpu.pipeline_mode<synchronous>, transform_indices = @transform_2, window_bounds = array<i64: 1, 128>}, {pipeline_mode = #tpu.pipeline_mode<synchronous>, transform_indices = @transform_3, window_bounds = array<i64: 1, 128>}, {pipeline_mode = #tpu.pipeline_mode<synchronous>, transform_indices = @transform_4, window_bounds = array<i64: 2, 128, 384>}, {pipeline_mode = #tpu.pipeline_mode<synchronous>, transform_indices = @transform_5, window_bounds = array<i64: 2, 1, 384>}, {pipeline_mode = #tpu.pipeline_mode<synchronous>, transform_indices = @transform_6, window_bounds = array<i64: 2, 128, 128>}, {pipeline_mode = #tpu.pipeline_mode<synchronous>, transform_indices = @transform_7, window_bounds = array<i64: 2, 1, 128>}, {pipeline_mode = #tpu.pipeline_mode<synchronous>, transform_indices = @transform_8, window_bounds = array<i64: 2, 1, 128>}, {pipeline_mode = #tpu.pipeline_mode<synchronous>, transform_indices = @transform_9, window_bounds = array<i64: 2, 1, 128>}, {pipeline_mode = #tpu.pipeline_mode<synchronous>, transform_indices = @transform_10, window_bounds = array<i64: 2, 128, 512>}, {pipeline_mode = #tpu.pipeline_mode<synchronous>, transform_indices = @transform_11, window_bounds = array<i64: 2, 1, 512>}, {pipeline_mode = #tpu.pipeline_mode<synchronous>, transform_indices = @transform_12, window_bounds = array<i64: 2, 512, 128>}, {pipeline_mode = #tpu.pipeline_mode<synchronous>, transform_indices = @transform_13, window_bounds = array<i64: 2, 1, 128>}, {pipeline_mode = #tpu.pipeline_mode<synchronous>, transform_indices = @transform_14, window_bounds = array<i64: 2, 1, 128>}, {pipeline_mode = #tpu.pipeline_mode<synchronous>, transform_indices = @transform_15, window_bounds = array<i64: 2, 1, 128>}, {transform_indices = @transform_16, window_bounds = array<i64: 8, 128>}]} {
    %c0 = arith.constant 0 : index
    %c0_0 = arith.constant 0 : index
    %0 = vector.load %arg1[%c0, %c0_0] : memref<8x128xf32, #tpu.memory_space<vmem>>, vector<8x128xf32>
    %c0_1 = arith.constant 0 : index
    %c0_2 = arith.constant 0 : index
    %1 = vector.load %arg3[%c0_1, %c0_2] : memref<1x128xf32, #tpu.memory_space<vmem>>, vector<1x128xf32>
    %c0_3 = arith.constant 0 : index
    %c0_4 = arith.constant 0 : index
    %2 = vector.load %arg4[%c0_3, %c0_4] : memref<1x128xf32, #tpu.memory_space<vmem>>, vector<1x128xf32>
    %cst = arith.constant dense<0.000000e+00> : vector<8xf32>
    %3 = vector.multi_reduction <add>, %0, %cst [1] : vector<8x128xf32> to vector<8xf32>
    %4 = vector.shape_cast %3 : vector<8xf32> to vector<8x1xf32>
    %cst_5 = arith.constant 1.280000e+02 : f32
    %5 = vector.broadcast %cst_5 : f32 to vector<8x1xf32>
    %6 = arith.divf %4, %5 : vector<8x1xf32>
    %7 = vector.broadcast %6 : vector<8x1xf32> to vector<8x128xf32>
    %8 = arith.subf %0, %7 : vector<8x128xf32>
    %9 = arith.mulf %8, %8 : vector<8x128xf32>
    %cst_6 = arith.constant dense<0.000000e+00> : vector<8xf32>
    %10 = vector.multi_reduction <add>, %9, %cst_6 [1] : vector<8x128xf32> to vector<8xf32>
    %11 = vector.shape_cast %10 : vector<8xf32> to vector<8x1xf32>
    %cst_7 = arith.constant 1.280000e+02 : f32
    %12 = vector.broadcast %cst_7 : f32 to vector<8x1xf32>
    %13 = arith.divf %11, %12 : vector<8x1xf32>
    %14 = vector.broadcast %6 : vector<8x1xf32> to vector<8x128xf32>
    %15 = arith.subf %0, %14 : vector<8x128xf32>
    %cst_8 = arith.constant 9.99999996E-13 : f32
    %16 = vector.broadcast %cst_8 : f32 to vector<8x1xf32>
    %17 = arith.addf %13, %16 : vector<8x1xf32>
    %18 = math.rsqrt %17 : vector<8x1xf32>
    %19 = vector.broadcast %18 : vector<8x1xf32> to vector<8x128xf32>
    %20 = arith.mulf %15, %19 : vector<8x128xf32>
    %21 = vector.broadcast %1 : vector<1x128xf32> to vector<8x128xf32>
    %22 = arith.mulf %20, %21 : vector<8x128xf32>
    %23 = vector.broadcast %2 : vector<1x128xf32> to vector<8x128xf32>
    %24 = arith.addf %22, %23 : vector<8x128xf32>
    %c0_9 = arith.constant 0 : index
    %c0_10 = arith.constant 0 : index
    %c0_11 = arith.constant 0 : index
    %25 = vector.load %arg2[%c0_9, %c0_10, %c0_11] : memref<1x1x8xf32, #tpu.memory_space<vmem>>, vector<1x1x8xf32>
    %26 = vector.shape_cast %25 : vector<1x1x8xf32> to vector<1x8xf32>
    %c0_12 = arith.constant 0 : index
    %c0_13 = arith.constant 0 : index
    %c0_14 = arith.constant 0 : index
    %27 = vector.load %arg5[%c0_12, %c0_13, %c0_14] : memref<2x128x384xf32, #tpu.memory_space<vmem>>, vector<1x128x384xf32>
    %28 = vector.shape_cast %27 : vector<1x128x384xf32> to vector<128x384xf32>
    %cst_15 = arith.constant dense<0.000000e+00> : vector<8x384xf32>
    %29 = tpu.matmul %24, %28, %cst_15 {dimension_numbers = #tpu.dot_dimension_numbers<[1], [0], [0], [1], [0, 0, 1, 1], [], []>} : vector<8x128xf32>, vector<128x384xf32>, vector<8x384xf32> -> vector<8x384xf32>
    %c0_16 = arith.constant 0 : index
    %c0_17 = arith.constant 0 : index
    %c0_18 = arith.constant 0 : index
    %30 = vector.load %arg6[%c0_16, %c0_17, %c0_18] : memref<2x1x384xf32, #tpu.memory_space<vmem>>, vector<1x1x384xf32>
    %31 = vector.shape_cast %30 : vector<1x1x384xf32> to vector<1x384xf32>
    %32 = vector.broadcast %31 : vector<1x384xf32> to vector<8x384xf32>
    %33 = arith.addf %29, %32 : vector<8x384xf32>
    %34 = vector.extract_strided_slice %33 {offsets = [0, 0], sizes = [8, 128], strides = [1, 1]} : vector<8x384xf32> to vector<8x128xf32>
    %35 = vector.shape_cast %34 : vector<8x128xf32> to vector<8x2x64xf32>
    %36 = tpu.transpose %35, [1, 0, 2] : vector<8x2x64xf32> -> vector<2x8x64xf32>
    %37 = vector.extract_strided_slice %33 {offsets = [0, 128], sizes = [8, 128], strides = [1, 1]} : vector<8x384xf32> to vector<8x128xf32>
    %38 = vector.shape_cast %37 : vector<8x128xf32> to vector<8x2x64xf32>
    %39 = tpu.transpose %38, [1, 0, 2] : vector<8x2x64xf32> -> vector<2x8x64xf32>
    %40 = vector.extract_strided_slice %33 {offsets = [0, 256], sizes = [8, 128], strides = [1, 1]} : vector<8x384xf32> to vector<8x128xf32>
    %41 = vector.shape_cast %40 : vector<8x128xf32> to vector<8x2x64xf32>
    %42 = tpu.transpose %41, [1, 0, 2] : vector<8x2x64xf32> -> vector<2x8x64xf32>
    "tpu.trace_start"() <{level = 10 : i32, message = "hqd,hkd->hqk"}> : () -> ()
    %cst_19 = arith.constant dense<0.000000e+00> : vector<2x8x8xf32>
    %43 = tpu.matmul %36, %39, %cst_19 {dimension_numbers = #tpu.dot_dimension_numbers<[2], [2], [1], [1], [0, 0, 0, 1, 1, 1], [0], [0]>} : vector<2x8x64xf32>, vector<2x8x64xf32>, vector<2x8x8xf32> -> vector<2x8x8xf32>
    "tpu.trace_stop"() : () -> ()
    %44 = vector.shape_cast %26 : vector<1x8xf32> to vector<1x1x8xf32>
    %45 = vector.broadcast %44 : vector<1x1x8xf32> to vector<2x8x8xf32>
    %46 = arith.addf %43, %45 : vector<2x8x8xf32>
    %cst_20 = arith.constant dense<0xFF800000> : vector<2x8xf32>
    %47 = vector.multi_reduction <maximumf>, %46, %cst_20 [2] : vector<2x8x8xf32> to vector<2x8xf32>
    %48 = vector.shape_cast %47 : vector<2x8xf32> to vector<2x8x1xf32>
    %49 = vector.broadcast %48 : vector<2x8x1xf32> to vector<2x8x8xf32>
    %50 = arith.subf %46, %49 : vector<2x8x8xf32>
    %51 = math.exp %50 : vector<2x8x8xf32>
    %cst_21 = arith.constant dense<0.000000e+00> : vector<2x8xf32>
    %52 = vector.multi_reduction <add>, %51, %cst_21 [2] : vector<2x8x8xf32> to vector<2x8xf32>
    %53 = vector.shape_cast %52 : vector<2x8xf32> to vector<2x8x1xf32>
    %54 = tpu.reciprocal %53 {approx = true} : vector<2x8x1xf32> -> vector<2x8x1xf32>
    %55 = vector.broadcast %54 : vector<2x8x1xf32> to vector<2x8x8xf32>
    %56 = arith.mulf %51, %55 : vector<2x8x8xf32>
    "tpu.trace_start"() <{level = 10 : i32, message = "hqk,hkd->hqd"}> : () -> ()
    %cst_22 = arith.constant dense<0.000000e+00> : vector<2x8x64xf32>
    %57 = tpu.matmul %56, %42, %cst_22 {dimension_numbers = #tpu.dot_dimension_numbers<[2], [1], [1], [2], [0, 0, 0, 1, 1, 2], [0], [0]>} : vector<2x8x8xf32>, vector<2x8x64xf32>, vector<2x8x64xf32> -> vector<2x8x64xf32>
    "tpu.trace_stop"() : () -> ()
    %58 = tpu.transpose %57, [1, 0, 2] : vector<2x8x64xf32> -> vector<8x2x64xf32>
    %59 = vector.shape_cast %58 : vector<8x2x64xf32> to vector<8x128xf32>
    %c0_23 = arith.constant 0 : index
    %c0_24 = arith.constant 0 : index
    %c0_25 = arith.constant 0 : index
    %60 = vector.load %arg7[%c0_23, %c0_24, %c0_25] : memref<2x128x128xf32, #tpu.memory_space<vmem>>, vector<1x128x128xf32>
    %61 = vector.shape_cast %60 : vector<1x128x128xf32> to vector<128x128xf32>
    %cst_26 = arith.constant dense<0.000000e+00> : vector<8x128xf32>
    %62 = tpu.matmul %59, %61, %cst_26 {dimension_numbers = #tpu.dot_dimension_numbers<[1], [0], [0], [1], [0, 0, 1, 1], [], []>} : vector<8x128xf32>, vector<128x128xf32>, vector<8x128xf32> -> vector<8x128xf32>
    %c0_27 = arith.constant 0 : index
    %c0_28 = arith.constant 0 : index
    %c0_29 = arith.constant 0 : index
    %63 = vector.load %arg8[%c0_27, %c0_28, %c0_29] : memref<2x1x128xf32, #tpu.memory_space<vmem>>, vector<1x1x128xf32>
    %64 = vector.shape_cast %63 : vector<1x1x128xf32> to vector<1x128xf32>
    %65 = vector.broadcast %64 : vector<1x128xf32> to vector<8x128xf32>
    %66 = arith.addf %62, %65 : vector<8x128xf32>
    %67 = arith.addf %66, %24 : vector<8x128xf32>
    %c0_30 = arith.constant 0 : index
    %c0_31 = arith.constant 0 : index
    %c0_32 = arith.constant 0 : index
    %68 = vector.load %arg9[%c0_30, %c0_31, %c0_32] : memref<2x1x128xf32, #tpu.memory_space<vmem>>, vector<1x1x128xf32>
    %69 = vector.shape_cast %68 : vector<1x1x128xf32> to vector<1x128xf32>
    %c0_33 = arith.constant 0 : index
    %c0_34 = arith.constant 0 : index
    %c0_35 = arith.constant 0 : index
    %70 = vector.load %arg10[%c0_33, %c0_34, %c0_35] : memref<2x1x128xf32, #tpu.memory_space<vmem>>, vector<1x1x128xf32>
    %71 = vector.shape_cast %70 : vector<1x1x128xf32> to vector<1x128xf32>
    %cst_36 = arith.constant dense<0.000000e+00> : vector<8xf32>
    %72 = vector.multi_reduction <add>, %67, %cst_36 [1] : vector<8x128xf32> to vector<8xf32>
    %73 = vector.shape_cast %72 : vector<8xf32> to vector<8x1xf32>
    %cst_37 = arith.constant 1.280000e+02 : f32
    %74 = vector.broadcast %cst_37 : f32 to vector<8x1xf32>
    %75 = arith.divf %73, %74 : vector<8x1xf32>
    %76 = vector.broadcast %75 : vector<8x1xf32> to vector<8x128xf32>
    %77 = arith.subf %67, %76 : vector<8x128xf32>
    %78 = arith.mulf %77, %77 : vector<8x128xf32>
    %cst_38 = arith.constant dense<0.000000e+00> : vector<8xf32>
    %79 = vector.multi_reduction <add>, %78, %cst_38 [1] : vector<8x128xf32> to vector<8xf32>
    %80 = vector.shape_cast %79 : vector<8xf32> to vector<8x1xf32>
    %cst_39 = arith.constant 1.280000e+02 : f32
    %81 = vector.broadcast %cst_39 : f32 to vector<8x1xf32>
    %82 = arith.divf %80, %81 : vector<8x1xf32>
    %83 = vector.broadcast %75 : vector<8x1xf32> to vector<8x128xf32>
    %84 = arith.subf %67, %83 : vector<8x128xf32>
    %cst_40 = arith.constant 9.99999996E-13 : f32
    %85 = vector.broadcast %cst_40 : f32 to vector<8x1xf32>
    %86 = arith.addf %82, %85 : vector<8x1xf32>
    %87 = math.rsqrt %86 : vector<8x1xf32>
    %88 = vector.broadcast %87 : vector<8x1xf32> to vector<8x128xf32>
    %89 = arith.mulf %84, %88 : vector<8x128xf32>
    %90 = vector.broadcast %69 : vector<1x128xf32> to vector<8x128xf32>
    %91 = arith.mulf %89, %90 : vector<8x128xf32>
    %92 = vector.broadcast %71 : vector<1x128xf32> to vector<8x128xf32>
    %93 = arith.addf %91, %92 : vector<8x128xf32>
    %c0_41 = arith.constant 0 : index
    %c0_42 = arith.constant 0 : index
    %c0_43 = arith.constant 0 : index
    %94 = vector.load %arg11[%c0_41, %c0_42, %c0_43] : memref<2x128x512xf32, #tpu.memory_space<vmem>>, vector<1x128x512xf32>
    %95 = vector.shape_cast %94 : vector<1x128x512xf32> to vector<128x512xf32>
    %cst_44 = arith.constant dense<0.000000e+00> : vector<8x512xf32>
    %96 = tpu.matmul %93, %95, %cst_44 {dimension_numbers = #tpu.dot_dimension_numbers<[1], [0], [0], [1], [0, 0, 1, 1], [], []>} : vector<8x128xf32>, vector<128x512xf32>, vector<8x512xf32> -> vector<8x512xf32>
    %c0_45 = arith.constant 0 : index
    %c0_46 = arith.constant 0 : index
    %c0_47 = arith.constant 0 : index
    %97 = vector.load %arg12[%c0_45, %c0_46, %c0_47] : memref<2x1x512xf32, #tpu.memory_space<vmem>>, vector<1x1x512xf32>
    %98 = vector.shape_cast %97 : vector<1x1x512xf32> to vector<1x512xf32>
    %99 = vector.broadcast %98 : vector<1x512xf32> to vector<8x512xf32>
    %100 = arith.addf %96, %99 : vector<8x512xf32>
    %101 = arith.mulf %100, %100 : vector<8x512xf32>
    %102 = arith.mulf %100, %101 : vector<8x512xf32>
    %cst_48 = arith.constant 4.471500e-02 : f32
    %103 = vector.broadcast %cst_48 : f32 to vector<8x512xf32>
    %104 = arith.mulf %103, %102 : vector<8x512xf32>
    %105 = arith.addf %100, %104 : vector<8x512xf32>
    %cst_49 = arith.constant 0.797884583 : f32
    %106 = vector.broadcast %cst_49 : f32 to vector<8x512xf32>
    %107 = arith.mulf %106, %105 : vector<8x512xf32>
    %108 = math.tanh %107 : vector<8x512xf32>
    %cst_50 = arith.constant 1.000000e+00 : f32
    %109 = vector.broadcast %cst_50 : f32 to vector<8x512xf32>
    %110 = arith.addf %109, %108 : vector<8x512xf32>
    %cst_51 = arith.constant 5.000000e-01 : f32
    %111 = vector.broadcast %cst_51 : f32 to vector<8x512xf32>
    %112 = arith.mulf %111, %110 : vector<8x512xf32>
    %113 = arith.mulf %100, %112 : vector<8x512xf32>
    %c0_52 = arith.constant 0 : index
    %c0_53 = arith.constant 0 : index
    %c0_54 = arith.constant 0 : index
    %114 = vector.load %arg13[%c0_52, %c0_53, %c0_54] : memref<2x512x128xf32, #tpu.memory_space<vmem>>, vector<1x512x128xf32>
    %115 = vector.shape_cast %114 : vector<1x512x128xf32> to vector<512x128xf32>
    %cst_55 = arith.constant dense<0.000000e+00> : vector<8x128xf32>
    %116 = tpu.matmul %113, %115, %cst_55 {dimension_numbers = #tpu.dot_dimension_numbers<[1], [0], [0], [1], [0, 0, 1, 1], [], []>} : vector<8x512xf32>, vector<512x128xf32>, vector<8x128xf32> -> vector<8x128xf32>
    %c0_56 = arith.constant 0 : index
    %c0_57 = arith.constant 0 : index
    %c0_58 = arith.constant 0 : index
    %117 = vector.load %arg14[%c0_56, %c0_57, %c0_58] : memref<2x1x128xf32, #tpu.memory_space<vmem>>, vector<1x1x128xf32>
    %118 = vector.shape_cast %117 : vector<1x1x128xf32> to vector<1x128xf32>
    %119 = vector.broadcast %118 : vector<1x128xf32> to vector<8x128xf32>
    %120 = arith.addf %116, %119 : vector<8x128xf32>
    %121 = arith.addf %120, %93 : vector<8x128xf32>
    %c0_59 = arith.constant 0 : index
    %c0_60 = arith.constant 0 : index
    %c0_61 = arith.constant 0 : index
    %122 = vector.load %arg15[%c0_59, %c0_60, %c0_61] : memref<2x1x128xf32, #tpu.memory_space<vmem>>, vector<1x1x128xf32>
    %123 = vector.shape_cast %122 : vector<1x1x128xf32> to vector<1x128xf32>
    %c0_62 = arith.constant 0 : index
    %c0_63 = arith.constant 0 : index
    %c0_64 = arith.constant 0 : index
    %124 = vector.load %arg16[%c0_62, %c0_63, %c0_64] : memref<2x1x128xf32, #tpu.memory_space<vmem>>, vector<1x1x128xf32>
    %125 = vector.shape_cast %124 : vector<1x1x128xf32> to vector<1x128xf32>
    %cst_65 = arith.constant dense<0.000000e+00> : vector<8xf32>
    %126 = vector.multi_reduction <add>, %121, %cst_65 [1] : vector<8x128xf32> to vector<8xf32>
    %127 = vector.shape_cast %126 : vector<8xf32> to vector<8x1xf32>
    %cst_66 = arith.constant 1.280000e+02 : f32
    %128 = vector.broadcast %cst_66 : f32 to vector<8x1xf32>
    %129 = arith.divf %127, %128 : vector<8x1xf32>
    %130 = vector.broadcast %129 : vector<8x1xf32> to vector<8x128xf32>
    %131 = arith.subf %121, %130 : vector<8x128xf32>
    %132 = arith.mulf %131, %131 : vector<8x128xf32>
    %cst_67 = arith.constant dense<0.000000e+00> : vector<8xf32>
    %133 = vector.multi_reduction <add>, %132, %cst_67 [1] : vector<8x128xf32> to vector<8xf32>
    %134 = vector.shape_cast %133 : vector<8xf32> to vector<8x1xf32>
    %cst_68 = arith.constant 1.280000e+02 : f32
    %135 = vector.broadcast %cst_68 : f32 to vector<8x1xf32>
    %136 = arith.divf %134, %135 : vector<8x1xf32>
    %137 = vector.broadcast %129 : vector<8x1xf32> to vector<8x128xf32>
    %138 = arith.subf %121, %137 : vector<8x128xf32>
    %cst_69 = arith.constant 9.99999996E-13 : f32
    %139 = vector.broadcast %cst_69 : f32 to vector<8x1xf32>
    %140 = arith.addf %136, %139 : vector<8x1xf32>
    %141 = math.rsqrt %140 : vector<8x1xf32>
    %142 = vector.broadcast %141 : vector<8x1xf32> to vector<8x128xf32>
    %143 = arith.mulf %138, %142 : vector<8x128xf32>
    %144 = vector.broadcast %123 : vector<1x128xf32> to vector<8x128xf32>
    %145 = arith.mulf %143, %144 : vector<8x128xf32>
    %146 = vector.broadcast %125 : vector<1x128xf32> to vector<8x128xf32>
    %147 = arith.addf %145, %146 : vector<8x128xf32>
    %c1 = arith.constant 1 : index
    %c0_70 = arith.constant 0 : index
    %c0_71 = arith.constant 0 : index
    %148 = vector.load %arg5[%c1, %c0_70, %c0_71] : memref<2x128x384xf32, #tpu.memory_space<vmem>>, vector<1x128x384xf32>
    %149 = vector.shape_cast %148 : vector<1x128x384xf32> to vector<128x384xf32>
    %cst_72 = arith.constant dense<0.000000e+00> : vector<8x384xf32>
    %150 = tpu.matmul %147, %149, %cst_72 {dimension_numbers = #tpu.dot_dimension_numbers<[1], [0], [0], [1], [0, 0, 1, 1], [], []>} : vector<8x128xf32>, vector<128x384xf32>, vector<8x384xf32> -> vector<8x384xf32>
    %c1_73 = arith.constant 1 : index
    %c0_74 = arith.constant 0 : index
    %c0_75 = arith.constant 0 : index
    %151 = vector.load %arg6[%c1_73, %c0_74, %c0_75] : memref<2x1x384xf32, #tpu.memory_space<vmem>>, vector<1x1x384xf32>
    %152 = vector.shape_cast %151 : vector<1x1x384xf32> to vector<1x384xf32>
    %153 = vector.broadcast %152 : vector<1x384xf32> to vector<8x384xf32>
    %154 = arith.addf %150, %153 : vector<8x384xf32>
    %155 = vector.extract_strided_slice %154 {offsets = [0, 0], sizes = [8, 128], strides = [1, 1]} : vector<8x384xf32> to vector<8x128xf32>
    %156 = vector.shape_cast %155 : vector<8x128xf32> to vector<8x2x64xf32>
    %157 = tpu.transpose %156, [1, 0, 2] : vector<8x2x64xf32> -> vector<2x8x64xf32>
    %158 = vector.extract_strided_slice %154 {offsets = [0, 128], sizes = [8, 128], strides = [1, 1]} : vector<8x384xf32> to vector<8x128xf32>
    %159 = vector.shape_cast %158 : vector<8x128xf32> to vector<8x2x64xf32>
    %160 = tpu.transpose %159, [1, 0, 2] : vector<8x2x64xf32> -> vector<2x8x64xf32>
    %161 = vector.extract_strided_slice %154 {offsets = [0, 256], sizes = [8, 128], strides = [1, 1]} : vector<8x384xf32> to vector<8x128xf32>
    %162 = vector.shape_cast %161 : vector<8x128xf32> to vector<8x2x64xf32>
    %163 = tpu.transpose %162, [1, 0, 2] : vector<8x2x64xf32> -> vector<2x8x64xf32>
    "tpu.trace_start"() <{level = 10 : i32, message = "hqd,hkd->hqk"}> : () -> ()
    %cst_76 = arith.constant dense<0.000000e+00> : vector<2x8x8xf32>
    %164 = tpu.matmul %157, %160, %cst_76 {dimension_numbers = #tpu.dot_dimension_numbers<[2], [2], [1], [1], [0, 0, 0, 1, 1, 1], [0], [0]>} : vector<2x8x64xf32>, vector<2x8x64xf32>, vector<2x8x8xf32> -> vector<2x8x8xf32>
    "tpu.trace_stop"() : () -> ()
    %165 = vector.shape_cast %26 : vector<1x8xf32> to vector<1x1x8xf32>
    %166 = vector.broadcast %165 : vector<1x1x8xf32> to vector<2x8x8xf32>
    %167 = arith.addf %164, %166 : vector<2x8x8xf32>
    %cst_77 = arith.constant dense<0xFF800000> : vector<2x8xf32>
    %168 = vector.multi_reduction <maximumf>, %167, %cst_77 [2] : vector<2x8x8xf32> to vector<2x8xf32>
    %169 = vector.shape_cast %168 : vector<2x8xf32> to vector<2x8x1xf32>
    %170 = vector.broadcast %169 : vector<2x8x1xf32> to vector<2x8x8xf32>
    %171 = arith.subf %167, %170 : vector<2x8x8xf32>
    %172 = math.exp %171 : vector<2x8x8xf32>
    %cst_78 = arith.constant dense<0.000000e+00> : vector<2x8xf32>
    %173 = vector.multi_reduction <add>, %172, %cst_78 [2] : vector<2x8x8xf32> to vector<2x8xf32>
    %174 = vector.shape_cast %173 : vector<2x8xf32> to vector<2x8x1xf32>
    %175 = tpu.reciprocal %174 {approx = true} : vector<2x8x1xf32> -> vector<2x8x1xf32>
    %176 = vector.broadcast %175 : vector<2x8x1xf32> to vector<2x8x8xf32>
    %177 = arith.mulf %172, %176 : vector<2x8x8xf32>
    "tpu.trace_start"() <{level = 10 : i32, message = "hqk,hkd->hqd"}> : () -> ()
    %cst_79 = arith.constant dense<0.000000e+00> : vector<2x8x64xf32>
    %178 = tpu.matmul %177, %163, %cst_79 {dimension_numbers = #tpu.dot_dimension_numbers<[2], [1], [1], [2], [0, 0, 0, 1, 1, 2], [0], [0]>} : vector<2x8x8xf32>, vector<2x8x64xf32>, vector<2x8x64xf32> -> vector<2x8x64xf32>
    "tpu.trace_stop"() : () -> ()
    %179 = tpu.transpose %178, [1, 0, 2] : vector<2x8x64xf32> -> vector<8x2x64xf32>
    %180 = vector.shape_cast %179 : vector<8x2x64xf32> to vector<8x128xf32>
    %c1_80 = arith.constant 1 : index
    %c0_81 = arith.constant 0 : index
    %c0_82 = arith.constant 0 : index
    %181 = vector.load %arg7[%c1_80, %c0_81, %c0_82] : memref<2x128x128xf32, #tpu.memory_space<vmem>>, vector<1x128x128xf32>
    %182 = vector.shape_cast %181 : vector<1x128x128xf32> to vector<128x128xf32>
    %cst_83 = arith.constant dense<0.000000e+00> : vector<8x128xf32>
    %183 = tpu.matmul %180, %182, %cst_83 {dimension_numbers = #tpu.dot_dimension_numbers<[1], [0], [0], [1], [0, 0, 1, 1], [], []>} : vector<8x128xf32>, vector<128x128xf32>, vector<8x128xf32> -> vector<8x128xf32>
    %c1_84 = arith.constant 1 : index
    %c0_85 = arith.constant 0 : index
    %c0_86 = arith.constant 0 : index
    %184 = vector.load %arg8[%c1_84, %c0_85, %c0_86] : memref<2x1x128xf32, #tpu.memory_space<vmem>>, vector<1x1x128xf32>
    %185 = vector.shape_cast %184 : vector<1x1x128xf32> to vector<1x128xf32>
    %186 = vector.broadcast %185 : vector<1x128xf32> to vector<8x128xf32>
    %187 = arith.addf %183, %186 : vector<8x128xf32>
    %188 = arith.addf %187, %147 : vector<8x128xf32>
    %c1_87 = arith.constant 1 : index
    %c0_88 = arith.constant 0 : index
    %c0_89 = arith.constant 0 : index
    %189 = vector.load %arg9[%c1_87, %c0_88, %c0_89] : memref<2x1x128xf32, #tpu.memory_space<vmem>>, vector<1x1x128xf32>
    %190 = vector.shape_cast %189 : vector<1x1x128xf32> to vector<1x128xf32>
    %c1_90 = arith.constant 1 : index
    %c0_91 = arith.constant 0 : index
    %c0_92 = arith.constant 0 : index
    %191 = vector.load %arg10[%c1_90, %c0_91, %c0_92] : memref<2x1x128xf32, #tpu.memory_space<vmem>>, vector<1x1x128xf32>
    %192 = vector.shape_cast %191 : vector<1x1x128xf32> to vector<1x128xf32>
    %cst_93 = arith.constant dense<0.000000e+00> : vector<8xf32>
    %193 = vector.multi_reduction <add>, %188, %cst_93 [1] : vector<8x128xf32> to vector<8xf32>
    %194 = vector.shape_cast %193 : vector<8xf32> to vector<8x1xf32>
    %cst_94 = arith.constant 1.280000e+02 : f32
    %195 = vector.broadcast %cst_94 : f32 to vector<8x1xf32>
    %196 = arith.divf %194, %195 : vector<8x1xf32>
    %197 = vector.broadcast %196 : vector<8x1xf32> to vector<8x128xf32>
    %198 = arith.subf %188, %197 : vector<8x128xf32>
    %199 = arith.mulf %198, %198 : vector<8x128xf32>
    %cst_95 = arith.constant dense<0.000000e+00> : vector<8xf32>
    %200 = vector.multi_reduction <add>, %199, %cst_95 [1] : vector<8x128xf32> to vector<8xf32>
    %201 = vector.shape_cast %200 : vector<8xf32> to vector<8x1xf32>
    %cst_96 = arith.constant 1.280000e+02 : f32
    %202 = vector.broadcast %cst_96 : f32 to vector<8x1xf32>
    %203 = arith.divf %201, %202 : vector<8x1xf32>
    %204 = vector.broadcast %196 : vector<8x1xf32> to vector<8x128xf32>
    %205 = arith.subf %188, %204 : vector<8x128xf32>
    %cst_97 = arith.constant 9.99999996E-13 : f32
    %206 = vector.broadcast %cst_97 : f32 to vector<8x1xf32>
    %207 = arith.addf %203, %206 : vector<8x1xf32>
    %208 = math.rsqrt %207 : vector<8x1xf32>
    %209 = vector.broadcast %208 : vector<8x1xf32> to vector<8x128xf32>
    %210 = arith.mulf %205, %209 : vector<8x128xf32>
    %211 = vector.broadcast %190 : vector<1x128xf32> to vector<8x128xf32>
    %212 = arith.mulf %210, %211 : vector<8x128xf32>
    %213 = vector.broadcast %192 : vector<1x128xf32> to vector<8x128xf32>
    %214 = arith.addf %212, %213 : vector<8x128xf32>
    %c1_98 = arith.constant 1 : index
    %c0_99 = arith.constant 0 : index
    %c0_100 = arith.constant 0 : index
    %215 = vector.load %arg11[%c1_98, %c0_99, %c0_100] : memref<2x128x512xf32, #tpu.memory_space<vmem>>, vector<1x128x512xf32>
    %216 = vector.shape_cast %215 : vector<1x128x512xf32> to vector<128x512xf32>
    %cst_101 = arith.constant dense<0.000000e+00> : vector<8x512xf32>
    %217 = tpu.matmul %214, %216, %cst_101 {dimension_numbers = #tpu.dot_dimension_numbers<[1], [0], [0], [1], [0, 0, 1, 1], [], []>} : vector<8x128xf32>, vector<128x512xf32>, vector<8x512xf32> -> vector<8x512xf32>
    %c1_102 = arith.constant 1 : index
    %c0_103 = arith.constant 0 : index
    %c0_104 = arith.constant 0 : index
    %218 = vector.load %arg12[%c1_102, %c0_103, %c0_104] : memref<2x1x512xf32, #tpu.memory_space<vmem>>, vector<1x1x512xf32>
    %219 = vector.shape_cast %218 : vector<1x1x512xf32> to vector<1x512xf32>
    %220 = vector.broadcast %219 : vector<1x512xf32> to vector<8x512xf32>
    %221 = arith.addf %217, %220 : vector<8x512xf32>
    %222 = arith.mulf %221, %221 : vector<8x512xf32>
    %223 = arith.mulf %221, %222 : vector<8x512xf32>
    %cst_105 = arith.constant 4.471500e-02 : f32
    %224 = vector.broadcast %cst_105 : f32 to vector<8x512xf32>
    %225 = arith.mulf %224, %223 : vector<8x512xf32>
    %226 = arith.addf %221, %225 : vector<8x512xf32>
    %cst_106 = arith.constant 0.797884583 : f32
    %227 = vector.broadcast %cst_106 : f32 to vector<8x512xf32>
    %228 = arith.mulf %227, %226 : vector<8x512xf32>
    %229 = math.tanh %228 : vector<8x512xf32>
    %cst_107 = arith.constant 1.000000e+00 : f32
    %230 = vector.broadcast %cst_107 : f32 to vector<8x512xf32>
    %231 = arith.addf %230, %229 : vector<8x512xf32>
    %cst_108 = arith.constant 5.000000e-01 : f32
    %232 = vector.broadcast %cst_108 : f32 to vector<8x512xf32>
    %233 = arith.mulf %232, %231 : vector<8x512xf32>
    %234 = arith.mulf %221, %233 : vector<8x512xf32>
    %c1_109 = arith.constant 1 : index
    %c0_110 = arith.constant 0 : index
    %c0_111 = arith.constant 0 : index
    %235 = vector.load %arg13[%c1_109, %c0_110, %c0_111] : memref<2x512x128xf32, #tpu.memory_space<vmem>>, vector<1x512x128xf32>
    %236 = vector.shape_cast %235 : vector<1x512x128xf32> to vector<512x128xf32>
    %cst_112 = arith.constant dense<0.000000e+00> : vector<8x128xf32>
    %237 = tpu.matmul %234, %236, %cst_112 {dimension_numbers = #tpu.dot_dimension_numbers<[1], [0], [0], [1], [0, 0, 1, 1], [], []>} : vector<8x512xf32>, vector<512x128xf32>, vector<8x128xf32> -> vector<8x128xf32>
    %c1_113 = arith.constant 1 : index
    %c0_114 = arith.constant 0 : index
    %c0_115 = arith.constant 0 : index
    %238 = vector.load %arg14[%c1_113, %c0_114, %c0_115] : memref<2x1x128xf32, #tpu.memory_space<vmem>>, vector<1x1x128xf32>
    %239 = vector.shape_cast %238 : vector<1x1x128xf32> to vector<1x128xf32>
    %240 = vector.broadcast %239 : vector<1x128xf32> to vector<8x128xf32>
    %241 = arith.addf %237, %240 : vector<8x128xf32>
    %242 = arith.addf %241, %214 : vector<8x128xf32>
    %c1_116 = arith.constant 1 : index
    %c0_117 = arith.constant 0 : index
    %c0_118 = arith.constant 0 : index
    %243 = vector.load %arg15[%c1_116, %c0_117, %c0_118] : memref<2x1x128xf32, #tpu.memory_space<vmem>>, vector<1x1x128xf32>
    %244 = vector.shape_cast %243 : vector<1x1x128xf32> to vector<1x128xf32>
    %c1_119 = arith.constant 1 : index
    %c0_120 = arith.constant 0 : index
    %c0_121 = arith.constant 0 : index
    %245 = vector.load %arg16[%c1_119, %c0_120, %c0_121] : memref<2x1x128xf32, #tpu.memory_space<vmem>>, vector<1x1x128xf32>
    %246 = vector.shape_cast %245 : vector<1x1x128xf32> to vector<1x128xf32>
    %cst_122 = arith.constant dense<0.000000e+00> : vector<8xf32>
    %247 = vector.multi_reduction <add>, %242, %cst_122 [1] : vector<8x128xf32> to vector<8xf32>
    %248 = vector.shape_cast %247 : vector<8xf32> to vector<8x1xf32>
    %cst_123 = arith.constant 1.280000e+02 : f32
    %249 = vector.broadcast %cst_123 : f32 to vector<8x1xf32>
    %250 = arith.divf %248, %249 : vector<8x1xf32>
    %251 = vector.broadcast %250 : vector<8x1xf32> to vector<8x128xf32>
    %252 = arith.subf %242, %251 : vector<8x128xf32>
    %253 = arith.mulf %252, %252 : vector<8x128xf32>
    %cst_124 = arith.constant dense<0.000000e+00> : vector<8xf32>
    %254 = vector.multi_reduction <add>, %253, %cst_124 [1] : vector<8x128xf32> to vector<8xf32>
    %255 = vector.shape_cast %254 : vector<8xf32> to vector<8x1xf32>
    %cst_125 = arith.constant 1.280000e+02 : f32
    %256 = vector.broadcast %cst_125 : f32 to vector<8x1xf32>
    %257 = arith.divf %255, %256 : vector<8x1xf32>
    %258 = vector.broadcast %250 : vector<8x1xf32> to vector<8x128xf32>
    %259 = arith.subf %242, %258 : vector<8x128xf32>
    %cst_126 = arith.constant 9.99999996E-13 : f32
    %260 = vector.broadcast %cst_126 : f32 to vector<8x1xf32>
    %261 = arith.addf %257, %260 : vector<8x1xf32>
    %262 = math.rsqrt %261 : vector<8x1xf32>
    %263 = vector.broadcast %262 : vector<8x1xf32> to vector<8x128xf32>
    %264 = arith.mulf %259, %263 : vector<8x128xf32>
    %265 = vector.broadcast %244 : vector<1x128xf32> to vector<8x128xf32>
    %266 = arith.mulf %264, %265 : vector<8x128xf32>
    %267 = vector.broadcast %246 : vector<1x128xf32> to vector<8x128xf32>
    %268 = arith.addf %266, %267 : vector<8x128xf32>
    %c0_127 = arith.constant 0 : index
    %c0_128 = arith.constant 0 : index
    %269 = vector.load %arg17[%c0_127, %c0_128] : memref<8x128xf32, #tpu.memory_space<vmem>>, vector<8x128xf32>
    tpu.vector_store %arg17[%c0_127, %c0_128], %268 {strides = array<i32>} : memref<8x128xf32, #tpu.memory_space<vmem>>, vector<8x128xf32>,
    return
  }
  func.func @transform_0(%arg0: i32) -> (i32, i32) {
    %c0_i32 = arith.constant 0 : i32
    %c0_i32_0 = arith.constant 0 : i32
    return %arg0, %c0_i32 : i32, i32
  }
  func.func @transform_1(%arg0: i32) -> (i32, i32, i32) {
    %c0_i32 = arith.constant 0 : i32
    %c0_i32_0 = arith.constant 0 : i32
    %c0_i32_1 = arith.constant 0 : i32
    return %arg0, %c0_i32, %c0_i32_0 : i32, i32, i32
  }
  func.func @transform_2(%arg0: i32) -> (i32, i32) {
    %c0_i32 = arith.constant 0 : i32
    %c0_i32_0 = arith.constant 0 : i32
    %c0_i32_1 = arith.constant 0 : i32
    return %c0_i32, %c0_i32_0 : i32, i32
  }
  func.func @transform_3(%arg0: i32) -> (i32, i32) {
    %c0_i32 = arith.constant 0 : i32
    %c0_i32_0 = arith.constant 0 : i32
    %c0_i32_1 = arith.constant 0 : i32
    return %c0_i32, %c0_i32_0 : i32, i32
  }
  func.func @transform_4(%arg0: i32) -> (i32, i32, i32) {
    %c0_i32 = arith.constant 0 : i32
    %c0_i32_0 = arith.constant 0 : i32
    %c0_i32_1 = arith.constant 0 : i32
    %c0_i32_2 = arith.constant 0 : i32
    return %c0_i32, %c0_i32_0, %c0_i32_1 : i32, i32, i32
  }
  func.func @transform_5(%arg0: i32) -> (i32, i32, i32) {
    %c0_i32 = arith.constant 0 : i32
    %c0_i32_0 = arith.constant 0 : i32
    %c0_i32_1 = arith.constant 0 : i32
    %c0_i32_2 = arith.constant 0 : i32
    return %c0_i32, %c0_i32_0, %c0_i32_1 : i32, i32, i32
  }
  func.func @transform_6(%arg0: i32) -> (i32, i32, i32) {
    %c0_i32 = arith.constant 0 : i32
    %c0_i32_0 = arith.constant 0 : i32
    %c0_i32_1 = arith.constant 0 : i32
    %c0_i32_2 = arith.constant 0 : i32
    return %c0_i32, %c0_i32_0, %c0_i32_1 : i32, i32, i32
  }
  func.func @transform_7(%arg0: i32) -> (i32, i32, i32) {
    %c0_i32 = arith.constant 0 : i32
    %c0_i32_0 = arith.constant 0 : i32
    %c0_i32_1 = arith.constant 0 : i32
    %c0_i32_2 = arith.constant 0 : i32
    return %c0_i32, %c0_i32_0, %c0_i32_1 : i32, i32, i32
  }
  func.func @transform_8(%arg0: i32) -> (i32, i32, i32) {
    %c0_i32 = arith.constant 0 : i32
    %c0_i32_0 = arith.constant 0 : i32
    %c0_i32_1 = arith.constant 0 : i32
    %c0_i32_2 = arith.constant 0 : i32
    return %c0_i32, %c0_i32_0, %c0_i32_1 : i32, i32, i32
  }
  func.func @transform_9(%arg0: i32) -> (i32, i32, i32) {
    %c0_i32 = arith.constant 0 : i32
    %c0_i32_0 = arith.constant 0 : i32
    %c0_i32_1 = arith.constant 0 : i32
    %c0_i32_2 = arith.constant 0 : i32
    return %c0_i32, %c0_i32_0, %c0_i32_1 : i32, i32, i32
  }
  func.func @transform_10(%arg0: i32) -> (i32, i32, i32) {
    %c0_i32 = arith.constant 0 : i32
    %c0_i32_0 = arith.constant 0 : i32
    %c0_i32_1 = arith.constant 0 : i32
    %c0_i32_2 = arith.constant 0 : i32
    return %c0_i32, %c0_i32_0, %c0_i32_1 : i32, i32, i32
  }
  func.func @transform_11(%arg0: i32) -> (i32, i32, i32) {
    %c0_i32 = arith.constant 0 : i32
    %c0_i32_0 = arith.constant 0 : i32
    %c0_i32_1 = arith.constant 0 : i32
    %c0_i32_2 = arith.constant 0 : i32
    return %c0_i32, %c0_i32_0, %c0_i32_1 : i32, i32, i32
  }
  func.func @transform_12(%arg0: i32) -> (i32, i32, i32) {
    %c0_i32 = arith.constant 0 : i32
    %c0_i32_0 = arith.constant 0 : i32
    %c0_i32_1 = arith.constant 0 : i32
    %c0_i32_2 = arith.constant 0 : i32
    return %c0_i32, %c0_i32_0, %c0_i32_1 : i32, i32, i32
  }
  func.func @transform_13(%arg0: i32) -> (i32, i32, i32) {
    %c0_i32 = arith.constant 0 : i32
    %c0_i32_0 = arith.constant 0 : i32
    %c0_i32_1 = arith.constant 0 : i32
    %c0_i32_2 = arith.constant 0 : i32
    return %c0_i32, %c0_i32_0, %c0_i32_1 : i32, i32, i32
  }
  func.func @transform_14(%arg0: i32) -> (i32, i32, i32) {
    %c0_i32 = arith.constant 0 : i32
    %c0_i32_0 = arith.constant 0 : i32
    %c0_i32_1 = arith.constant 0 : i32
    %c0_i32_2 = arith.constant 0 : i32
    return %c0_i32, %c0_i32_0, %c0_i32_1 : i32, i32, i32
  }
  func.func @transform_15(%arg0: i32) -> (i32, i32, i32) {
    %c0_i32 = arith.constant 0 : i32
    %c0_i32_0 = arith.constant 0 : i32
    %c0_i32_1 = arith.constant 0 : i32
    %c0_i32_2 = arith.constant 0 : i32
    return %c0_i32, %c0_i32_0, %c0_i32_1 : i32, i32, i32
  }
  func.func @transform_16(%arg0: i32) -> (i32, i32) {
    %c0_i32 = arith.constant 0 : i32
    %c0_i32_0 = arith.constant 0 : i32
    return %arg0, %c0_i32 : i32, i32
  }
}

</mosaic_0001>

<bundles_post_ra>
// kernel: tpu_custom_call.1
= control target key start
LH: loop header
LB: loop body
LE: loop exit
PB: predicated region body
PF: predicated region fallthrough
CT: control target
= control target key end

     0   :  { %s6358_s0 = inlined_call_operand.hbm [shape: f32[16,128], index: 0, kind: input, shape index: {}]   ;;  %s6359_s1 = inlined_call_operand.hbm [shape: f32[2,1,8], index: 1, kind: input, shape index: {}]   ;;  %s6360_s2 = inlined_call_operand.hbm [shape: f32[1,128], index: 2, kind: input, shape index: {}]   ;;  %s6361_s3 = inlined_call_operand.hbm [shape: f32[1,128], index: 3, kind: input, shape index: {}]   ;;  %s6362_s4 = inlined_call_operand.hbm [shape: f32[2,128,384], index: 4, kind: input, shape index: {}]   ;;  %s6363_s5 = inlined_call_operand.vmem [shape: f32[2,1,384], index: 5, kind: input, shape index: {}]   ;;  %s6364_s6 = inlined_call_operand.hbm [shape: f32[2,128,128], index: 6, kind: input, shape index: {}]   ;;  %s6365_s7 = inlined_call_operand.vmem [shape: f32[2,1,128], index: 7, kind: input, shape index: {}]   ;;  %s6366_s8 = inlined_call_operand.vmem [shape: f32[2,1,128], index: 8, kind: input, shape index: {}]   ;;  %s6367_s9 = inlined_call_operand.vmem [shape: f32[2,1,128], index: 9, kind: input, shape index: {}]   ;;  %s6368_s10 = inlined_call_operand.hbm [shape: f32[2,128,512], index: 10, kind: input, shape index: {}]   ;;  %s6369_s11 = inlined_call_operand.vmem [shape: f32[2,1,512], index: 11, kind: input, shape index: {}]   ;;  %s6370_s12 = inlined_call_operand.hbm [shape: f32[2,512,128], index: 12, kind: input, shape index: {}]   ;;  %s6371_s13 = inlined_call_operand.vmem [shape: f32[2,1,128], index: 13, kind: input, shape index: {}]   ;;  %s6372_s14 = inlined_call_operand.vmem [shape: f32[2,1,128], index: 14, kind: input, shape index: {}]   ;;  %s6373_s15 = inlined_call_operand.vmem [shape: f32[2,1,128], index: 15, kind: input, shape index: {}]   ;;  %s6374_s16 = inlined_call_operand.hbm [shape: f32[16,128], index: 16, kind: output, shape index: {}]  }
   0x1   :  { %6389 = sst [smem:[#allocation24_spill]] %s6358_s0 }
   0x2   :  { %6390 = sst [smem:[#allocation25_spill]] %s6360_s2 }
   0x3   :  { %6391 = sst [smem:[#allocation26_spill]] %s6361_s3 }
   0x4   :  { %6392 = sst [smem:[#allocation27_spill]] %s6362_s4 }
   0x5   :  { %6393 = sst [smem:[#allocation28_spill]] %s6364_s6 }
   0x6   :  { %6394 = sst [smem:[#allocation29_spill]] %s6368_s10 }
   0x7   :  { %6395 = sst [smem:[#allocation30_spill]] %s6369_s11 }
   0x8   :  { %6396 = sst [smem:[#allocation31_spill]] %s6371_s13 }
   0x9   :  { %6397 = sst [smem:[#allocation32_spill]] %s6372_s14 }
   0xa   :  { %6398 = sst [smem:[#allocation33_spill]] %s6373_s15 }
   0xb   :  { %6399 = sst [smem:[#allocation34_spill]] %s6374_s16 }
   0xc   :  { %21 = vsyncpa [#allocation3], 0 }
   0xd   :  { %23 = vsyncpa [#allocation3 + $0x1], 0 }
   0xe   :  { %24 = vsyncpa [#allocation6], 0 }
   0xf   :  { %26 = vsyncpa [#allocation6 + $0x1], 0 }
  0x10   :  { %27 = vsyncpa [#allocation9], 0 }
  0x11   :  { %28 = vsyncpa [#allocation12], 0 }
  0x12   :  { %29 = vsyncpa [#allocation15], 0 }
  0x13   :  { %30 = vsyncpa [#allocation4], 0 }
  0x14   :  { %32 = vsyncpa [#allocation4 + $0x1], 0  ;;  %s5613_s21 = smov 0   ;;  %s5615_s22 = smov 0  }
  0x15   :  { %s5617_s23 = smov 0   ;;  %s5619_s24 = smov 0  }
  0x16 LB: > { %s5507_s25 = smov [#allocation7]   ;;  %s5634_s27 = sadd.s32 4294967295, %s5505_s24   ;;  %s5505_s24 = sphi %s5619_s24, %s6439_s24   ;;  %s5501_s23 = sphi %s5617_s23, %s6438_s23   ;;  %s5497_s22 = sphi %s5615_s22, %s6437_s22   ;;  %s5493_s21 = sphi %s5613_s21, %s6436_s21  }
  0x17   : > { %s428_s26 = sshll.u32 %s5507_s25, 4  ;;  %p4129_p0 = scmp.ge.s32.totalorder %s5505_s24, 1  ;;  %s5639_s26 = int_to_ptr.vmem [resolvable:$true] %s428_s26 }
  0x18   : > { %p6381_p1 = scmp.eq.s32.totalorder %s5634_s27, 0  ;;  %p415_p2 = scmp.lt.s32.totalorder %s5505_s24, 3 }
  0x19   : > { %s5508_s29 = smov [#allocation8]   ;;  %s5509_s0 = smov [#allocation11]  }
  0x1a   : > { %p5641_p3 = pnand %p4129_p0, %p415_p2  ;;  %s439_s30 = sshll.u32 %s5508_s29, 4  ;;  %s5648_s30 = int_to_ptr.vmem [resolvable:$true] %s439_s30 }
  0x1b   : > { %s465_s17 = sshll.u32 %s5509_s0, 4  ;;  %s6402_s2 = sld [smem:[#allocation25_spill]]  ;;  %s5656_s17 = int_to_ptr.vmem [resolvable:$true] %s465_s17 }
  0x1c   : > { %s6400_s28 = scalar_select %p5641_p3, 1, 0 }
  0x1d   : > { %p5054_p5 = pneg %p5641_p3 }
  0x1f   : > { %p5652_p6 = pnand %p5054_p5, %p6381_p1 }
  0x21   : > { %s5191_s25 = scalar_lea.hbm %s6402_s2, 16  ;;  %p5666_p8 = pneg %p5652_p6 }
  0x22   : > { %p5192_p7 = scmp.ne.s32.totalorder %s6402_s2, %s5191_s25  ;;  %p5198_p11 = scmp.lt.u32.totalorder %s5191_s25, %s6402_s2 }
  0x24   : > { %p5194_p9 = pnand %p5666_p8, %p5192_p7 }
  0x26   : > { %p5195_p10 = pneg %p5194_p9 }
  0x28   : > { %p5200_p12 = pnand %p5198_p11, %p5195_p10 }
  0x2a   : > { %5203 = shalt.err (!%p5200_p12)
}
  0x2b   : > { %s5204_s15 = scalar_lea.vmem %s5639_s26, 16  ;;  %s5211_s16 = scalar_lea.vmem %s5639_s26, 32 }
  0x2c   : > { %p5205_p13 = scmp.ne.s32.totalorder %s5639_s26, %s5204_s15  ;;  %p5212_p5 = scmp.lt.s32.totalorder %s5639_s26, %s5639_s26 }
  0x2d   : > { %p5213_p7 = scmp.lt.s32.totalorder %s5211_s16, %s5204_s15 }
  0x2e   : > { %p5207_p0 = pnand %p5205_p13, %p5666_p8 }
  0x2f   : > { %p5214_p9 = por %p5213_p7, %p5212_p5 }
  0x30   : > { %p5208_p2 = pneg %p5207_p0 }
  0x32   : > { %p5215_p4 = pnand %p5214_p9, %p5208_p2 }
  0x34   : > { %5218 = shalt.err (!%p5215_p4)
}
  0x35   : > { %5057 = dma.hbm_to_vmem [thread:$0]  (!%p5652_p6), %s6402_s2, 16, %s5639_s26, [#allocation6]  }
  0x36   : > { %s6404_s3 = sld [smem:[#allocation26_spill]] }
  0x3c   : > { %s5219_s0 = scalar_lea.hbm %s6404_s3, 16 }
  0x3d   : > { %p5220_p10 = scmp.ne.s32.totalorder %s6404_s3, %s5219_s0  ;;  %p5226_p4 = scmp.lt.u32.totalorder %s5219_s0, %s6404_s3 }
  0x3f   : > { %p5222_p11 = pnand %p5220_p10, %p5666_p8 }
  0x41   : > { %p5223_p12 = pneg %p5222_p11 }
  0x43   : > { %p5228_p13 = pnand %p5226_p4, %p5223_p12 }
  0x45   : > { %5231 = shalt.err (!%p5228_p13)
}
  0x46   : > { %s5232_s26 = scalar_lea.vmem %s5648_s30, 16  ;;  %s5239_s11 = scalar_lea.vmem %s5648_s30, 32 }
  0x47   : > { %p5233_p0 = scmp.ne.s32.totalorder %s5648_s30, %s5232_s26  ;;  %p5240_p7 = scmp.lt.s32.totalorder %s5648_s30, %s5648_s30 }
  0x48   : > { %p5241_p9 = scmp.lt.s32.totalorder %s5239_s11, %s5232_s26 }
  0x49   : > { %p5235_p2 = pnand %p5233_p0, %p5666_p8 }
  0x4a   : > { %p5242_p10 = por %p5241_p9, %p5240_p7 }
  0x4b   : > { %p5236_p5 = pneg %p5235_p2 }
  0x4d   : > { %p5243_p11 = pnand %p5242_p10, %p5236_p5 }
  0x4f   : > { %5246 = shalt.err (!%p5243_p11)
}
  0x50   : > { %5060 = dma.hbm_to_vmem [thread:$0]  (!%p5652_p6), %s6404_s3, 16, %s5648_s30, [#allocation9]  }
  0x51   : > { %s6405_s6 = sld [smem:[#allocation28_spill]] }
  0x57   : > { %s5247_s25 = scalar_lea.hbm %s6405_s6, 4096 }
  0x58   : > { %p5248_p12 = scmp.ne.s32.totalorder %s6405_s6, %s5247_s25  ;;  %p5254_p0 = scmp.lt.u32.totalorder %s5247_s25, %s6405_s6 }
  0x5a   : > { %p5250_p4 = pnand %p5248_p12, %p5666_p8 }
  0x5c   : > { %p5251_p13 = pneg %p5250_p4 }
  0x5e   : > { %p5256_p2 = pnand %p5254_p0, %p5251_p13 }
  0x60   : > { %5259 = shalt.err (!%p5256_p2)
}
  0x61   : > { %s5260_s30 = scalar_lea.vmem %s5656_s17, 4096  ;;  %p5268_p10 = scmp.lt.s32.totalorder %s5656_s17, %s5656_s17 }
  0x62   : > { %p5261_p5 = scmp.ne.s32.totalorder %s5656_s17, %s5260_s30  ;;  %p5269_p11 = scmp.lt.s32.totalorder %s5260_s30, %s5260_s30 }
  0x64   : > { %p5263_p7 = pnand %p5261_p5, %p5666_p8  ;;  %p5270_p12 = por %p5269_p11, %p5268_p10 }
  0x66   : > { %p5264_p9 = pneg %p5263_p7 }
  0x68   : > { %p5271_p4 = pnand %p5270_p12, %p5264_p9 }
  0x6a   : > { %5274 = shalt.err (!%p5271_p4)
}
  0x6b   : > { %s6383_s11 = smov 128   ;;  %s6384_s13 = smov 8  }
  0x6c   : > { %5066 = dma.hbm_to_vmem [thread:$0]  (!%p5652_p6), %s6405_s6, 4096, %s5656_s17, [#allocation12], %s6383_s11, %s6383_s11, %s6384_s13  }
  0x6d   : > { %s5512_s20 = smov [#allocation10]   ;;  %s6406_s4 = sld [smem:[#allocation27_spill]] }
  0x6e   : > { %s449_s25 = sshll.u32 %s5512_s20, 4  ;;  %s450_s25 = int_to_ptr.vmem [resolvable:$true] %s449_s25 }
  0x73   : > { %s5275_s16 = scalar_lea.hbm %s6406_s4, 12288 }
  0x74   : > { %p5276_p13 = scmp.ne.s32.totalorder %s6406_s4, %s5275_s16  ;;  %p5282_p5 = scmp.lt.u32.totalorder %s5275_s16, %s6406_s4 }
  0x76   : > { %p5278_p0 = pnand %p5276_p13, %p5666_p8 }
  0x78   : > { %p5279_p2 = pneg %p5278_p0 }
  0x7a   : > { %p5284_p7 = pnand %p5282_p5, %p5279_p2 }
  0x7c   : > { %5287 = shalt.err (!%p5284_p7)
}
  0x7d   : > { %s5288_s17 = scalar_lea.vmem %s450_s25, 12288  ;;  %p5296_p12 = scmp.lt.s32.totalorder %s450_s25, %s450_s25 }
  0x7e   : > { %p5289_p9 = scmp.ne.s32.totalorder %s450_s25, %s5288_s17  ;;  %p5297_p4 = scmp.lt.s32.totalorder %s5288_s17, %s5288_s17 }
  0x80   : > { %p5291_p10 = pnand %p5289_p9, %p5666_p8  ;;  %p5298_p1 = por %p5297_p4, %p5296_p12 }
  0x82   : > { %p5292_p11 = pneg %p5291_p10 }
  0x84   : > { %p5299_p3 = pnand %p5298_p1, %p5292_p11 }
  0x86   : > { %5302 = shalt.err (!%p5299_p3)
}
  0x87   : > { %s5513_s14 = smov 384   ;;  %s5514_s19 = smov 24  }
  0x88   : > { %5063 = dma.hbm_to_vmem [thread:$0]  (!%p5652_p6), %s6406_s4, 12288, %s450_s25, [#allocation9], %s5513_s14, %s5513_s14, %s5514_s19  }
  0x89   : > { %s5515_s20 = smov [#allocation13]   ;;  %s6407_s10 = sld [smem:[#allocation29_spill]] }
  0x8a   : > { %s487_s0 = sshll.u32 %s5515_s20, 4  ;;  %s488_s0 = int_to_ptr.vmem [resolvable:$true] %s487_s0 }
  0x8f   : > { %s5303_s26 = scalar_lea.hbm %s6407_s10, 16384 }
  0x90   : > { %p5304_p1 = scmp.ne.s32.totalorder %s6407_s10, %s5303_s26  ;;  %p5310_p0 = scmp.lt.u32.totalorder %s5303_s26, %s6407_s10 }
  0x92   : > { %p5306_p3 = pnand %p5304_p1, %p5666_p8 }
  0x94   : > { %p5307_p13 = pneg %p5306_p3 }
  0x96   : > { %p5312_p2 = pnand %p5310_p0, %p5307_p13 }
  0x98   : > { %5315 = shalt.err (!%p5312_p2)
}
  0x99   : > { %s5316_s25 = scalar_lea.vmem %s488_s0, 16384  ;;  %p5324_p10 = scmp.lt.s32.totalorder %s488_s0, %s488_s0 }
  0x9a   : > { %p5317_p5 = scmp.ne.s32.totalorder %s488_s0, %s5316_s25  ;;  %p5325_p11 = scmp.lt.s32.totalorder %s5316_s25, %s5316_s25 }
  0x9c   : > { %p5319_p7 = pnand %p5317_p5, %p5666_p8  ;;  %p5326_p12 = por %p5325_p11, %p5324_p10 }
  0x9e   : > { %p5320_p9 = pneg %p5319_p7 }
  0xa0   : > { %p5327_p4 = pnand %p5326_p12, %p5320_p9 }
  0xa2   : > { %5330 = shalt.err (!%p5327_p4)
}
  0xa3   : > { %s5516_s14 = smov 512   ;;  %s5517_s19 = smov 32  }
  0xa4   : > { %5069 = dma.hbm_to_vmem [thread:$0]  (!%p5652_p6), %s6407_s10, 16384, %s488_s0, [#allocation12], %s5516_s14, %s5516_s14, %s5517_s19  }
  0xa5   : > { %s5518_s2 = smov [#allocation14]   ;;  %s5331_s16 = scalar_lea.hbm %s6370_s12, 16384 }
  0xa6   : > { %s503_s3 = sshll.u32 %s5518_s2, 4  ;;  %p5332_p1 = scmp.ne.s32.totalorder %s6370_s12, %s5331_s16  ;;  %s504_s3 = int_to_ptr.vmem [resolvable:$true] %s503_s3 }
  0xa7   : > { %p5338_p0 = scmp.lt.u32.totalorder %s5331_s16, %s6370_s12 }
  0xa8   : > { %p5334_p3 = pnand %p5332_p1, %p5666_p8 }
  0xaa   : > { %p5335_p13 = pneg %p5334_p3 }
  0xac   : > { %p5340_p2 = pnand %p5338_p0, %p5335_p13 }
  0xae   : > { %5343 = shalt.err (!%p5340_p2)
}
  0xaf   : > { %s5344_s0 = scalar_lea.vmem %s504_s3, 16384  ;;  %p5352_p10 = scmp.lt.s32.totalorder %s504_s3, %s504_s3 }
  0xb0   : > { %p5345_p5 = scmp.ne.s32.totalorder %s504_s3, %s5344_s0  ;;  %p5353_p11 = scmp.lt.s32.totalorder %s5344_s0, %s5344_s0 }
  0xb2   : > { %p5347_p7 = pnand %p5345_p5, %p5666_p8  ;;  %p5354_p12 = por %p5353_p11, %p5352_p10 }
  0xb4   : > { %p5348_p9 = pneg %p5347_p7 }
  0xb6   : > { %p5355_p4 = pnand %p5354_p12, %p5348_p9 }
  0xb8   : > { %5358 = shalt.err (!%p5355_p4)
}
  0xb9   : > { %s6408_s14 = smov 8   ;;  %s6409_s19 = smov 128  }
  0xba   : > { %5072 = dma.hbm_to_vmem [thread:$0]  (!%p5652_p6), %s6370_s12, 16384, %s504_s3, [#allocation15], %s6409_s19, %s6409_s19, %s6408_s14  }
  0xbb   : > { %s4128_s18 = sadd.s32 4294967294, %s5505_s24   ;;  %s5797_s29 = sadd.s32 1, %s5505_s24  }
  0xbc   : > { %s42_s2 = ssub.s32 %s5505_s24, %s5797_s29  ;;  %s45_s20 = sadd.s32 1, %s5501_s23 }
  0xbd   : > { %p43_p8 = scmp.eq.s32.totalorder %s42_s2, 0  ;;  %p52_p1 = scmp.ne.s32.totalorder %s5501_s23, %s5497_s22 }
  0xbe   : > { %p53_p3 = scmp.eq.s32.totalorder %s5505_s24, 0  ;;  %p58_p13 = scmp.ne.s32.totalorder %s5497_s22, %s5493_s21 }
  0xbf   : > { %s5808_s15 = scalar_select %p43_p8, %s5501_s23, %s45_s20  }
  0xc0   : > { %p5810_p0 = por %p53_p3, %p52_p1  ;;  %p6411_p2 = scmp.eq.s32.totalorder %s5634_s27, 0 }
  0xc1   : > { %p402_p5 = scmp.eq.s32.totalorder %s5634_s27, 1  ;;  %p408_p7 = scmp.eq.s32.totalorder %s4128_s18, 1 }
  0xc2   : > { %p5816_p6 = por %p6411_p2, %p58_p13  ;;  %p5090_p9 = scmp.lt.s32.totalorder %s5505_s24, 2 }
  0xc3   : > { %s5823_s26 = sand.u32 1, %s5501_s23   ;;  %p5825_p10 = por %p402_p5, %p52_p1 }
  0xc4   : > { %s6412_s3 = scalar_select %p5816_p6, 1, 0 }
  0xc5   : > { %s6413_s30 = scalar_select %p5825_p10, 1, 0 }
  0xc6   : > { %p5829_p11 = por %p408_p7, %p58_p13  ;;  %s4137_s25 = sshll.u32 %s5823_s26, 3 }
  0xc7   : > { %s4138_s0 = sshll.u32 %s5505_s24, 7  ;;  %s6415_s11 = sld [smem:[#allocation24_spill]] }
  0xc8   : > { %s6414_s17 = scalar_select %p5829_p11, 1, 0 }
  0xc9   : > { %s530_s18 = scalar_lea.vmem [#allocation2], %s4137_s25  ;;  %p5844_p12 = pnand %p5090_p9, %p5810_p0 }
  0xca   : > { %s537_s2 = sshll.u32 %s530_s18, 4  ;;  %s527_s6 = scalar_lea.sflag [#allocation3], %s5823_s26  ;;  %s5840_s2 = int_to_ptr.vmem [resolvable:$true] %s537_s2 }
  0xcb   : > { %p5361_p8 = pneg %p5844_p12 }
  0xcd   : > { %s5838_s13 = scalar_lea.hbm %s6415_s11, %s4138_s0  ;;  %s5364_s16 = scalar_lea.hbm %s6415_s11, 256 }
  0xce   : > { %s5359_s14 = scalar_lea.hbm %s5838_s13, 128  ;;  %p5365_p13 = scmp.lt.u32.totalorder %s5838_s13, %s6415_s11 }
  0xcf   : > { %p5360_p4 = scmp.ne.s32.totalorder %s5838_s13, %s5359_s14  ;;  %p5366_p0 = scmp.lt.u32.totalorder %s5364_s16, %s5359_s14 }
  0xd0   : > { %p5368_p5 = scmp.lt.u32.totalorder %s5359_s14, %s5838_s13 }
  0xd1   : > { %p5362_p1 = pnand %p5361_p8, %p5360_p4  ;;  %p5367_p2 = por %p5366_p0, %p5365_p13 }
  0xd3   : > { %p5363_p3 = pneg %p5362_p1  ;;  %p5369_p7 = por %p5368_p5, %p5367_p2 }
  0xd5   : > { %p5370_p9 = pnand %p5369_p7, %p5363_p3 }
  0xd7   : > { %5373 = shalt.err (!%p5370_p9)
}
  0xd8   : > { %s5374_s4 = scalar_lea.vmem %s5840_s2, 128  ;;  %s5519_s25 = smov [#allocation2]  }
  0xd9   : > { %p5375_p4 = scmp.ne.s32.totalorder %s5840_s2, %s5374_s4  ;;  %s5379_s0 = sshll.u32 %s5519_s25, 4  ;;  %s5380_s0 = int_to_ptr.vmem [resolvable:$false] %s5379_s0 }
  0xda   : > { %s5381_s19 = scalar_lea.vmem %s5380_s0, 256  ;;  %p5382_p10 = scmp.lt.s32.totalorder %s5840_s2, %s5380_s0 }
  0xdb   : > { %p5377_p1 = pnand %p5375_p4, %p5361_p8  ;;  %p5383_p13 = scmp.lt.s32.totalorder %s5381_s19, %s5374_s4 }
  0xdd   : > { %p5378_p11 = pneg %p5377_p1  ;;  %p5384_p0 = por %p5383_p13, %p5382_p10 }
  0xdf   : > { %p5385_p2 = pnand %p5384_p0, %p5378_p11 }
  0xe1   : > { %5388 = shalt.err (!%p5385_p2)
}
  0xe2   : > { %5076 = dma.hbm_to_vmem [thread:$0]  (!%p5844_p12), %s5838_s13, 128, %s5840_s2, %s527_s6  }
  0xe3   : > { %s4139_s14 = sshll.u32 %s5505_s24, 4  ;;  %s547_s16 = scalar_lea.vmem [#allocation5], %s5823_s26 }
  0xe4   : > { %s554_s18 = sshll.u32 %s547_s16, 4  ;;  %s5880_s0 = scalar_lea.hbm %s6359_s1, %s4139_s14  ;;  %s555_s18 = int_to_ptr.vmem [resolvable:$true] %s554_s18 }
  0xe5   : > { %s6417_s4 = sand.u32 1, %s5505_s24   ;;  %s5389_s11 = scalar_lea.hbm %s5880_s0, 16 }
  0xe6   : > { %s545_s19 = scalar_lea.sflag [#allocation6], %s6417_s4  ;;  %p5390_p10 = scmp.ne.s32.totalorder %s5880_s0, %s5389_s11 }
  0xe7   : > { %s5394_s13 = scalar_lea.hbm %s6359_s1, 32  ;;  %p5395_p5 = scmp.lt.u32.totalorder %s5880_s0, %s6359_s1 }
  0xe8   : > { %p5392_p11 = pnand %p5390_p10, %p5361_p8  ;;  %p5396_p7 = scmp.lt.u32.totalorder %s5394_s13, %s5389_s11 }
  0xe9   : > { %p5398_p4 = scmp.lt.u32.totalorder %s5389_s11, %s5880_s0 }
  0xea   : > { %p5393_p3 = pneg %p5392_p11  ;;  %p5397_p9 = por %p5396_p7, %p5395_p5 }
  0xec   : > { %p5399_p1 = por %p5398_p4, %p5397_p9 }
  0xee   : > { %p5400_p13 = pnand %p5399_p1, %p5393_p3 }
  0xf0   : > { %5403 = shalt.err (!%p5400_p13)
}
  0xf1   : > { %s5404_s14 = scalar_lea.vmem %s555_s18, 16  ;;  %s5520_s16 = smov [#allocation5]  }
  0xf2   : > { %p5405_p0 = scmp.ne.s32.totalorder %s555_s18, %s5404_s14  ;;  %s5409_s25 = sshll.u32 %s5520_s16, 4  ;;  %s5410_s25 = int_to_ptr.vmem [resolvable:$false] %s5409_s25 }
  0xf3   : > { %s5411_s4 = scalar_lea.vmem %s5410_s25, 32  ;;  %p5412_p11 = scmp.lt.s32.totalorder %s555_s18, %s5410_s25 }
  0xf4   : > { %p5407_p2 = pnand %p5405_p0, %p5361_p8  ;;  %p5413_p6 = scmp.lt.s32.totalorder %s5411_s4, %s5404_s14 }
  0xf6   : > { %p5408_p10 = pneg %p5407_p2  ;;  %p5414_p5 = por %p5413_p6, %p5412_p11 }
  0xf8   : > { %p5415_p7 = pnand %p5414_p5, %p5408_p10 }
  0xfa   : > { %5418 = shalt.err (!%p5415_p7)
}
  0xfb   : > { %5079 = dma.hbm_to_vmem [thread:$0]  (!%p5844_p12), %s5880_s0, 16, %s555_s18, %s545_s19  }
  0xfc   : > { %p6418_p3 = scmp.ne.s32.totalorder %s6400_s28, 0 }
  0xfd   : > { %s5906_s11 = sand.u32 (!%p6418_p3), 1, %s5497_s22   ;;  %p6419_p6 = scmp.ne.s32.totalorder (!%p6418_p3), %s6412_s3, 0 }
  0xfe   : > { %563 = sbr.rel (%p6418_p3) target bundleno = 5700 (0x1644), region = 84  ;;  %s4141_s6 = sshll.u32 (!%p6418_p3), %s5906_s11, 3 }
  0xff   : > { %s566_s26 = scalar_lea.sflag (!%p6418_p3), [#allocation3], %s5906_s11  ;;  %s569_s13 = scalar_lea.vmem (!%p6418_p3), [#allocation2], %s4141_s6 }
 0x105   : > { %5464 = dma.done.wait (%p6419_p6), %s566_s26, 128  }
 0x106   : > { %5466 = vsyncadd (%p6419_p6), %s566_s26, 4294967168  ;;  %s574_s28 = sand.u32 1, %s5634_s27   ;;  %s577_s18 = scalar_lea.vmem [#allocation5], %s5906_s11 }
 0x107   : > { %s575_s20 = scalar_lea.sflag [#allocation6], %s574_s28 }
 0x108   : > { %5468 = dma.done.wait (%p6419_p6), %s575_s20, 16  }
 0x109   : > { %5470 = vsyncadd (%p6419_p6), %s575_s20, 4294967280  ;;  %p6420_p12 = scmp.eq.s32.totalorder %s5634_s27, 0 }
 0x10b   : > { %5472 = dma.done.wait (%p6420_p12), [#allocation6], 16   ;;  %p6421_p8 = pmov %p6420_p12 }
 0x10d   : > { %5474 = vsyncadd (%p6421_p8), [#allocation6], 4294967280  ;;  %p6422_p9 = pmov %p6421_p8 }
 0x10e   : > { %p6423_p4 = pmov %p6421_p8 }
 0x10f   : > { %5476 = dma.done.wait (%p6422_p9), [#allocation9], 12304  }
 0x110   : > { %5478 = vsyncadd (%p6423_p4), [#allocation9], 4294954992  ;;  %p6424_p1 = pmov %p6423_p4 }
 0x112   : > { %5480 = dma.done.wait (%p6424_p1), [#allocation12], 20480   ;;  %p6425_p13 = pmov %p6424_p1 }
 0x113   : > { %p6426_p0 = pmov %p6424_p1 }
 0x114   : > { %5482 = vsyncadd (%p6425_p13), [#allocation12], 4294946816 }
 0x115   : > { %5484 = dma.done.wait (%p6426_p0), [#allocation15], 16384   ;;  %p6427_p2 = pmov %p6426_p0 }
 0x116   : > { %v654_v0 = vld [vmem:[%s569_s13] sm:$0xff]  ;;  %v688_v2 = vld [vmem:[#allocation10 + $0x20] sm:$0xff]  ;;  %v5521_v5 = vmov 0.0|0.0   ;;  %v5522_v57 = vmov 0.0   ;;  %vm5523_vm0 = vmmov 0   ;;  %s5524_s19 = smov 64  }
 0x117   : > { %5486 = vsyncadd (%p6427_p2), [#allocation15], 4294950912  ;;  %657 = vadd.xlane.f32.xlu0 %v654_v0  ;;  %v685_v1 = vld [vmem:[#allocation10 + $0x8] sm:$0xff]  ;;  %v684_v3 = vld [vmem:[#allocation10] sm:$0xff]  ;;  %4640 = vmatprep.subr.bf16.mxu1 %v5521_v5  ;;  %vm1256_vm1 = vcmask 523264   ;;  %vm1409_vm2 = vcmask 64512  }
 0x118   : > { %v4608_v4 = vpack.c.bf16 %v688_v2, %v685_v1  ;;  %v687_v6 = vld [vmem:[#allocation10 + $0x18] sm:$0xff]  ;;  %v686_v7 = vld [vmem:[#allocation10 + $0x10] sm:$0xff]  ;;  %v689_v8 = vld [vmem:[#allocation10 + $0x28] sm:$0xff]  ;;  %813 = vmatprep.mubr.f32.mxu0 %v5522_v57  ;;  %4460 = vmatprep.mubr.msk.f32.mxu1 %vm5523_vm0, %v5522_v57  ;;  %s6428_s28 = sld [smem:[#allocation30_spill]]  ;;  %s6429_s0 = sld [smem:[#allocation31_spill]] }
 0x119   : > { %v4610_v9 = vpack.c.bf16 %v687_v6, %v684_v3  ;;  %v4641_v10 = vpack.c.bf16 %v689_v8, %v686_v7  ;;  %v691_v11 = vld [vmem:[#allocation10 + $0x38] sm:$0xff]  ;;  %v694_v12 = vld [vmem:[#allocation10 + $0x50] sm:$0xff]  ;;  %v693_v15 = vld [vmem:[#allocation10 + $0x48] sm:$0xff]  ;;  %s6430_s14 = sld [smem:[#allocation32_spill]]  ;;  %s6431_s4 = sld [smem:[#allocation33_spill]] }
 0x11a   : > { %v690_v13 = vld [vmem:[#allocation10 + $0x30] sm:$0xff]  ;;  %4609 = vmatprep.subr.bf16.mxu0 %v4608_v4  ;;  %v4612_v14 = vpack.c.bf16 %v694_v12, %v691_v11  ;;  %v692_v16 = vld [vmem:[#allocation10 + $0x40] sm:$0xff]  ;;  %v695_v17 = vld [vmem:[#allocation10 + $0x58] sm:$0xff]  ;;  %s4201_s10 = sshll.u32 %s5634_s27, 7  ;;  %s653_s2 = scalar_lea.vmem [#allocation16], %s4141_s6 }
 0x11b   : > { %4611 = vmatpush1.bf16.msra.mxu0 %v4610_v9  ;;  %4642 = vmatpush3.bf16.msra.mxu1 %v4641_v10  ;;  %v4614_v18 = vpack.c.bf16 %v693_v15, %v690_v13  ;;  %v4644_v19 = vpack.c.bf16 %v695_v17, %v692_v16  ;;  %v697_v20 = vld [vmem:[#allocation10 + $0x68] sm:$0xff]  ;;  %v700_v21 = vld [vmem:[#allocation10 + $0x80] sm:$0xff]  ;;  %v699_v24 = vld [vmem:[#allocation10 + $0x78] sm:$0xff]  ;;  %s3981_s16 = sshll.u32 %s653_s2, 4  ;;  %s6432_s13 = sld [smem:[#allocation34_spill]]  ;;  %s6316_s16 = int_to_ptr.vmem [resolvable:$true] %s3981_s16 }
 0x11c   : > { %v696_v22 = vld [vmem:[#allocation10 + $0x60] sm:$0xff]  ;;  %4613 = vmatprep.subr.bf16.mxu0 %v4612_v14  ;;  %4643 = vmatprep.subr.bf16.mxu1 %v5521_v5  ;;  %v4616_v23 = vpack.c.bf16 %v700_v21, %v697_v20  ;;  %v698_v25 = vld [vmem:[#allocation10 + $0x70] sm:$0xff]  ;;  %v701_v26 = vld [vmem:[#allocation10 + $0x88] sm:$0xff]  ;;  %s5419_s20 = scalar_lea.vmem %s6316_s16, 128  ;;  %p6433_p11 = scmp.ne.s32.totalorder %s6413_s30, 0 }
 0x11d   : > { %v4618_v27 = vpack.c.bf16 %v699_v24, %v696_v22  ;;  %v4647_v28 = vpack.c.bf16 %v701_v26, %v698_v25  ;;  %v703_v33 = vld [vmem:[#allocation10 + $0x98] sm:$0xff]  ;;  %v706_v34 = vld [vmem:[#allocation10 + $0xb0] sm:$0xff]  ;;  %v705_v37 = vld [vmem:[#allocation10 + $0xa8] sm:$0xff]  ;;  %v734_v25 = vlaneseq  ;;  %p5420_p10 = scmp.ne.s32.totalorder %s6316_s16, %s5419_s20  ;;  %s5527_s27 = smov [#allocation16]  }
 0x11e   : > { %v4620_v35 = vpack.c.bf16 %v706_v34, %v703_v33  ;;  %v702_v36 = vld [vmem:[#allocation10 + $0x90] sm:$0xff]  ;;  %v704_v38 = vld [vmem:[#allocation10 + $0xa0] sm:$0xff]  ;;  %v707_v40 = vld [vmem:[#allocation10 + $0xb8] sm:$0xff]  ;;  %s5423_s6 = sshll.u32 %s5527_s27, 4  ;;  %s5424_s6 = int_to_ptr.vmem [resolvable:$false] %s5423_s6 }
 0x11f   : > { %4615 = vmatpush1.bf16.msra.mxu0 %v4614_v18  ;;  %4645 = vmatpush3.bf16.msra.mxu1 %v4644_v19  ;;  %v4622_v39 = vpack.c.bf16 %v705_v37, %v702_v36  ;;  %v4650_v41 = vpack.c.bf16 %v707_v40, %v704_v38  ;;  %v709_v42 = vld [vmem:[#allocation10 + $0xc8] sm:$0xff]  ;;  %v712_v43 = vld [vmem:[#allocation10 + $0xe0] sm:$0xff]  ;;  %v711_v46 = vld [vmem:[#allocation10 + $0xd8] sm:$0xff]  ;;  %v5962_v26 = vshrl.u32 %v734_v25, 7  ;;  %v5525_v38 = vmov 1983009808   ;;  %p5421_p5 = pnand %p5420_p10, %p6433_p11  ;;  %p5426_p3 = scmp.lt.s32.totalorder %s6316_s16, %s5424_s6 }
 0x120   : > { %4617 = vmatprep.subr.bf16.mxu0 %v4616_v23  ;;  %4646 = vmatprep.subr.bf16.mxu1 %v5521_v5  ;;  %v4624_v44 = vpack.c.bf16 %v712_v43, %v709_v42  ;;  %v708_v45 = vld [vmem:[#allocation10 + $0xc0] sm:$0xff]  ;;  %v710_v47 = vld [vmem:[#allocation10 + $0xd0] sm:$0xff]  ;;  %v713_v49 = vld [vmem:[#allocation10 + $0xe8] sm:$0xff] }
 0x121   : > { %v4626_v48 = vpack.c.bf16 %v711_v46, %v708_v45  ;;  %v715_v50 = vld [vmem:[#allocation10 + $0xf8] sm:$0xff]  ;;  %v718_v51 = vld [vmem:[#allocation10 + $0x110] sm:$0xff]  ;;  %v4653_v52 = vpack.c.bf16 %v713_v49, %v710_v47  ;;  %v717_v55 = vld [vmem:[#allocation10 + $0x108] sm:$0xff]  ;;  %p5422_p7 = pneg %p5421_p5 }
 0x122   : > { %v4628_v53 = vpack.c.bf16 %v718_v51, %v715_v50  ;;  %v714_v54 = vld [vmem:[#allocation10 + $0xf0] sm:$0xff]  ;;  %v716_v56 = vld [vmem:[#allocation10 + $0x100] sm:$0xff]  ;;  %v719_v59 = vld [vmem:[#allocation10 + $0x118] sm:$0xff] }
 0x123   : > { %4619 = vmatpush1.bf16.msra.mxu0 %v4618_v27  ;;  %4648 = vmatpush3.bf16.msra.mxu1 %v4647_v28  ;;  %v4630_v58 = vpack.c.bf16 %v717_v55, %v714_v54  ;;  %v721_v60 = vld [vmem:[#allocation10 + $0x128] sm:$0xff]  ;;  %v724_v61 = vld [vmem:[#allocation10 + $0x140] sm:$0xff]  ;;  %v4656_v62 = vpack.c.bf16 %v719_v59, %v716_v56  ;;  %v723_v1 = vld [vmem:[#allocation10 + $0x138] sm:$0xff]  ;;  %v5965_v27 = vsub.s32 1, %v5962_v26 }
 0x124   : > { %4649 = vmatprep.subr.bf16.mxu1 %v5521_v5  ;;  %4621 = vmatprep.subr.bf16.mxu0 %v4620_v35  ;;  %v4632_v63 = vpack.c.bf16 %v724_v61, %v721_v60  ;;  %v722_v2 = vld [vmem:[#allocation10 + $0x130] sm:$0xff]  ;;  %v725_v3 = vld [vmem:[#allocation10 + $0x148] sm:$0xff]  ;;  %v727_v4 = vld [vmem:[#allocation10 + $0x158] sm:$0xff] }
 0x125   : > { %v730_v6 = vld [vmem:[#allocation10 + $0x170] sm:$0xff]  ;;  %v4659_v8 = vpack.c.bf16 %v725_v3, %v722_v2  ;;  %v729_v11 = vld [vmem:[#allocation10 + $0x168] sm:$0xff]  ;;  %v728_v12 = vld [vmem:[#allocation10 + $0x160] sm:$0xff] }
 0x126   : > { %v4636_v9 = vpack.c.bf16 %v730_v6, %v727_v4  ;;  %v726_v10 = vld [vmem:[#allocation10 + $0x150] sm:$0xff]  ;;  %v731_v13 = vld [vmem:[#allocation10 + $0x178] sm:$0xff]  ;;  %v5970_v28 = vld [vmem:[%s6363_s5] sm:$0x7] }
 0x127   : > { %4623 = vmatpush1.bf16.msra.mxu0 %v4622_v39  ;;  %4651 = vmatpush3.bf16.msra.mxu1 %v4650_v41  ;;  %v4638_v14 = vpack.c.bf16 %v729_v11, %v726_v10  ;;  %v4662_v15 = vpack.c.bf16 %v731_v13, %v728_v12  ;;  %v4149_v20 = vld [vmem:[#allocation7] ss:$0 sm:$0xff]  ;;  %v4150_v22 = vld [vmem:[#allocation8] ss:$0 sm:$0xff]  ;;  %v896_v39 = vunpack.c.l.s4 %v5525_v38  ;;  %v5526_v41 = vmov 1934713408  }
 0x128   : > { %4652 = vmatprep.subr.bf16.mxu1 %v5521_v5  ;;  %4625 = vmatprep.subr.bf16.mxu0 %v4624_v44  ;;  %v927_v42 = vunpack.c.l.s4 %v5526_v41 }
 0x129   : > { %v897_v40 = vunpack.c.0.s8 %v896_v39 }
 0x12a   : > { %v928_v44 = vunpack.c.0.s8 %v927_v42 }
 0x12b   : > { %4627 = vmatpush1.bf16.msra.mxu0 %v4626_v48  ;;  %4654 = vmatpush3.bf16.msra.mxu1 %v4653_v52  ;;  %v5984_v43 = vsub.s32 %v897_v40, %v5962_v26 }
 0x12c   : > { %4629 = vmatprep.subr.bf16.mxu0 %v4628_v53  ;;  %4655 = vmatprep.subr.bf16.mxu1 %v5521_v5  ;;  %v5988_v47 = vsub.s32 %v928_v44, %v5962_v26 }
 0x12f   : > { %4631 = vmatpush1.bf16.msra.mxu0 %v4630_v58  ;;  %4657 = vmatpush3.bf16.msra.mxu1 %v4656_v62 }
 0x130   : > { %4633 = vmatprep.subr.bf16.mxu0 %v4632_v63  ;;  %4658 = vmatprep.subr.bf16.mxu1 %v5521_v5 }
 0x133   : > { %4660 = vmatpush3.bf16.msra.mxu1 %v4659_v8 }
 0x134   : > { %4661 = vmatprep.subr.bf16.mxu1 %v5521_v5 }
 0x137   : > { %4663 = vmatpush3.bf16.msra.mxu1 %v4662_v15 }
 0x1a4   : > { %v658_v29 = vpop.xlane.xlu0 %657 }
 0x1a5   : > { %v660_v30 = vmul.f32 0.0078125, %v658_v29  ;;  %v5973_v29 = vsub.s32 0, %v5962_v26 }
 0x1a7   : > { %v5942_v31 = vsub.f32 %v654_v0, %v660_v30  ;;  %v720_v0 = vld [vmem:[#allocation10 + $0x120] sm:$0xff]  ;;  %v741_v30 = vrot.slane %v5970_v28, %v5965_v27  ;;  %v737_v35 = vrot.slane %v5970_v28, %v5973_v29 }
 0x1a8   : > { %v4634_v7 = vpack.c.bf16 %v723_v1, %v720_v0 }
 0x1a9   : > { %v662_v32 = vmul.f32 %v5942_v31, %v5942_v31 }
 0x1aa   : > { %4635 = vmatpush1.bf16.msra.mxu0 %v4634_v7 }
 0x1ab   : > { %663 = vadd.xlane.f32.xlu0 %v662_v32  ;;  %4637 = vmatprep.subr.bf16.mxu0 %v4636_v9 }
 0x1ae   : > { %4639 = vmatpush1.bf16.msra.mxu0 %v4638_v14 }
 0x1af   : > { %4463 = vmatprep.subr.mxu0 %v5522_v57 }
 0x238   : > { %v664_v16 = vpop.xlane.xlu0 %663 }
 0x239   : > { %v665_v17 = vmul.f32 0.0078125, %v664_v16 }
 0x23b   : > { %v666_v18 = vadd.f32 1e-12, %v665_v17 }
 0x23d   : > { %5148 = vrsqrt.f32 %v666_v18 }
 0x247   : > { %v5149_v19 = vpop.eup %5148 }
 0x248   : > { %v668_v21 = vmul.f32 %v5149_v19, %v5942_v31 }
 0x24a   : > { %v675_v23 = vmul.f32 %v4149_v20, %v668_v21 }
 0x24c   : > { %v5955_v24 = vadd.f32 %v4150_v22, %v675_v23 }
 0x24e   : > { %814 = vmatmul.mubr.f32.vlgmr.msra.gmra.mrb[0].mxu0 %v5955_v24  ;;  %4461 = vmatmul.mubr.f32.vlgmr.msra.gmra.mrb[0].mxu1 %v5955_v24 }
 0x24f   : > { %4465 = vmatprep.mubr.msk.f32.mxu0 %vm5523_vm0, %v5522_v57  ;;  %1970 = vmatprep.mubr.f32.mxu1 %v5522_v57 }
 0x321   : > { %v815_v31 = vpop.f32.mrb[0].mxu0  ;;  %v5977_v32 = vpop.f32.mrb[0].mxu1 }
 0x322   : > { %v817_v33 = vpop.f32.mrb[1].mxu0  ;;  %v4462_v34 = vpop.f32.mrb[1].mxu1  ;;  %v816_v37 = vadd.f32 %v815_v31, %v737_v35 }
 0x323   : > { %v818_v36 = vadd.f32 %v817_v33, %v741_v30 }
 0x324   : > { %v894_v55 = vcombine.high %v816_v37, %v5522_v57  ;;  %v901_v62 = vrot.slane %v816_v37, %v5984_v43 }
 0x325   : > { %1011 = vrot.lane.b32.xlu1 %v818_v36, %s5524_s19  ;;  %v1014_v45 = vcombine.high %v818_v36, %v5522_v57  ;;  %v1021_v48 = vrot.slane %v818_v36, %v5984_v43 }
 0x326   : > { %v908_v6 = vrot.slane %v894_v55, %v5984_v43 }
 0x327   : > { %v1028_v51 = vrot.slane %v1014_v45, %v5984_v43 }
 0x329   : > { %891 = vrot.lane.b32.xlu1 %v816_v37, %s5524_s19 }
 0x397   : > { %v1012_v46 = vpop.permute.xlu1 %1011 }
 0x398   : > { %v1029_v49 = vcombine.high %v1012_v46, %v5522_v57  ;;  %v1036_v50 = vrot.slane %v1012_v46, %v5984_v43 }
 0x39a   : > { %v1043_v52 = vrot.slane %v1029_v49, %v5984_v43  ;;  %v1044_v53 = vcombine.low %v1021_v48, %v1036_v50  ;;  %v1045_v54 = vcombine.high %v1021_v48, %v1036_v50  ;;  %v4157_v50 = vld [vmem:[%s577_s18] ss:$0 sm:$0xff] }
 0x39b   : > { %v892_v56 = vpop.permute.xlu1 %891 }
 0x39c   : > { %v1052_v58 = vrot.slane %v1044_v53, %v5988_v47  ;;  %v1059_v59 = vrot.slane %v1045_v54, %v5988_v47  ;;  %v1060_v60 = vcombine.low %v1028_v51, %v1043_v52  ;;  %v1061_v61 = vcombine.high %v1028_v51, %v1043_v52 }
 0x39d   : > { %v909_v63 = vcombine.high %v892_v56, %v5522_v57  ;;  %v916_v0 = vrot.slane %v892_v56, %v5984_v43 }
 0x39e   : > { %v1068_v1 = vrot.slane %v1060_v60, %v5988_v47  ;;  %v1075_v2 = vrot.slane %v1061_v61, %v5988_v47  ;;  %v1080_v3 = vcombine.low %v1052_v58, %v1059_v59  ;;  %v4153_v4 = vcombine.high %v1052_v58, %v1059_v59 }
 0x39f   : > { %v923_v7 = vrot.slane %v909_v63, %v5984_v43  ;;  %v924_v8 = vcombine.low %v901_v62, %v916_v0  ;;  %v925_v9 = vcombine.high %v901_v62, %v916_v0 }
 0x3a0   : > { %v1087_v10 = vrot.slane %v1080_v3, %v5984_v43  ;;  %v1095_v11 = vrot.slane %v4153_v4, %v5984_v43  ;;  %v1096_v12 = vcombine.low %v1068_v1, %v1075_v2  ;;  %v4154_v13 = vcombine.high %v1068_v1, %v1075_v2 }
 0x3a1   : > { %v932_v14 = vrot.slane %v924_v8, %v5988_v47  ;;  %v939_v15 = vrot.slane %v925_v9, %v5988_v47  ;;  %v940_v16 = vcombine.low %v908_v6, %v923_v7  ;;  %v941_v17 = vcombine.high %v908_v6, %v923_v7 }
 0x3a2   : > { %v1103_v18 = vrot.slane %v1096_v12, %v5984_v43  ;;  %v1111_v19 = vrot.slane %v4154_v13, %v5984_v43  ;;  %v1112_v20 = vcombine.low %v1087_v10, %v1095_v11  ;;  %v6038_v7 = vsub.s32 2, %v5962_v26 }
 0x3a3   : > { %v948_v21 = vrot.slane %v940_v16, %v5988_v47  ;;  %v955_v22 = vrot.slane %v941_v17, %v5988_v47  ;;  %v960_v23 = vcombine.low %v932_v14, %v939_v15  ;;  %v4151_v25 = vcombine.high %v932_v14, %v939_v15 }
 0x3a4   : > { %v1120_v30 = vcombine.low %v1103_v18, %v1111_v19  ;;  %v1119_v36 = vrot.slane %v1112_v20, %v5988_v47  ;;  %v745_v8 = vrot.slane %v5970_v28, %v6038_v7 }
 0x3a5   : > { %v967_v31 = vrot.slane %v960_v23, %v5984_v43  ;;  %v975_v33 = vrot.slane %v4151_v25, %v5984_v43  ;;  %v976_v34 = vcombine.low %v948_v21, %v955_v22  ;;  %v4152_v35 = vcombine.high %v948_v21, %v955_v22 }
 0x3a6   : > { %v1127_v37 = vrot.slane %v1120_v30, %v5988_v47  ;;  %v887_v9 = vadd.f32 %v5977_v32, %v745_v8  ;;  %v1711_v8 = vld [vmem:[#allocation11 + $0x60] sm:$0xff] }
 0x3a7   : > { %v983_v38 = vrot.slane %v976_v34, %v5984_v43  ;;  %v991_v39 = vrot.slane %v4152_v35, %v5984_v43  ;;  %v992_v40 = vcombine.low %v967_v31, %v975_v33 }
 0x3a8   : > { %v1128_v41 = vcombine.low %v1119_v36, %v1127_v37  ;;  %v1129_v48 = vcombine.high %v1119_v36, %v1127_v37  ;;  %v1134_v12 = vcombine.high %v887_v9, %v5522_v57  ;;  %v1141_v14 = vrot.slane %v887_v9, %v5984_v43 }
 0x3a9   : > { %v1000_v42 = vcombine.low %v983_v38, %v991_v39  ;;  %v999_v44 = vrot.slane %v992_v40, %v5988_v47 }
 0x3aa   : > { %4464 = vmatpush3.xpose.msk.msra.mxu0 %vm1256_vm1, %v1128_v41  ;;  %v1148_v17 = vrot.slane %v1134_v12, %v5984_v43  ;;  %v1714_v12 = vld [vmem:[#allocation11 + $0x78] sm:$0xff] }
 0x3ab   : > { %4468 = vmatprep.subr.mxu0 %v5522_v57  ;;  %v1007_v45 = vrot.slane %v1000_v42, %v5988_v47 }
 0x3ad   : > { %v1008_v46 = vcombine.low %v999_v44, %v1007_v45  ;;  %v1009_v49 = vcombine.high %v999_v44, %v1007_v45 }
 0x3af   : > { %4466 = vmatmul.mubr.msk.f32.vlgmr.msra.gmra.mrb[2].mxu0 %vm1256_vm1, %v1008_v46 }
 0x3b0   : > { %4469 = vmatpush3.xpose.msk.msra.mxu0 %vm1256_vm1, %v1129_v48  ;;  %4470 = vmatprep.mubr.msk.f32.mxu0 %vm5523_vm0, %v5522_v57 }
 0x3b1   : > { %4473 = vmatprep.subr.mxu0 %v5522_v57 }
 0x3b3   : > { %4471 = vmatmul.mubr.msk.f32.vlgmr.msra.gmra.mrb[4].mxu0 %vm1256_vm1, %v1009_v49 }
 0x3b4   : > { %4475 = vmatprep.mubr.msk.f32.mxu0 %vm5523_vm0, %v5522_v57 }
 0x482   : > { %v1329_v51 = vpop.f32.mrb[2].mxu0 }
 0x483   : > { %v1330_v52 = vadd.f32 %v4157_v50, %v1329_v51  ;;  %v4467_v53 = vpop.f32.mrb[3].mxu0  ;;  %v1699_v51 = vld [vmem:[#allocation11] sm:$0xff] }
 0x484   : > { %v1701_v53 = vld [vmem:[#allocation11 + $0x10] sm:$0xff] }
 0x485   : > { %v1410_v54 = vsel %vm1409_vm2, %v1330_v52, -inf }
 0x486   : > { %1411 = vmax.xlane.f32.xlu0 %v1410_v54  ;;  %v1405_v55 = vpop.f32.mrb[4].mxu0 }
 0x487   : > { %v1406_v56 = vadd.f32 %v4157_v50, %v1405_v55  ;;  %v4472_v58 = vpop.f32.mrb[5].mxu0  ;;  %v1702_v55 = vld [vmem:[#allocation11 + $0x18] sm:$0xff] }
 0x488   : > { %v1703_v58 = vld [vmem:[#allocation11 + $0x20] sm:$0xff] }
 0x489   : > { %v1413_v59 = vsel %vm1409_vm2, %v1406_v56, -inf }
 0x48a   : > { %1414 = vmax.xlane.f32.xlu1 %v1413_v59  ;;  %v1704_v59 = vld [vmem:[#allocation11 + $0x28] sm:$0xff] }
 0x513   : > { %v1412_v60 = vpop.xlane.xlu0 %1411 }
 0x514   : > { %v1416_v61 = vsub.f32 %v1330_v52, %v1412_v60  ;;  %v1700_v52 = vld [vmem:[#allocation11 + $0x8] sm:$0xff]  ;;  %v4671_v60 = vpack.c.bf16 %v1704_v59, %v1703_v58 }
 0x515   : > { %v4665_v54 = vpack.c.bf16 %v1700_v52, %v1699_v51 }
 0x516   : > { %v1418_v62 = vmul.f32 1.442695, %v1416_v61  ;;  %v1705_v61 = vld [vmem:[#allocation11 + $0x30] sm:$0xff] }
 0x517   : > { %v1415_v63 = vpop.xlane.xlu1 %1414 }
 0x518   : > { %5150 = vpow2.f32 %v1418_v62  ;;  %v1417_v0 = vsub.f32 %v1406_v56, %v1415_v63  ;;  %v4668_v56 = vpack.c.bf16 %v1702_v55, %v1701_v53  ;;  %v1706_v62 = vld [vmem:[#allocation11 + $0x38] sm:$0xff] }
 0x519   : > { %v4674_v63 = vpack.c.bf16 %v1706_v62, %v1705_v61  ;;  %v1825_v61 = vld [vmem:[#allocation13 + $0x28] sm:$0xff]  ;;  %v1823_v62 = vld [vmem:[#allocation13 + $0x18] sm:$0xff] }
 0x51a   : > { %v1420_v1 = vmul.f32 1.442695, %v1417_v0  ;;  %v1707_v0 = vld [vmem:[#allocation11 + $0x40] sm:$0xff] }
 0x51c   : > { %5152 = vpow2.f32 %v1420_v1  ;;  %v1708_v1 = vld [vmem:[#allocation11 + $0x48] sm:$0xff] }
 0x522   : > { %v5151_v2 = vpop.eup %5150 }
 0x523   : > { %v1422_v3 = vsel %vm1409_vm2, %v5151_v2, 0.0 }
 0x524   : > { %1423 = vadd.xlane.f32.xlu0 %v1422_v3  ;;  %v1709_v3 = vld [vmem:[#allocation11 + $0x50] sm:$0xff] }
 0x526   : > { %v5153_v4 = vpop.eup %5152 }
 0x527   : > { %v1425_v6 = vsel %vm1409_vm2, %v5153_v4, 0.0 }
 0x528   : > { %1426 = vadd.xlane.f32.xlu0 %v1425_v6 }
 0x53e   : > { %1131 = vrot.lane.b32.xlu0 %v887_v9, %s5524_s19  ;;  %v1712_v9 = vld [vmem:[#allocation11 + $0x68] sm:$0xff] }
 0x5b1   : > { %v1424_v10 = vpop.xlane.xlu0 %1423 }
 0x5b2   : > { %5154 = vrcp.f32 %v1424_v10  ;;  %v4683_v10 = vpack.c.bf16 %v1712_v9, %v1711_v8  ;;  %v1826_v8 = vld [vmem:[#allocation13 + $0x30] sm:$0xff]  ;;  %v1829_v9 = vld [vmem:[#allocation13 + $0x48] sm:$0xff] }
 0x5b5   : > { %v1427_v11 = vpop.xlane.xlu0 %1426 }
 0x5b6   : > { %5156 = vrcp.f32 %v1427_v11  ;;  %v1713_v11 = vld [vmem:[#allocation11 + $0x70] sm:$0xff] }
 0x5b9   : > { %v1132_v13 = vpop.permute.xlu0 %1131 }
 0x5ba   : > { %v1149_v15 = vcombine.high %v1132_v13, %v5522_v57  ;;  %v1156_v16 = vrot.slane %v1132_v13, %v5984_v43  ;;  %v4686_v13 = vpack.c.bf16 %v1714_v12, %v1713_v11  ;;  %v1833_v11 = vld [vmem:[#allocation13 + $0x68] sm:$0xff]  ;;  %v1831_v12 = vld [vmem:[#allocation13 + $0x58] sm:$0xff] }
 0x5bc   : > { %v1163_v18 = vrot.slane %v1149_v15, %v5984_v43  ;;  %v1164_v28 = vcombine.low %v1141_v14, %v1156_v16  ;;  %v1165_v19 = vcombine.high %v1141_v14, %v1156_v16  ;;  %v5155_v41 = vpop.eup %5154 }
 0x5bd   : > { %v1430_v48 = vmul.f32 %v5155_v41, %v5151_v2  ;;  %v4677_v2 = vpack.c.bf16 %v1708_v1, %v1707_v0  ;;  %v1827_v0 = vld [vmem:[#allocation13 + $0x38] sm:$0xff]  ;;  %v1820_v1 = vld [vmem:[#allocation13] sm:$0xff] }
 0x5be   : > { %v1172_v32 = vrot.slane %v1164_v28, %v5988_v47  ;;  %v1179_v20 = vrot.slane %v1165_v19, %v5988_v47  ;;  %v1180_v21 = vcombine.low %v1148_v17, %v1163_v18  ;;  %v1181_v22 = vcombine.high %v1148_v17, %v1163_v18 }
 0x5c0   : > { %v1188_v23 = vrot.slane %v1180_v21, %v5988_v47  ;;  %v1195_v25 = vrot.slane %v1181_v22, %v5988_v47  ;;  %v1200_v30 = vcombine.low %v1172_v32, %v1179_v20  ;;  %v4155_v31 = vcombine.high %v1172_v32, %v1179_v20  ;;  %v5157_v46 = vpop.eup %5156 }
 0x5c1   : > { %v1431_v50 = vmul.f32 %v5157_v46, %v5153_v4  ;;  %v1710_v4 = vld [vmem:[#allocation11 + $0x58] sm:$0xff] }
 0x5c2   : > { %v1207_v33 = vrot.slane %v1200_v30, %v5984_v43  ;;  %v1215_v34 = vrot.slane %v4155_v31, %v5984_v43  ;;  %v1216_v35 = vcombine.low %v1188_v23, %v1195_v25  ;;  %v4156_v36 = vcombine.high %v1188_v23, %v1195_v25 }
 0x5c3   : > { %v4680_v6 = vpack.c.bf16 %v1710_v4, %v1709_v3  ;;  %v4720_v3 = vpack.c.bf16 %v1827_v0, %v1823_v62  ;;  %v1856_v62 = vld [vmem:[#allocation13 + $0x120] sm:$0xff] }
 0x5c4   : > { %v1223_v37 = vrot.slane %v1216_v35, %v5984_v43  ;;  %v1231_v38 = vrot.slane %v4156_v36, %v5984_v43  ;;  %v1232_v39 = vcombine.low %v1207_v33, %v1215_v34 }
 0x5c6   : > { %v1240_v40 = vcombine.low %v1223_v37, %v1231_v38  ;;  %v1239_v42 = vrot.slane %v1232_v39, %v5988_v47 }
 0x5c8   : > { %v1247_v44 = vrot.slane %v1240_v40, %v5988_v47 }
 0x5ca   : > { %v1248_v45 = vcombine.low %v1239_v42, %v1247_v44  ;;  %v1249_v49 = vcombine.high %v1239_v42, %v1247_v44 }
 0x5cc   : > { %4474 = vmatpush3.msra.mxu0 %v1248_v45 }
 0x5cd   : > { %4476 = vmatmul.mubr.msk.f32.vlgmr.msra.gmra.mrb[6].mxu0 %vm1409_vm2, %v1430_v48  ;;  %4478 = vmatprep.subr.mxu0 %v5522_v57 }
 0x5ce   : > { %4479 = vmatpush3.msra.mxu0 %v1249_v49  ;;  %4480 = vmatprep.mubr.msk.f32.mxu0 %vm5523_vm0, %v5522_v57 }
 0x5cf   : > { %4664 = vmatprep.subr.bf16.mxu0 %v5521_v5 }
 0x5d1   : > { %4481 = vmatmul.mubr.msk.f32.vlgmr.msra.gmra.mrb[8].mxu0 %vm1409_vm2, %v1431_v50 }
 0x5d2   : > { %4515 = vmatprep.mubr.msk.f32.mxu0 %vm5523_vm0, %v5522_v57  ;;  %4666 = vmatpush3.bf16.msra.mxu0 %v4665_v54  ;;  %v4166_v54 = vld [vmem:[%s6365_s7] ss:$0 sm:$0xff] }
 0x5d3   : > { %4667 = vmatprep.subr.bf16.mxu0 %v5521_v5 }
 0x5d6   : > { %4669 = vmatpush3.bf16.msra.mxu0 %v4668_v56 }
 0x5d7   : > { %4670 = vmatprep.subr.bf16.mxu0 %v5521_v5 }
 0x5da   : > { %4672 = vmatpush3.bf16.msra.mxu0 %v4671_v60  ;;  %v1821_v60 = vld [vmem:[#allocation13 + $0x8] sm:$0xff] }
 0x5db   : > { %4673 = vmatprep.subr.bf16.mxu0 %v5521_v5 }
 0x5de   : > { %4675 = vmatpush3.bf16.msra.mxu0 %v4674_v63  ;;  %v4688_v63 = vpack.c.bf16 %v1825_v61, %v1821_v60  ;;  %v1859_v60 = vld [vmem:[#allocation13 + $0x138] sm:$0xff]  ;;  %v1852_v61 = vld [vmem:[#allocation13 + $0x100] sm:$0xff] }
 0x5df   : > { %4676 = vmatprep.subr.bf16.mxu0 %v5521_v5  ;;  %v4706_v0 = vpack.c.bf16 %v1856_v62, %v1852_v61  ;;  %v2133_v62 = vld [vmem:[#allocation14 + $0x188] sm:$0xff] }
 0x5e0   : > { %4689 = vmatprep.subr.bf16.mxu1 %v4688_v63 }
 0x5e2   : > { %4678 = vmatpush3.bf16.msra.mxu0 %v4677_v2  ;;  %v1824_v2 = vld [vmem:[#allocation13 + $0x20] sm:$0xff] }
 0x5e3   : > { %4679 = vmatprep.subr.bf16.mxu0 %v5521_v5  ;;  %v4690_v4 = vpack.c.bf16 %v1824_v2, %v1820_v1  ;;  %v1854_v1 = vld [vmem:[#allocation13 + $0x110] sm:$0xff] }
 0x5e4   : > { %v1858_v2 = vld [vmem:[#allocation13 + $0x130] sm:$0xff] }
 0x5e5   : > { %4691 = vmatpush1.bf16.msra.mxu1 %v4690_v4  ;;  %v4738_v4 = vpack.c.bf16 %v1858_v2, %v1854_v1  ;;  %v2116_v2 = vld [vmem:[#allocation14 + $0x100] sm:$0xff] }
 0x5e6   : > { %4681 = vmatpush3.bf16.msra.mxu0 %v4680_v6  ;;  %v1822_v6 = vld [vmem:[#allocation13 + $0x10] sm:$0xff] }
 0x5e7   : > { %4682 = vmatprep.subr.bf16.mxu0 %v5521_v5 }
 0x5ea   : > { %4684 = vmatpush3.bf16.msra.mxu0 %v4683_v10  ;;  %v4722_v10 = vpack.c.bf16 %v1826_v8, %v1822_v6  ;;  %v1865_v6 = vld [vmem:[#allocation13 + $0x168] sm:$0xff]  ;;  %v1863_v8 = vld [vmem:[#allocation13 + $0x158] sm:$0xff] }
 0x5eb   : > { %4685 = vmatprep.subr.bf16.mxu0 %v5521_v5 }
 0x5ee   : > { %4687 = vmatpush3.bf16.msra.mxu0 %v4686_v13  ;;  %v1835_v13 = vld [vmem:[#allocation13 + $0x78] sm:$0xff] }
 0x5ef   : > { %4721 = vmatprep.subr.bf16.mxu0 %v4720_v3  ;;  %v1861_v3 = vld [vmem:[#allocation13 + $0x148] sm:$0xff] }
 0x6a0   : > { %v1501_v14 = vpop.f32.mrb[6].mxu0 }
 0x6a1   : > { %v4477_v15 = vpop.f32.mrb[7].mxu0  ;;  %v1578_v16 = vcombine.high %v1501_v14, %v5522_v57  ;;  %v1585_v18 = vrot.slane %v1501_v14, %v5984_v43  ;;  %v4724_v14 = vpack.c.bf16 %v1835_v13, %v1831_v12  ;;  %v1860_v12 = vld [vmem:[#allocation13 + $0x140] sm:$0xff] }
 0x6a2   : > { %v1828_v15 = vld [vmem:[#allocation13 + $0x40] sm:$0xff] }
 0x6a3   : > { %v1592_v20 = vrot.slane %v1578_v16, %v5984_v43  ;;  %v1832_v16 = vld [vmem:[#allocation13 + $0x60] sm:$0xff] }
 0x6a4   : > { %v1574_v17 = vpop.f32.mrb[8].mxu0  ;;  %v1864_v13 = vld [vmem:[#allocation13 + $0x160] sm:$0xff] }
 0x6a5   : > { %v1593_v28 = vcombine.high %v1574_v17, %v5522_v57  ;;  %v1600_v19 = vrot.slane %v1574_v17, %v5984_v43  ;;  %v4482_v32 = vpop.f32.mrb[9].mxu0  ;;  %v1830_v17 = vld [vmem:[#allocation13 + $0x50] sm:$0xff] }
 0x6a6   : > { %v1841_v32 = vld [vmem:[#allocation13 + $0xa8] sm:$0xff] }
 0x6a7   : > { %v1607_v21 = vrot.slane %v1593_v28, %v5984_v43  ;;  %v1608_v22 = vcombine.low %v1585_v18, %v1600_v19  ;;  %v1609_v23 = vcombine.high %v1585_v18, %v1600_v19  ;;  %v4694_v18 = vpack.c.bf16 %v1832_v16, %v1828_v15  ;;  %v1834_v28 = vld [vmem:[#allocation13 + $0x70] sm:$0xff]  ;;  %v1837_v19 = vld [vmem:[#allocation13 + $0x88] sm:$0xff] }
 0x6a8   : > { %v1866_v15 = vld [vmem:[#allocation13 + $0x170] sm:$0xff]  ;;  %v1869_v16 = vld [vmem:[#allocation13 + $0x188] sm:$0xff] }
 0x6a9   : > { %v1616_v25 = vrot.slane %v1608_v22, %v5988_v47  ;;  %v1623_v30 = vrot.slane %v1609_v23, %v5988_v47  ;;  %v1624_v31 = vcombine.low %v1592_v20, %v1607_v21  ;;  %v1625_v33 = vcombine.high %v1592_v20, %v1607_v21  ;;  %v1839_v22 = vld [vmem:[#allocation13 + $0x98] sm:$0xff] }
 0x6aa   : > { %v4726_v20 = vpack.c.bf16 %v1834_v28, %v1830_v17  ;;  %v4696_v21 = vpack.c.bf16 %v1841_v32, %v1837_v19  ;;  %v1843_v23 = vld [vmem:[#allocation13 + $0xb8] sm:$0xff]  ;;  %v1873_v17 = vld [vmem:[#allocation13 + $0x1a8] sm:$0xff] }
 0x6ab   : > { %v1632_v34 = vrot.slane %v1624_v31, %v5988_v47  ;;  %v1639_v35 = vrot.slane %v1625_v33, %v5988_v47  ;;  %v1644_v36 = vcombine.low %v1616_v25, %v1623_v30  ;;  %v4164_v37 = vcombine.high %v1616_v25, %v1623_v30  ;;  %v1836_v25 = vld [vmem:[#allocation13 + $0x80] sm:$0xff]  ;;  %v1838_v33 = vld [vmem:[#allocation13 + $0x90] sm:$0xff]  ;;  %v1871_v19 = vld [vmem:[#allocation13 + $0x198] sm:$0xff] }
 0x6ac   : > { %v4728_v30 = vpack.c.bf16 %v1843_v23, %v1839_v22  ;;  %v1840_v31 = vld [vmem:[#allocation13 + $0xa0] sm:$0xff]  ;;  %v4712_v28 = vpack.c.bf16 %v1873_v17, %v1869_v16  ;;  %v1875_v32 = vld [vmem:[#allocation13 + $0x1b8] sm:$0xff]  ;;  %v1870_v23 = vld [vmem:[#allocation13 + $0x190] sm:$0xff] }
 0x6ad   : > { %v1651_v38 = vrot.slane %v1644_v36, %v5984_v43  ;;  %v1659_v39 = vrot.slane %v4164_v37, %v5984_v43  ;;  %v1660_v40 = vcombine.low %v1632_v34, %v1639_v35  ;;  %v4165_v41 = vcombine.high %v1632_v34, %v1639_v35  ;;  %v1842_v34 = vld [vmem:[#allocation13 + $0xb0] sm:$0xff]  ;;  %v1872_v22 = vld [vmem:[#allocation13 + $0x1a0] sm:$0xff]  ;;  %v2119_v16 = vld [vmem:[#allocation14 + $0x118] sm:$0xff] }
 0x6ae   : > { %v4698_v35 = vpack.c.bf16 %v1840_v31, %v1836_v25  ;;  %v4730_v36 = vpack.c.bf16 %v1842_v34, %v1838_v33  ;;  %v1874_v25 = vld [vmem:[#allocation13 + $0x1b0] sm:$0xff]  ;;  %v1877_v31 = vld [vmem:[#allocation13 + $0x1c8] sm:$0xff]  ;;  %v1879_v34 = vld [vmem:[#allocation13 + $0x1d8] sm:$0xff] }
 0x6af   : > { %v1667_v42 = vrot.slane %v1660_v40, %v5984_v43  ;;  %v1675_v44 = vrot.slane %v4165_v41, %v5984_v43  ;;  %v1676_v45 = vcombine.low %v1651_v38, %v1659_v39  ;;  %v1845_v41 = vld [vmem:[#allocation13 + $0xc8] sm:$0xff] }
 0x6b0   : > { %v1881_v33 = vld [vmem:[#allocation13 + $0x1e8] sm:$0xff] }
 0x6b1   : > { %v1684_v46 = vcombine.low %v1667_v42, %v1675_v44  ;;  %v1683_v48 = vrot.slane %v1676_v45, %v5988_v47  ;;  %v1849_v42 = vld [vmem:[#allocation13 + $0xe8] sm:$0xff]  ;;  %v1847_v44 = vld [vmem:[#allocation13 + $0xd8] sm:$0xff] }
 0x6b2   : > { %v4700_v45 = vpack.c.bf16 %v1849_v42, %v1845_v41  ;;  %v1878_v42 = vld [vmem:[#allocation13 + $0x1d0] sm:$0xff] }
 0x6b3   : > { %v1691_v49 = vrot.slane %v1684_v46, %v5988_v47  ;;  %v1851_v46 = vld [vmem:[#allocation13 + $0xf8] sm:$0xff] }
 0x6b5   : > { %v1693_v50 = vcombine.high %v1683_v48, %v1691_v49  ;;  %v1692_v51 = vcombine.low %v1683_v48, %v1691_v49  ;;  %v1844_v48 = vld [vmem:[#allocation13 + $0xc0] sm:$0xff] }
 0x6b6   : > { %v1848_v49 = vld [vmem:[#allocation13 + $0xe0] sm:$0xff] }
 0x6b7   : > { %1695 = vrot.lane.b32.xlu0 %v1693_v50, %s5524_s19  ;;  %v4732_v50 = vpack.c.bf16 %v1851_v46, %v1847_v44  ;;  %v1882_v44 = vld [vmem:[#allocation13 + $0x1f0] sm:$0xff] }
 0x6b8   : > { %v4750_v46 = vpack.c.bf16 %v1882_v44, %v1878_v42 }
 0x729   : > { %v1696_v52 = vpop.permute.xlu0 %1695 }
 0x72a   : > { %v1698_v53 = vsel %vm1256_vm1, %v1692_v51, %v1696_v52  ;;  %v4702_v51 = vpack.c.bf16 %v1848_v49, %v1844_v48  ;;  %v1846_v52 = vld [vmem:[#allocation13 + $0xd0] sm:$0xff] }
 0x72b   : > { %4516 = vmatmul.mubr.f32.vlgmr.msra.gmra.mrb[10].mxu0 %v1698_v53  ;;  %v1850_v53 = vld [vmem:[#allocation13 + $0xf0] sm:$0xff] }
 0x72c   : > { %2041 = vmatprep.mubr.f32.mxu0 %v5522_v57  ;;  %4723 = vmatpush1.bf16.msra.mxu0 %v4722_v10  ;;  %v4708_v10 = vpack.c.bf16 %v1865_v6, %v1861_v3  ;;  %v2117_v3 = vld [vmem:[#allocation14 + $0x108] sm:$0xff]  ;;  %v2102_v6 = vld [vmem:[#allocation14 + $0x90] sm:$0xff] }
 0x72d   : > { %4725 = vmatprep.subr.bf16.mxu0 %v4724_v14  ;;  %v4710_v14 = vpack.c.bf16 %v1864_v13, %v1860_v12  ;;  %v2086_v12 = vld [vmem:[#allocation14 + $0x10] sm:$0xff]  ;;  %v2087_v13 = vld [vmem:[#allocation14 + $0x18] sm:$0xff] }
 0x730   : > { %4727 = vmatpush1.bf16.msra.mxu0 %v4726_v20  ;;  %v1868_v20 = vld [vmem:[#allocation13 + $0x180] sm:$0xff] }
 0x731   : > { %4729 = vmatprep.subr.bf16.mxu0 %v4728_v30  ;;  %v4714_v30 = vpack.c.bf16 %v1872_v22, %v1868_v20  ;;  %v2137_v20 = vld [vmem:[#allocation14 + $0x1a8] sm:$0xff] }
 0x732   : > { %v2089_v22 = vld [vmem:[#allocation14 + $0x28] sm:$0xff] }
 0x734   : > { %4731 = vmatpush1.bf16.msra.mxu0 %v4730_v36  ;;  %v4716_v36 = vpack.c.bf16 %v1881_v33, %v1877_v31  ;;  %v2121_v31 = vld [vmem:[#allocation14 + $0x128] sm:$0xff] }
 0x735   : > { %4733 = vmatprep.subr.bf16.mxu0 %v4732_v50 }
 0x7fe   : > { %v1788_v55 = vpop.f32.mrb[10].mxu0 }
 0x7ff   : > { %v1789_v56 = vadd.f32 %v4166_v54, %v1788_v55  ;;  %v4517_v58 = vpop.f32.mrb[11].mxu0  ;;  %v4734_v54 = vpack.c.bf16 %v1850_v53, %v1846_v52  ;;  %v1853_v55 = vld [vmem:[#allocation13 + $0x108] sm:$0xff] }
 0x800   : > { %v1855_v58 = vld [vmem:[#allocation13 + $0x118] sm:$0xff]  ;;  %v4167_v52 = vld [vmem:[%s6366_s8] ss:$0 sm:$0xff] }
 0x801   : > { %v1792_v59 = vadd.f32 %v1789_v56, %v5955_v24  ;;  %v4692_v24 = vpack.c.bf16 %v1833_v11, %v1829_v9  ;;  %v1857_v56 = vld [vmem:[#allocation13 + $0x128] sm:$0xff]  ;;  %4735 = vmatpush1.bf16.msra.mxu0 %v4734_v54  ;;  %v4736_v63 = vpack.c.bf16 %v1859_v60, %v1855_v58  ;;  %v1867_v9 = vld [vmem:[#allocation13 + $0x178] sm:$0xff]  ;;  %v2100_v58 = vld [vmem:[#allocation14 + $0x80] sm:$0xff] }
 0x802   : > { %v4740_v11 = vpack.c.bf16 %v1867_v9, %v1863_v8  ;;  %v4168_v54 = vld [vmem:[%s6367_s9] ss:$0 sm:$0xff]  ;;  %v2132_v60 = vld [vmem:[#allocation14 + $0x180] sm:$0xff]  ;;  %v2103_v8 = vld [vmem:[#allocation14 + $0x98] sm:$0xff] }
 0x803   : > { %1795 = vadd.xlane.f32.xlu1 %v1792_v59  ;;  %4693 = vmatprep.subr.bf16.mxu1 %v4692_v24  ;;  %v1862_v24 = vld [vmem:[#allocation13 + $0x150] sm:$0xff]  ;;  %v4784_v1 = vpack.c.bf16 %v2133_v62, %v2132_v60  ;;  %v2124_v60 = vld [vmem:[#allocation14 + $0x140] sm:$0xff] }
 0x804   : > { %4695 = vmatpush1.bf16.msra.mxu1 %v4694_v18  ;;  %4737 = vmatprep.subr.bf16.mxu0 %v4736_v63  ;;  %v4742_v18 = vpack.c.bf16 %v1866_v15, %v1862_v24  ;;  %v2084_v63 = vld [vmem:[#allocation14] sm:$0xff]  ;;  %v2134_v9 = vld [vmem:[#allocation14 + $0x190] sm:$0xff] }
 0x805   : > { %4697 = vmatprep.subr.bf16.mxu1 %v4696_v21  ;;  %4739 = vmatpush1.bf16.msra.mxu0 %v4738_v4  ;;  %v4744_v21 = vpack.c.bf16 %v1875_v32, %v1871_v19  ;;  %v4786_v4 = vpack.c.bf16 %v2117_v3, %v2116_v2  ;;  %v2118_v15 = vld [vmem:[#allocation14 + $0x110] sm:$0xff]  ;;  %v2136_v19 = vld [vmem:[#allocation14 + $0x1a0] sm:$0xff] }
 0x806   : > { %4741 = vmatprep.subr.bf16.mxu0 %v4740_v11  ;;  %v2135_v11 = vld [vmem:[#allocation14 + $0x198] sm:$0xff]  ;;  %v4790_v17 = vpack.c.bf16 %v2119_v16, %v2118_v15  ;;  %v2110_v62 = vld [vmem:[#allocation14 + $0xd0] sm:$0xff]  ;;  %v2145_v15 = vld [vmem:[#allocation14 + $0x1e8] sm:$0xff] }
 0x807   : > { %v4788_v24 = vpack.c.bf16 %v2135_v11, %v2134_v9  ;;  %v2112_v11 = vld [vmem:[#allocation14 + $0xe0] sm:$0xff] }
 0x808   : > { %4699 = vmatpush1.bf16.msra.mxu1 %v4698_v35  ;;  %v4746_v35 = vpack.c.bf16 %v1874_v25, %v1870_v23  ;;  %v4792_v23 = vpack.c.bf16 %v2137_v20, %v2136_v19  ;;  %v2096_v16 = vld [vmem:[#allocation14 + $0x60] sm:$0xff]  ;;  %v2129_v19 = vld [vmem:[#allocation14 + $0x168] sm:$0xff]  ;;  %v2114_v20 = vld [vmem:[#allocation14 + $0xf0] sm:$0xff] }
 0x809   : > { %4701 = vmatprep.subr.bf16.mxu1 %v4700_v45  ;;  %4743 = vmatpush1.bf16.msra.mxu0 %v4742_v18  ;;  %v2104_v18 = vld [vmem:[#allocation14 + $0xa0] sm:$0xff] }
 0x80a   : > { %4745 = vmatprep.subr.bf16.mxu0 %v4744_v21  ;;  %v2088_v21 = vld [vmem:[#allocation14 + $0x20] sm:$0xff] }
 0x80b   : > { %v4762_v25 = vpack.c.bf16 %v2089_v22, %v2088_v21  ;;  %v2115_v21 = vld [vmem:[#allocation14 + $0xf8] sm:$0xff]  ;;  %v2146_v22 = vld [vmem:[#allocation14 + $0x1f0] sm:$0xff] }
 0x80c   : > { %4703 = vmatpush1.bf16.msra.mxu1 %v4702_v51 }
 0x80d   : > { %4747 = vmatpush1.bf16.msra.mxu0 %v4746_v35  ;;  %v2107_v35 = vld [vmem:[#allocation14 + $0xb8] sm:$0xff] }
 0x890   : > { %v1796_v37 = vpop.xlane.xlu1 %1795 }
 0x891   : > { %v1797_v38 = vmul.f32 0.0078125, %v1796_v37  ;;  %v1883_v37 = vld [vmem:[#allocation13 + $0x1f8] sm:$0xff] }
 0x892   : > { %v4748_v41 = vpack.c.bf16 %v1883_v37, %v1879_v34  ;;  %v2106_v34 = vld [vmem:[#allocation14 + $0xb0] sm:$0xff] }
 0x893   : > { %v6098_v39 = vsub.f32 %v1792_v59, %v1797_v38  ;;  %v4704_v59 = vpack.c.bf16 %v1857_v56, %v1853_v55  ;;  %v1876_v38 = vld [vmem:[#allocation13 + $0x1c0] sm:$0xff]  ;;  %v4764_v37 = vpack.c.bf16 %v2107_v35, %v2106_v34  ;;  %v2130_v35 = vld [vmem:[#allocation14 + $0x170] sm:$0xff] }
 0x894   : > { %4749 = vmatprep.subr.bf16.mxu0 %v4748_v41  ;;  %v2091_v41 = vld [vmem:[#allocation14 + $0x38] sm:$0xff] }
 0x895   : > { %v1799_v40 = vmul.f32 %v6098_v39, %v6098_v39  ;;  %4705 = vmatprep.subr.bf16.mxu1 %v4704_v59  ;;  %4751 = vmatpush1.bf16.msra.mxu0 %v4750_v46  ;;  %v2101_v59 = vld [vmem:[#allocation14 + $0x88] sm:$0xff]  ;;  %v2123_v46 = vld [vmem:[#allocation14 + $0x138] sm:$0xff] }
 0x896   : > { %4707 = vmatpush1.bf16.msra.mxu1 %v4706_v0  ;;  %v4752_v61 = vpack.c.bf16 %v2101_v59, %v2100_v58  ;;  %v2085_v0 = vld [vmem:[#allocation14 + $0x8] sm:$0xff]  ;;  %4785 = vmatprep.subr.bf16.mxu0 %v4784_v1  ;;  %v2142_v1 = vld [vmem:[#allocation14 + $0x1d0] sm:$0xff] }
 0x897   : > { %1800 = vadd.xlane.f32.xlu0 %v1799_v40  ;;  %4709 = vmatprep.subr.bf16.mxu1 %v4708_v10  ;;  %v1880_v40 = vld [vmem:[#allocation13 + $0x1e0] sm:$0xff]  ;;  %v4756_v10 = vpack.c.bf16 %v2103_v8, %v2102_v6  ;;  %v2095_v6 = vld [vmem:[#allocation14 + $0x58] sm:$0xff]  ;;  %v2126_v8 = vld [vmem:[#allocation14 + $0x150] sm:$0xff] }
 0x898   : > { %v4718_v45 = vpack.c.bf16 %v1880_v40, %v1876_v38  ;;  %v2139_v38 = vld [vmem:[#allocation14 + $0x1b8] sm:$0xff]  ;;  %v2090_v40 = vld [vmem:[#allocation14 + $0x30] sm:$0xff] }
 0x899   : > { %v4766_v44 = vpack.c.bf16 %v2091_v41, %v2090_v40  ;;  %v1884_v40 = vld [vmem:[%s6428_s28] sm:$0xf]  ;;  %v1900_v41 = vsub.s32 3, %v5962_v26 }
 0x89a   : > { %4711 = vmatpush1.bf16.msra.mxu1 %v4710_v14  ;;  %v4758_v14 = vpack.c.bf16 %v2087_v13, %v2086_v12  ;;  %v2113_v12 = vld [vmem:[#allocation14 + $0xe8] sm:$0xff] }
 0x89b   : > { %4713 = vmatprep.subr.bf16.mxu1 %v4712_v28  ;;  %v2105_v28 = vld [vmem:[#allocation14 + $0xa8] sm:$0xff] }
 0x89c   : > { %v4760_v32 = vpack.c.bf16 %v2105_v28, %v2104_v18  ;;  %v2097_v18 = vld [vmem:[#allocation14 + $0x68] sm:$0xff]  ;;  %v2128_v28 = vld [vmem:[#allocation14 + $0x160] sm:$0xff] }
 0x89e   : > { %4715 = vmatpush1.bf16.msra.mxu1 %v4714_v30  ;;  %v2120_v30 = vld [vmem:[#allocation14 + $0x120] sm:$0xff] }
 0x89f   : > { %4717 = vmatprep.subr.bf16.mxu1 %v4716_v36  ;;  %v4794_v33 = vpack.c.bf16 %v2121_v31, %v2120_v30  ;;  %v2138_v36 = vld [vmem:[#allocation14 + $0x1b0] sm:$0xff]  ;;  %v2147_v30 = vld [vmem:[#allocation14 + $0x1f8] sm:$0xff] }
 0x8a0   : > { %v4796_v42 = vpack.c.bf16 %v2139_v38, %v2138_v36  ;;  %v2098_v31 = vld [vmem:[#allocation14 + $0x70] sm:$0xff]  ;;  %v4812_v34 = vpack.c.bf16 %v2147_v30, %v2146_v22  ;;  %v2131_v36 = vld [vmem:[#allocation14 + $0x178] sm:$0xff] }
 0x8a1   : > { %v4814_v38 = vpack.c.bf16 %v2131_v36, %v2130_v35  ;;  %v4169_v36 = vld [vmem:[%s6429_s0] ss:$0 sm:$0xff] }
 0x8a2   : > { %4719 = vmatpush1.bf16.msra.mxu1 %v4718_v45  ;;  %v2122_v45 = vld [vmem:[#allocation14 + $0x130] sm:$0xff] }
 0x8a3   : > { %4753 = vmatprep.subr.bf16.mxu1 %v4752_v61  ;;  %v2125_v61 = vld [vmem:[#allocation14 + $0x148] sm:$0xff] }
 0x924   : > { %v1801_v48 = vpop.xlane.xlu0 %1800 }
 0x925   : > { %v1802_v49 = vmul.f32 0.0078125, %v1801_v48  ;;  %v4798_v48 = vpack.c.bf16 %v2123_v46, %v2122_v45  ;;  %v1893_v45 = vrot.slane %v1884_v40, %v5965_v27  ;;  %v1901_v46 = vrot.slane %v1884_v40, %v1900_v41 }
 0x927   : > { %v1803_v50 = vadd.f32 1e-12, %v1802_v49  ;;  %v2108_v49 = vld [vmem:[#allocation14 + $0xc0] sm:$0xff] }
 0x929   : > { %5158 = vrsqrt.f32 %v1803_v50  ;;  %v2109_v50 = vld [vmem:[#allocation14 + $0xc8] sm:$0xff] }
 0x933   : > { %v5159_v51 = vpop.eup %5158 }
 0x934   : > { %v1805_v53 = vmul.f32 %v5159_v51, %v6098_v39  ;;  %v4754_v39 = vpack.c.bf16 %v2085_v0, %v2084_v63  ;;  %v2140_v51 = vld [vmem:[#allocation14 + $0x1c0] sm:$0xff]  ;;  %v4802_v63 = vpack.c.bf16 %v2125_v61, %v2124_v60  ;;  %v2111_v0 = vld [vmem:[#allocation14 + $0xd8] sm:$0xff] }
 0x935   : > { %v4772_v2 = vpack.c.bf16 %v2111_v0, %v2110_v62 }
 0x936   : > { %v1812_v55 = vmul.f32 %v4167_v52, %v1805_v53  ;;  %v4768_v52 = vpack.c.bf16 %v2109_v50, %v2108_v49  ;;  %v2141_v53 = vld [vmem:[#allocation14 + $0x1c8] sm:$0xff] }
 0x937   : > { %v4800_v58 = vpack.c.bf16 %v2141_v53, %v2140_v51 }
 0x938   : > { %v6109_v56 = vadd.f32 %v4168_v54, %v1812_v55  ;;  %v2092_v54 = vld [vmem:[#allocation14 + $0x40] sm:$0xff]  ;;  %v2093_v55 = vld [vmem:[#allocation14 + $0x48] sm:$0xff] }
 0x939   : > { %v4770_v59 = vpack.c.bf16 %v2093_v55, %v2092_v54 }
 0x93a   : > { %1971 = vmatmul.mubr.f32.vlgmr.msra.gmra.mrb[2].mxu1 %v6109_v56  ;;  %2042 = vmatmul.mubr.f32.vlgmr.msra.gmra.mrb[12].mxu0 %v6109_v56 }
 0x93b   : > { %4755 = vmatpush3.bf16.msra.mxu1 %v4754_v39  ;;  %4787 = vmatpush3.bf16.msra.mxu0 %v4786_v4  ;;  %v2143_v39 = vld [vmem:[#allocation14 + $0x1d8] sm:$0xff]  ;;  %v2094_v4 = vld [vmem:[#allocation14 + $0x50] sm:$0xff] }
 0x93c   : > { %4757 = vmatprep.subr.bf16.mxu1 %v4756_v10  ;;  %4789 = vmatprep.subr.bf16.mxu0 %v4788_v24  ;;  %v4804_v3 = vpack.c.bf16 %v2143_v39, %v2142_v1  ;;  %v4774_v9 = vpack.c.bf16 %v2095_v6, %v2094_v4  ;;  %v2127_v10 = vld [vmem:[#allocation14 + $0x158] sm:$0xff]  ;;  %v4776_v24 = vpack.c.bf16 %v2113_v12, %v2112_v11 }
 0x93d   : > { %v4806_v13 = vpack.c.bf16 %v2127_v10, %v2126_v8 }
 0x93f   : > { %4759 = vmatpush3.bf16.msra.mxu1 %v4758_v14  ;;  %4791 = vmatpush3.bf16.msra.mxu0 %v4790_v17  ;;  %v2144_v14 = vld [vmem:[#allocation14 + $0x1e0] sm:$0xff] }
 0x940   : > { %4761 = vmatprep.subr.bf16.mxu1 %v4760_v32  ;;  %4793 = vmatprep.subr.bf16.mxu0 %v4792_v23  ;;  %v4808_v17 = vpack.c.bf16 %v2145_v15, %v2144_v14  ;;  %v4778_v32 = vpack.c.bf16 %v2097_v18, %v2096_v16  ;;  %v4810_v23 = vpack.c.bf16 %v2129_v19, %v2128_v28 }
 0x943   : > { %4763 = vmatpush3.bf16.msra.mxu1 %v4762_v25  ;;  %4795 = vmatpush3.bf16.msra.mxu0 %v4794_v33  ;;  %v4780_v25 = vpack.c.bf16 %v2115_v21, %v2114_v20  ;;  %v2099_v33 = vld [vmem:[#allocation14 + $0x78] sm:$0xff] }
 0x944   : > { %4765 = vmatprep.subr.bf16.mxu1 %v4764_v37  ;;  %4797 = vmatprep.subr.bf16.mxu0 %v4796_v42  ;;  %v4782_v37 = vpack.c.bf16 %v2099_v33, %v2098_v31  ;;  %v1889_v42 = vrot.slane %v1884_v40, %v5973_v29 }
 0x947   : > { %4767 = vmatpush3.bf16.msra.mxu1 %v4766_v44  ;;  %4799 = vmatpush3.bf16.msra.mxu0 %v4798_v48  ;;  %v1897_v44 = vrot.slane %v1884_v40, %v6038_v7 }
 0x948   : > { %4769 = vmatprep.subr.bf16.mxu1 %v4768_v52  ;;  %4801 = vmatprep.subr.bf16.mxu0 %v4800_v58 }
 0x94b   : > { %4771 = vmatpush3.bf16.msra.mxu1 %v4770_v59  ;;  %4803 = vmatpush3.bf16.msra.mxu0 %v4802_v63 }
 0x94c   : > { %4773 = vmatprep.subr.bf16.mxu1 %v4772_v2  ;;  %4805 = vmatprep.subr.bf16.mxu0 %v4804_v3 }
 0x94f   : > { %4775 = vmatpush3.bf16.msra.mxu1 %v4774_v9  ;;  %4807 = vmatpush3.bf16.msra.mxu0 %v4806_v13 }
 0x950   : > { %4777 = vmatprep.subr.bf16.mxu1 %v4776_v24  ;;  %4809 = vmatprep.subr.bf16.mxu0 %v4808_v17 }
 0x953   : > { %4779 = vmatpush3.bf16.msra.mxu1 %v4778_v32  ;;  %4811 = vmatpush3.bf16.msra.mxu0 %v4810_v23 }
 0x954   : > { %4781 = vmatprep.subr.bf16.mxu1 %v4780_v25  ;;  %4813 = vmatprep.subr.bf16.mxu0 %v4812_v34 }
 0x957   : > { %4783 = vmatpush3.bf16.msra.mxu1 %v4782_v37  ;;  %4815 = vmatpush3.bf16.msra.mxu0 %v4814_v38 }
 0x958   : > { %4848 = vmatprep.subr.bf16.mxu0 %v5521_v5 }
 0xa0d   : > { %v1972_v48 = vpop.f32.mrb[2].mxu1  ;;  %v2043_v49 = vpop.f32.mrb[12].mxu0 }
 0xa0e   : > { %v1973_v50 = vadd.f32 %v1972_v48, %v1889_v42  ;;  %v2044_v51 = vadd.f32 %v2043_v49, %v1897_v44  ;;  %v1974_v52 = vpop.f32.mrb[3].mxu1  ;;  %v2045_v53 = vpop.f32.mrb[13].mxu0  ;;  %v2325_v48 = vld [vmem:[#allocation10 + $0x188] sm:$0xff]  ;;  %v2328_v49 = vld [vmem:[#allocation10 + $0x1a0] sm:$0xff] }
 0xa0f   : > { %v1975_v54 = vadd.f32 %v1974_v52, %v1893_v45  ;;  %v2046_v55 = vadd.f32 %v2045_v53, %v1901_v46  ;;  %v2327_v52 = vld [vmem:[#allocation10 + $0x198] sm:$0xff]  ;;  %v2326_v53 = vld [vmem:[#allocation10 + $0x190] sm:$0xff] }
 0xa10   : > { %v2048_v58 = vmul.f32 %v1973_v50, %v1973_v50  ;;  %v2050_v59 = vmul.f32 %v2044_v51, %v2044_v51 }
 0xa11   : > { %v2049_v60 = vmul.f32 %v1975_v54, %v1975_v54  ;;  %v2051_v61 = vmul.f32 %v2046_v55, %v2046_v55 }
 0xa12   : > { %v2052_v62 = vmul.f32 %v2048_v58, %v1973_v50  ;;  %v2054_v63 = vmul.f32 %v2050_v59, %v2044_v51  ;;  %v2331_v59 = vld [vmem:[#allocation10 + $0x1b8] sm:$0xff] }
 0xa13   : > { %v2053_v0 = vmul.f32 %v2049_v60, %v1975_v54  ;;  %v2055_v1 = vmul.f32 %v2051_v61, %v2046_v55  ;;  %v2334_v60 = vld [vmem:[#allocation10 + $0x1d0] sm:$0xff] }
 0xa14   : > { %v2056_v39 = vmul.f32 0.044715, %v2052_v62  ;;  %v2058_v2 = vmul.f32 0.044715, %v2054_v63  ;;  %v2330_v61 = vld [vmem:[#allocation10 + $0x1b0] sm:$0xff]  ;;  %v4820_v62 = vpack.c.bf16 %v2334_v60, %v2331_v59  ;;  %v2333_v63 = vld [vmem:[#allocation10 + $0x1c8] sm:$0xff] }
 0xa15   : > { %v2057_v3 = vmul.f32 0.044715, %v2053_v0  ;;  %v2059_v4 = vmul.f32 0.044715, %v2055_v1  ;;  %v2332_v0 = vld [vmem:[#allocation10 + $0x1c0] sm:$0xff]  ;;  %v2335_v1 = vld [vmem:[#allocation10 + $0x1d8] sm:$0xff] }
 0xa16   : > { %v2060_v6 = vadd.f32 %v2056_v39, %v1973_v50  ;;  %v2062_v8 = vadd.f32 %v2058_v2, %v2044_v51  ;;  %v4852_v39 = vpack.c.bf16 %v2335_v1, %v2332_v0  ;;  %v2337_v2 = vld [vmem:[#allocation10 + $0x1e8] sm:$0xff]  ;;  %v2367_v60 = vld [vmem:[#allocation10 + $0x2d8] sm:$0xff]  ;;  %v2366_v1 = vld [vmem:[#allocation10 + $0x2d0] sm:$0xff] }
 0xa17   : > { %v2061_v9 = vadd.f32 %v2057_v3, %v1975_v54  ;;  %v2063_v10 = vadd.f32 %v2059_v4, %v2046_v55  ;;  %v2340_v3 = vld [vmem:[#allocation10 + $0x200] sm:$0xff]  ;;  %v2365_v59 = vld [vmem:[#allocation10 + $0x2c8] sm:$0xff] }
 0xa18   : > { %v2064_v11 = vmul.f32 0.7978846, %v2060_v6  ;;  %v2066_v12 = vmul.f32 0.7978846, %v2062_v8  ;;  %v2336_v4 = vld [vmem:[#allocation10 + $0x1e0] sm:$0xff]  ;;  %v4824_v6 = vpack.c.bf16 %v2340_v3, %v2337_v2  ;;  %v2339_v8 = vld [vmem:[#allocation10 + $0x1f8] sm:$0xff] }
 0xa19   : > { %v2065_v13 = vmul.f32 0.7978846, %v2061_v9  ;;  %v2067_v24 = vmul.f32 0.7978846, %v2063_v10  ;;  %v2338_v9 = vld [vmem:[#allocation10 + $0x1f0] sm:$0xff]  ;;  %v2341_v10 = vld [vmem:[#allocation10 + $0x208] sm:$0xff] }
 0xa1a   : > { %5160 = vtanh.f32 %v2064_v11  ;;  %v4826_v11 = vpack.c.bf16 %v2339_v8, %v2336_v4  ;;  %v2371_v2 = vld [vmem:[#allocation10 + $0x2f8] sm:$0xff] }
 0xa1b   : > { %5162 = vtanh.f32 %v2066_v12  ;;  %v4855_v12 = vpack.c.bf16 %v2341_v10, %v2338_v9 }
 0xa1c   : > { %5164 = vtanh.f32 %v2065_v13 }
 0xa1d   : > { %5166 = vtanh.f32 %v2067_v24 }
 0xa24   : > { %v5161_v14 = vpop.eup %5160 }
 0xa25   : > { %v5163_v15 = vpop.eup %5162  ;;  %v2072_v16 = vadd.f32 1.0, %v5161_v14 }
 0xa26   : > { %v5165_v17 = vpop.eup %5164  ;;  %v2074_v18 = vadd.f32 1.0, %v5163_v15 }
 0xa27   : > { %v5167_v28 = vpop.eup %5166  ;;  %v2073_v19 = vadd.f32 1.0, %v5165_v17  ;;  %v2076_v20 = vmul.f32 0.5, %v2072_v16  ;;  %v2343_v16 = vld [vmem:[#allocation10 + $0x218] sm:$0xff]  ;;  %v2346_v17 = vld [vmem:[#allocation10 + $0x230] sm:$0xff] }
 0xa28   : > { %v2075_v32 = vadd.f32 1.0, %v5167_v28  ;;  %v2078_v22 = vmul.f32 0.5, %v2074_v18  ;;  %v4828_v18 = vpack.c.bf16 %v2346_v17, %v2343_v16  ;;  %v2342_v28 = vld [vmem:[#allocation10 + $0x210] sm:$0xff] }
 0xa29   : > { %v2077_v21 = vmul.f32 0.5, %v2073_v19  ;;  %v2080_v31 = vmul.f32 %v2076_v20, %v1973_v50  ;;  %v2324_v50 = vld [vmem:[#allocation10 + $0x180] sm:$0xff]  ;;  %v2345_v19 = vld [vmem:[#allocation10 + $0x228] sm:$0xff] }
 0xa2a   : > { %v2079_v23 = vmul.f32 0.5, %v2075_v32  ;;  %v2082_v33 = vmul.f32 %v2078_v22, %v2044_v51  ;;  %v4816_v51 = vpack.c.bf16 %v2328_v49, %v2325_v48  ;;  %v2344_v32 = vld [vmem:[#allocation10 + $0x220] sm:$0xff]  ;;  %v4830_v20 = vpack.c.bf16 %v2345_v19, %v2342_v28  ;;  %v2359_v49 = vld [vmem:[#allocation10 + $0x298] sm:$0xff] }
 0xa2b   : > { %v2081_v25 = vmul.f32 %v2077_v21, %v1975_v54  ;;  %v2329_v54 = vld [vmem:[#allocation10 + $0x1a8] sm:$0xff]  ;;  %v2347_v21 = vld [vmem:[#allocation10 + $0x238] sm:$0xff] }
 0xa2c   : > { %v2083_v30 = vmul.f32 %v2079_v23, %v2046_v55  ;;  %v4818_v55 = vpack.c.bf16 %v2327_v52, %v2324_v50  ;;  %v4849_v58 = vpack.c.bf16 %v2329_v54, %v2326_v53  ;;  %4817 = vmatprep.subr.bf16.mxu1 %v4816_v51  ;;  %v4858_v22 = vpack.c.bf16 %v2347_v21, %v2344_v32  ;;  %v2349_v23 = vld [vmem:[#allocation10 + $0x248] sm:$0xff]  ;;  %v2364_v51 = vld [vmem:[#allocation10 + $0x2c0] sm:$0xff] }
 0xa2d   : > { %2219 = vmatprep.mubr.f32.mxu1 %v2081_v25  ;;  %v2352_v25 = vld [vmem:[#allocation10 + $0x260] sm:$0xff]  ;;  %v2361_v50 = vld [vmem:[#allocation10 + $0x2a8] sm:$0xff] }
 0xa2e   : > { %2289 = vmatprep.mubr.f32.mxu0 %v2083_v30  ;;  %2220 = vmatmul.mubr.f32.vlgmr.msra.gmra.mrb[4].mxu1 %v2080_v31  ;;  %v4832_v30 = vpack.c.bf16 %v2352_v25, %v2349_v23  ;;  %v2348_v31 = vld [vmem:[#allocation10 + $0x240] sm:$0xff]  ;;  %v4840_v53 = vpack.c.bf16 %v2364_v51, %v2361_v50 }
 0xa2f   : > { %2290 = vmatmul.mubr.f32.vlgmr.msra.gmra.mrb[14].mxu0 %v2082_v33  ;;  %2454 = vmatprep.mubr.f32.mxu1 %v5522_v57  ;;  %v2351_v33 = vld [vmem:[#allocation10 + $0x258] sm:$0xff]  ;;  %v2360_v54 = vld [vmem:[#allocation10 + $0x2a0] sm:$0xff] }
 0xa30   : > { %4550 = vmatprep.mubr.msk.f32.mxu0 %vm5523_vm0, %v5522_v57  ;;  %4819 = vmatpush1.bf16.msra.mxu1 %v4818_v55  ;;  %v2363_v55 = vld [vmem:[#allocation10 + $0x2b8] sm:$0xff] }
 0xa31   : > { %4850 = vmatpush3.bf16.msra.mxu0 %v4849_v58  ;;  %4821 = vmatprep.subr.bf16.mxu1 %v4820_v62  ;;  %v2362_v58 = vld [vmem:[#allocation10 + $0x2b0] sm:$0xff]  ;;  %v4842_v62 = vpack.c.bf16 %v2363_v55, %v2360_v54 }
 0xa32   : > { %4851 = vmatprep.subr.bf16.mxu0 %v5521_v5 }
 0xa35   : > { %4853 = vmatpush3.bf16.msra.mxu0 %v4852_v39  ;;  %v2368_v39 = vld [vmem:[#allocation10 + $0x2e0] sm:$0xff] }
 0xa36   : > { %4854 = vmatprep.subr.bf16.mxu0 %v5521_v5  ;;  %v4870_v4 = vpack.c.bf16 %v2371_v2, %v2368_v39 }
 0xa39   : > { %4856 = vmatpush3.bf16.msra.mxu0 %v4855_v12 }
 0xa3a   : > { %4857 = vmatprep.subr.bf16.mxu0 %v5521_v5 }
 0xa3d   : > { %4859 = vmatpush3.bf16.msra.mxu0 %v4858_v22 }
 0xa3e   : > { %4860 = vmatprep.subr.bf16.mxu0 %v5521_v5 }
 0xb01   : > { %v4278_v34 = vpop.f32.mrb[4].mxu1 }
 0xb02   : > { %v4313_v35 = vpop.f32.mrb[14].mxu0  ;;  %v4279_v37 = vpop.f32.mrb[5].mxu1 }
 0xb03   : > { %v4280_v38 = vadd.f32 %v4279_v37, %v4278_v34  ;;  %v4314_v40 = vpop.f32.mrb[15].mxu0  ;;  %v2350_v34 = vld [vmem:[#allocation10 + $0x250] sm:$0xff]  ;;  %v2355_v37 = vld [vmem:[#allocation10 + $0x278] sm:$0xff] }
 0xb04   : > { %v4315_v42 = vadd.f32 %v4314_v40, %v4313_v35  ;;  %v4834_v35 = vpack.c.bf16 %v2351_v33, %v2348_v31 }
 0xb05   : > { %v2222_v44 = vadd.f32 %v4280_v38, %v4169_v36  ;;  %v2353_v36 = vld [vmem:[#allocation10 + $0x268] sm:$0xff]  ;;  %v2358_v38 = vld [vmem:[#allocation10 + $0x290] sm:$0xff] }
 0xb06   : > { %v4861_v40 = vpack.c.bf16 %v2353_v36, %v2350_v34 }
 0xb07   : > { %v2292_v45 = vadd.f32 %v4315_v42, %v2222_v44  ;;  %v4836_v42 = vpack.c.bf16 %v2358_v38, %v2355_v37  ;;  %v2354_v44 = vld [vmem:[#allocation10 + $0x270] sm:$0xff] }
 0xb08   : > { %4862 = vmatpush3.bf16.msra.mxu0 %v4861_v40 }
 0xb09   : > { %v2295_v46 = vadd.f32 %v2292_v45, %v6109_v56  ;;  %v4822_v56 = vpack.c.bf16 %v2333_v63, %v2330_v61  ;;  %v2357_v45 = vld [vmem:[#allocation10 + $0x288] sm:$0xff]  ;;  %4863 = vmatprep.subr.bf16.mxu0 %v5521_v5  ;;  %v2370_v61 = vld [vmem:[#allocation10 + $0x2f0] sm:$0xff]  ;;  %v4867_v63 = vpack.c.bf16 %v2365_v59, %v2362_v58 }
 0xb0a   : > { %v4838_v48 = vpack.c.bf16 %v2357_v45, %v2354_v44  ;;  %v4844_v0 = vpack.c.bf16 %v2370_v61, %v2367_v60 }
 0xb0b   : > { %2298 = vadd.xlane.f32.xlu1 %v2295_v46  ;;  %4823 = vmatpush1.bf16.msra.mxu1 %v4822_v56  ;;  %v2369_v56 = vld [vmem:[#allocation10 + $0x2e8] sm:$0xff] }
 0xb0c   : > { %4825 = vmatprep.subr.bf16.mxu1 %v4824_v6  ;;  %v4846_v3 = vpack.c.bf16 %v2369_v56, %v2366_v1 }
 0xb0f   : > { %4827 = vmatpush1.bf16.msra.mxu1 %v4826_v11  ;;  %v4170_v11 = vld [vmem:[%s6430_s14] ss:$0 sm:$0xff] }
 0xb10   : > { %4829 = vmatprep.subr.bf16.mxu1 %v4828_v18 }
 0xb13   : > { %4831 = vmatpush1.bf16.msra.mxu1 %v4830_v20 }
 0xb14   : > { %4833 = vmatprep.subr.bf16.mxu1 %v4832_v30 }
 0xb17   : > { %4835 = vmatpush1.bf16.msra.mxu1 %v4834_v35 }
 0xb18   : > { %4837 = vmatprep.subr.bf16.mxu1 %v4836_v42 }
 0xb1b   : > { %4839 = vmatpush1.bf16.msra.mxu1 %v4838_v48 }
 0xb1c   : > { %4841 = vmatprep.subr.bf16.mxu1 %v4840_v53 }
 0xb1f   : > { %4843 = vmatpush1.bf16.msra.mxu1 %v4842_v62 }
 0xb20   : > { %4845 = vmatprep.subr.bf16.mxu1 %v4844_v0 }
 0xb23   : > { %4847 = vmatpush1.bf16.msra.mxu1 %v4846_v3 }
 0xb24   : > { %4553 = vmatprep.subr.mxu1 %v5522_v57 }
 0xb98   : > { %v2299_v13 = vpop.xlane.xlu1 %2298 }
 0xb99   : > { %v2300_v24 = vmul.f32 0.0078125, %v2299_v13  ;;  %v4171_v13 = vld [vmem:[%s6431_s4] ss:$0 sm:$0xff] }
 0xb9b   : > { %v6133_v14 = vsub.f32 %v2295_v46, %v2300_v24  ;;  %v2356_v46 = vld [vmem:[#allocation10 + $0x280] sm:$0xff] }
 0xb9c   : > { %v4864_v52 = vpack.c.bf16 %v2359_v49, %v2356_v46 }
 0xb9d   : > { %v2302_v15 = vmul.f32 %v6133_v14, %v6133_v14 }
 0xb9e   : > { %4865 = vmatpush3.bf16.msra.mxu0 %v4864_v52 }
 0xb9f   : > { %2303 = vadd.xlane.f32.xlu1 %v2302_v15  ;;  %4866 = vmatprep.subr.bf16.mxu0 %v5521_v5 }
 0xba2   : > { %4868 = vmatpush3.bf16.msra.mxu0 %v4867_v63 }
 0xba3   : > { %4869 = vmatprep.subr.bf16.mxu0 %v5521_v5 }
 0xba6   : > { %4871 = vmatpush3.bf16.msra.mxu0 %v4870_v4 }
 0xc2c   : > { %v2304_v6 = vpop.xlane.xlu1 %2303 }
 0xc2d   : > { %v2305_v8 = vmul.f32 0.0078125, %v2304_v6 }
 0xc2f   : > { %v2306_v9 = vadd.f32 1e-12, %v2305_v8 }
 0xc31   : > { %5168 = vrsqrt.f32 %v2306_v9 }
 0xc3b   : > { %v5169_v10 = vpop.eup %5168 }
 0xc3c   : > { %v2308_v12 = vmul.f32 %v5169_v10, %v6133_v14  ;;  %v6159_v14 = vld [vmem:[%s6363_s5 + $0x3] sm:$0x7] }
 0xc3d   : > { %v2382_v16 = vrot.slane %v6159_v14, %v5965_v27  ;;  %v2378_v32 = vrot.slane %v6159_v14, %v5973_v29 }
 0xc3e   : > { %v2315_v24 = vmul.f32 %v4170_v11, %v2308_v12 }
 0xc40   : > { %v6149_v15 = vadd.f32 %v4171_v13, %v2315_v24 }
 0xc42   : > { %2455 = vmatmul.mubr.f32.vlgmr.msra.gmra.mrb[6].mxu1 %v6149_v15  ;;  %4551 = vmatmul.mubr.f32.vlgmr.msra.gmra.mrb[16].mxu0 %v6149_v15 }
 0xc43   : > { %4555 = vmatprep.mubr.msk.f32.mxu1 %vm5523_vm0, %v5522_v57  ;;  %3609 = vmatprep.mubr.f32.mxu0 %v5522_v57 }
 0xd15   : > { %v2456_v17 = vpop.f32.mrb[6].mxu1  ;;  %v6163_v18 = vpop.f32.mrb[16].mxu0 }
 0xd16   : > { %v2458_v28 = vpop.f32.mrb[7].mxu1  ;;  %v4552_v19 = vpop.f32.mrb[17].mxu0  ;;  %v2457_v21 = vadd.f32 %v2456_v17, %v2378_v32 }
 0xd17   : > { %v2459_v20 = vadd.f32 %v2458_v28, %v2382_v16 }
 0xd18   : > { %v2535_v37 = vcombine.high %v2457_v21, %v5522_v57  ;;  %v2542_v46 = vrot.slane %v2457_v21, %v5984_v43 }
 0xd19   : > { %2652 = vrot.lane.b32.xlu1 %v2459_v20, %s5524_s19  ;;  %v2655_v22 = vcombine.high %v2459_v20, %v5522_v57  ;;  %v2662_v25 = vrot.slane %v2459_v20, %v5984_v43 }
 0xd1a   : > { %v2549_v54 = vrot.slane %v2535_v37, %v5984_v43 }
 0xd1b   : > { %v2669_v33 = vrot.slane %v2655_v22, %v5984_v43 }
 0xd1d   : > { %2532 = vrot.lane.b32.xlu1 %v2457_v21, %s5524_s19 }
 0xd8b   : > { %v2653_v23 = vpop.permute.xlu1 %2652 }
 0xd8c   : > { %v2670_v30 = vcombine.high %v2653_v23, %v5522_v57  ;;  %v2677_v31 = vrot.slane %v2653_v23, %v5984_v43 }
 0xd8e   : > { %v2684_v34 = vrot.slane %v2670_v30, %v5984_v43  ;;  %v2685_v35 = vcombine.low %v2662_v25, %v2677_v31  ;;  %v2686_v36 = vcombine.high %v2662_v25, %v2677_v31 }
 0xd8f   : > { %v2533_v38 = vpop.permute.xlu1 %2532 }
 0xd90   : > { %v2693_v40 = vrot.slane %v2685_v35, %v5988_v47  ;;  %v2700_v42 = vrot.slane %v2686_v36, %v5988_v47  ;;  %v2701_v44 = vcombine.low %v2669_v33, %v2684_v34  ;;  %v2702_v45 = vcombine.high %v2669_v33, %v2684_v34  ;;  %v5190_v35 = vld [vmem:[%s577_s18] ss:$0 sm:$0xff]  ;;  %s3968_s18 = scalar_lea.sflag [#allocation4], %s5906_s11 }
 0xd91   : > { %v2550_v48 = vcombine.high %v2533_v38, %v5522_v57  ;;  %v2557_v49 = vrot.slane %v2533_v38, %v5984_v43 }
 0xd92   : > { %v2709_v50 = vrot.slane %v2701_v44, %v5988_v47  ;;  %v2716_v51 = vrot.slane %v2702_v45, %v5988_v47  ;;  %v2721_v52 = vcombine.low %v2693_v40, %v2700_v42  ;;  %v4175_v53 = vcombine.high %v2693_v40, %v2700_v42 }
 0xd93   : > { %v2564_v55 = vrot.slane %v2550_v48, %v5984_v43  ;;  %v2565_v58 = vcombine.low %v2542_v46, %v2557_v49  ;;  %v2566_v59 = vcombine.high %v2542_v46, %v2557_v49 }
 0xd94   : > { %v2728_v60 = vrot.slane %v2721_v52, %v5984_v43  ;;  %v2736_v61 = vrot.slane %v4175_v53, %v5984_v43  ;;  %v2737_v62 = vcombine.low %v2709_v50, %v2716_v51  ;;  %v4176_v63 = vcombine.high %v2709_v50, %v2716_v51 }
 0xd95   : > { %v2573_v0 = vrot.slane %v2565_v58, %v5988_v47  ;;  %v2580_v1 = vrot.slane %v2566_v59, %v5988_v47  ;;  %v2581_v56 = vcombine.low %v2549_v54, %v2564_v55  ;;  %v2582_v39 = vcombine.high %v2549_v54, %v2564_v55 }
 0xd96   : > { %v2744_v2 = vrot.slane %v2737_v62, %v5984_v43  ;;  %v2752_v3 = vrot.slane %v4176_v63, %v5984_v43  ;;  %v2753_v4 = vcombine.low %v2728_v60, %v2736_v61  ;;  %v2386_v59 = vrot.slane %v6159_v14, %v6038_v7 }
 0xd97   : > { %v2589_v6 = vrot.slane %v2581_v56, %v5988_v47  ;;  %v2596_v8 = vrot.slane %v2582_v39, %v5988_v47  ;;  %v2601_v9 = vcombine.low %v2573_v0, %v2580_v1  ;;  %v4173_v10 = vcombine.high %v2573_v0, %v2580_v1 }
 0xd98   : > { %v2761_v11 = vcombine.low %v2744_v2, %v2752_v3  ;;  %v2760_v17 = vrot.slane %v2753_v4, %v5988_v47  ;;  %v2528_v60 = vadd.f32 %v6163_v18, %v2386_v59 }
 0xd99   : > { %v2608_v12 = vrot.slane %v2601_v9, %v5984_v43  ;;  %v2616_v13 = vrot.slane %v4173_v10, %v5984_v43  ;;  %v2617_v24 = vcombine.low %v2589_v6, %v2596_v8  ;;  %v4174_v16 = vcombine.high %v2589_v6, %v2596_v8 }
 0xd9a   : > { %v2768_v28 = vrot.slane %v2761_v11, %v5988_v47  ;;  %v2775_v63 = vcombine.high %v2528_v60, %v5522_v57  ;;  %v2782_v1 = vrot.slane %v2528_v60, %v5984_v43 }
 0xd9b   : > { %v2624_v19 = vrot.slane %v2617_v24, %v5984_v43  ;;  %v2632_v32 = vrot.slane %v4174_v16, %v5984_v43  ;;  %v2633_v20 = vcombine.low %v2608_v12, %v2616_v13 }
 0xd9c   : > { %v2769_v21 = vcombine.low %v2760_v17, %v2768_v28  ;;  %v2770_v31 = vcombine.high %v2760_v17, %v2768_v28  ;;  %v2789_v2 = vrot.slane %v2775_v63, %v5984_v43  ;;  %v3347_v63 = vld [vmem:[#allocation11 + $0xf0] sm:$0xff] }
 0xd9d   : > { %v2641_v22 = vcombine.low %v2624_v19, %v2632_v32  ;;  %v2640_v23 = vrot.slane %v2633_v20, %v5988_v47 }
 0xd9e   : > { %4554 = vmatpush3.xpose.msk.msra.mxu1 %vm1256_vm1, %v2769_v21 }
 0xd9f   : > { %4558 = vmatprep.subr.mxu1 %v5522_v57  ;;  %v2648_v25 = vrot.slane %v2641_v22, %v5988_v47 }
 0xda1   : > { %v2649_v30 = vcombine.low %v2640_v23, %v2648_v25  ;;  %v2650_v33 = vcombine.high %v2640_v23, %v2648_v25 }
 0xda3   : > { %4556 = vmatmul.mubr.msk.f32.vlgmr.msra.gmra.mrb[8].mxu1 %vm1256_vm1, %v2649_v30 }
 0xda4   : > { %4559 = vmatpush3.xpose.msk.msra.mxu1 %vm1256_vm1, %v2770_v31  ;;  %4560 = vmatprep.mubr.msk.f32.mxu1 %vm5523_vm0, %v5522_v57 }
 0xda5   : > { %4563 = vmatprep.subr.mxu1 %v5522_v57 }
 0xda7   : > { %4561 = vmatmul.mubr.msk.f32.vlgmr.msra.gmra.mrb[10].mxu1 %vm1256_vm1, %v2650_v33 }
 0xda8   : > { %4565 = vmatprep.mubr.msk.f32.mxu1 %vm5523_vm0, %v5522_v57 }
 0xe76   : > { %v2963_v34 = vpop.f32.mrb[8].mxu1 }
 0xe77   : > { %v2964_v36 = vadd.f32 %v5190_v35, %v2963_v34  ;;  %v4557_v37 = vpop.f32.mrb[9].mxu1 }
 0xe78   : > { %v3334_v37 = vld [vmem:[#allocation11 + $0x88] sm:$0xff] }
 0xe79   : > { %v3043_v38 = vsel %vm1409_vm2, %v2964_v36, -inf }
 0xe7a   : > { %3044 = vmax.xlane.f32.xlu0 %v3043_v38  ;;  %v3039_v40 = vpop.f32.mrb[10].mxu1  ;;  %v3335_v38 = vld [vmem:[#allocation11 + $0x90] sm:$0xff] }
 0xe7b   : > { %v3040_v42 = vadd.f32 %v5190_v35, %v3039_v40  ;;  %v4562_v44 = vpop.f32.mrb[11].mxu1 }
 0xe7d   : > { %v3046_v45 = vsel %vm1409_vm2, %v3040_v42, -inf }
 0xe7e   : > { %3047 = vmax.xlane.f32.xlu1 %v3046_v45  ;;  %v3337_v45 = vld [vmem:[#allocation11 + $0xa0] sm:$0xff] }
 0xf07   : > { %v3045_v46 = vpop.xlane.xlu0 %3044 }
 0xf08   : > { %v3049_v48 = vsub.f32 %v2964_v36, %v3045_v46  ;;  %v3333_v36 = vld [vmem:[#allocation11 + $0x80] sm:$0xff]  ;;  %v3338_v46 = vld [vmem:[#allocation11 + $0xa8] sm:$0xff] }
 0xf09   : > { %v4873_v40 = vpack.c.bf16 %v3334_v37, %v3333_v36 }
 0xf0a   : > { %v3051_v49 = vmul.f32 1.442695, %v3049_v48  ;;  %v4879_v48 = vpack.c.bf16 %v3338_v46, %v3337_v45  ;;  %v3463_v46 = vld [vmem:[#allocation13 + $0x228] sm:$0xff] }
 0xf0b   : > { %v3048_v50 = vpop.xlane.xlu1 %3047 }
 0xf0c   : > { %5170 = vpow2.f32 %v3051_v49  ;;  %v3050_v51 = vsub.f32 %v3040_v42, %v3048_v50  ;;  %v3336_v42 = vld [vmem:[#allocation11 + $0x98] sm:$0xff]  ;;  %v3339_v49 = vld [vmem:[#allocation11 + $0xb0] sm:$0xff] }
 0xf0d   : > { %v4876_v44 = vpack.c.bf16 %v3336_v42, %v3335_v38  ;;  %v3340_v50 = vld [vmem:[#allocation11 + $0xb8] sm:$0xff] }
 0xf0e   : > { %v3053_v52 = vmul.f32 1.442695, %v3050_v51  ;;  %v4882_v51 = vpack.c.bf16 %v3340_v50, %v3339_v49  ;;  %v3465_v50 = vld [vmem:[#allocation13 + $0x238] sm:$0xff] }
 0xf10   : > { %5172 = vpow2.f32 %v3053_v52  ;;  %v3341_v52 = vld [vmem:[#allocation11 + $0xc0] sm:$0xff] }
 0xf16   : > { %v5171_v53 = vpop.eup %5170 }
 0xf17   : > { %v3055_v54 = vsel %vm1409_vm2, %v5171_v53, 0.0 }
 0xf18   : > { %3056 = vadd.xlane.f32.xlu0 %v3055_v54 }
 0xf1a   : > { %v5173_v55 = vpop.eup %5172 }
 0xf1b   : > { %v3058_v58 = vsel %vm1409_vm2, %v5173_v55, 0.0 }
 0xf1c   : > { %3059 = vadd.xlane.f32.xlu0 %v3058_v58  ;;  %v3344_v58 = vld [vmem:[#allocation11 + $0xd8] sm:$0xff] }
 0xf32   : > { %2772 = vrot.lane.b32.xlu0 %v2528_v60, %s5524_s19  ;;  %v3345_v60 = vld [vmem:[#allocation11 + $0xe0] sm:$0xff] }
 0xfa5   : > { %v3057_v61 = vpop.xlane.xlu0 %3056 }
 0xfa6   : > { %5174 = vrcp.f32 %v3057_v61  ;;  %v3346_v61 = vld [vmem:[#allocation11 + $0xe8] sm:$0xff] }
 0xfa9   : > { %v3060_v62 = vpop.xlane.xlu0 %3059 }
 0xfaa   : > { %5176 = vrcp.f32 %v3060_v62  ;;  %v4891_v62 = vpack.c.bf16 %v3346_v61, %v3345_v60  ;;  %v3471_v60 = vld [vmem:[#allocation13 + $0x268] sm:$0xff]  ;;  %v3469_v61 = vld [vmem:[#allocation13 + $0x258] sm:$0xff] }
 0xfad   : > { %v2773_v0 = vpop.permute.xlu0 %2772 }
 0xfae   : > { %v2790_v56 = vcombine.high %v2773_v0, %v5522_v57  ;;  %v2797_v39 = vrot.slane %v2773_v0, %v5984_v43  ;;  %v3348_v0 = vld [vmem:[#allocation11 + $0xf8] sm:$0xff] }
 0xfb0   : > { %v2804_v3 = vrot.slane %v2790_v56, %v5984_v43  ;;  %v2805_v14 = vcombine.low %v2782_v1, %v2797_v39  ;;  %v2806_v4 = vcombine.high %v2782_v1, %v2797_v39  ;;  %v5175_v22 = vpop.eup %5174  ;;  %v4894_v1 = vpack.c.bf16 %v3348_v0, %v3347_v63  ;;  %v3466_v0 = vld [vmem:[#allocation13 + $0x240] sm:$0xff] }
 0xfb1   : > { %v3063_v33 = vmul.f32 %v5175_v22, %v5171_v53  ;;  %v3342_v53 = vld [vmem:[#allocation11 + $0xc8] sm:$0xff] }
 0xfb2   : > { %v2813_v18 = vrot.slane %v2805_v14, %v5988_v47  ;;  %v2820_v6 = vrot.slane %v2806_v4, %v5988_v47  ;;  %v2821_v8 = vcombine.low %v2789_v2, %v2804_v3  ;;  %v2822_v9 = vcombine.high %v2789_v2, %v2804_v3 }
 0xfb3   : > { %v4885_v54 = vpack.c.bf16 %v3342_v53, %v3341_v52  ;;  %v3462_v52 = vld [vmem:[#allocation13 + $0x220] sm:$0xff] }
 0xfb4   : > { %v2829_v10 = vrot.slane %v2821_v8, %v5988_v47  ;;  %v2836_v11 = vrot.slane %v2822_v9, %v5988_v47  ;;  %v2841_v12 = vcombine.low %v2813_v18, %v2820_v6  ;;  %v4177_v13 = vcombine.high %v2813_v18, %v2820_v6  ;;  %v5177_v31 = vpop.eup %5176 }
 0xfb5   : > { %v3064_v35 = vmul.f32 %v5177_v31, %v5173_v55  ;;  %v3343_v55 = vld [vmem:[#allocation11 + $0xd0] sm:$0xff] }
 0xfb6   : > { %v2848_v24 = vrot.slane %v2841_v12, %v5984_v43  ;;  %v2856_v16 = vrot.slane %v4177_v13, %v5984_v43  ;;  %v2857_v17 = vcombine.low %v2829_v10, %v2836_v11  ;;  %v4178_v28 = vcombine.high %v2829_v10, %v2836_v11 }
 0xfb7   : > { %v4888_v59 = vpack.c.bf16 %v3344_v58, %v3343_v55  ;;  %v3464_v55 = vld [vmem:[#allocation13 + $0x230] sm:$0xff]  ;;  %v3467_v58 = vld [vmem:[#allocation13 + $0x248] sm:$0xff] }
 0xfb8   : > { %v2864_v19 = vrot.slane %v2857_v17, %v5984_v43  ;;  %v2872_v32 = vrot.slane %v4178_v28, %v5984_v43  ;;  %v2873_v20 = vcombine.low %v2848_v24, %v2856_v16 }
 0xfba   : > { %v2881_v21 = vcombine.low %v2864_v19, %v2872_v32  ;;  %v2880_v23 = vrot.slane %v2873_v20, %v5988_v47 }
 0xfbc   : > { %v2888_v25 = vrot.slane %v2881_v21, %v5988_v47 }
 0xfbe   : > { %v2889_v30 = vcombine.low %v2880_v23, %v2888_v25  ;;  %v2890_v34 = vcombine.high %v2880_v23, %v2888_v25 }
 0xfc0   : > { %4564 = vmatpush3.msra.mxu1 %v2889_v30 }
 0xfc1   : > { %4566 = vmatmul.mubr.msk.f32.vlgmr.msra.gmra.mrb[12].mxu1 %vm1409_vm2, %v3063_v33  ;;  %4568 = vmatprep.subr.mxu1 %v5522_v57 }
 0xfc2   : > { %4569 = vmatpush3.msra.mxu1 %v2890_v34  ;;  %4570 = vmatprep.mubr.msk.f32.mxu1 %vm5523_vm0, %v5522_v57 }
 0xfc3   : > { %4872 = vmatprep.subr.bf16.mxu1 %v5521_v5 }
 0xfc5   : > { %4571 = vmatmul.mubr.msk.f32.vlgmr.msra.gmra.mrb[14].mxu1 %vm1409_vm2, %v3064_v35 }
 0xfc6   : > { %4605 = vmatprep.mubr.msk.f32.mxu1 %vm5523_vm0, %v5522_v57  ;;  %4874 = vmatpush3.bf16.msra.mxu1 %v4873_v40 }
 0xfc7   : > { %4875 = vmatprep.subr.bf16.mxu1 %v5521_v5 }
 0xfca   : > { %4877 = vmatpush3.bf16.msra.mxu1 %v4876_v44 }
 0xfcb   : > { %4878 = vmatprep.subr.bf16.mxu1 %v5521_v5 }
 0xfce   : > { %4880 = vmatpush3.bf16.msra.mxu1 %v4879_v48  ;;  %v3461_v48 = vld [vmem:[#allocation13 + $0x218] sm:$0xff] }
 0xfcf   : > { %4881 = vmatprep.subr.bf16.mxu1 %v5521_v5  ;;  %v4928_v53 = vpack.c.bf16 %v3465_v50, %v3461_v48  ;;  %v3492_v48 = vld [vmem:[#allocation13 + $0x310] sm:$0xff]  ;;  %v3499_v50 = vld [vmem:[#allocation13 + $0x348] sm:$0xff] }
 0xfd2   : > { %4883 = vmatpush3.bf16.msra.mxu1 %v4882_v51  ;;  %v3458_v51 = vld [vmem:[#allocation13 + $0x200] sm:$0xff] }
 0xfd3   : > { %4884 = vmatprep.subr.bf16.mxu1 %v5521_v5 }
 0xfd6   : > { %4886 = vmatpush3.bf16.msra.mxu1 %v4885_v54  ;;  %v4898_v54 = vpack.c.bf16 %v3462_v52, %v3458_v51  ;;  %v3503_v52 = vld [vmem:[#allocation13 + $0x368] sm:$0xff] }
 0xfd7   : > { %4887 = vmatprep.subr.bf16.mxu1 %v5521_v5 }
 0xfda   : > { %4889 = vmatpush3.bf16.msra.mxu1 %v4888_v59 }
 0xfdb   : > { %4890 = vmatprep.subr.bf16.mxu1 %v5521_v5 }
 0xfde   : > { %4892 = vmatpush3.bf16.msra.mxu1 %v4891_v62  ;;  %v3473_v62 = vld [vmem:[#allocation13 + $0x278] sm:$0xff] }
 0xfdf   : > { %4893 = vmatprep.subr.bf16.mxu1 %v5521_v5  ;;  %v4932_v63 = vpack.c.bf16 %v3473_v62, %v3469_v61  ;;  %v3504_v62 = vld [vmem:[#allocation13 + $0x370] sm:$0xff] }
 0xfe2   : > { %4895 = vmatpush3.bf16.msra.mxu1 %v4894_v1  ;;  %v3470_v1 = vld [vmem:[#allocation13 + $0x260] sm:$0xff] }
 0xfe3   : > { %4929 = vmatprep.subr.bf16.mxu1 %v4928_v53  ;;  %v3501_v53 = vld [vmem:[#allocation13 + $0x358] sm:$0xff] }
0x1094   : > { %v3134_v56 = vpop.f32.mrb[12].mxu1 }
0x1095   : > { %v4567_v39 = vpop.f32.mrb[13].mxu1  ;;  %v3211_v2 = vcombine.high %v3134_v56, %v5522_v57  ;;  %v3218_v14 = vrot.slane %v3134_v56, %v5984_v43  ;;  %v3468_v56 = vld [vmem:[#allocation13 + $0x250] sm:$0xff] }
0x1096   : > { %v4902_v39 = vpack.c.bf16 %v3470_v1, %v3466_v0 }
0x1097   : > { %v3225_v8 = vrot.slane %v3211_v2, %v5984_v43  ;;  %v3472_v2 = vld [vmem:[#allocation13 + $0x270] sm:$0xff] }
0x1098   : > { %v3207_v3 = vpop.f32.mrb[14].mxu1 }
0x1099   : > { %v3226_v4 = vcombine.high %v3207_v3, %v5522_v57  ;;  %v3233_v18 = vrot.slane %v3207_v3, %v5984_v43  ;;  %v4572_v6 = vpop.f32.mrb[15].mxu1  ;;  %v3475_v3 = vld [vmem:[#allocation13 + $0x288] sm:$0xff] }
0x109a   : > { %v3477_v6 = vld [vmem:[#allocation13 + $0x298] sm:$0xff] }
0x109b   : > { %v3240_v9 = vrot.slane %v3226_v4, %v5984_v43  ;;  %v3241_v10 = vcombine.low %v3218_v14, %v3233_v18  ;;  %v3242_v11 = vcombine.high %v3218_v14, %v3233_v18  ;;  %v3479_v14 = vld [vmem:[#allocation13 + $0x2a8] sm:$0xff]  ;;  %v4934_v4 = vpack.c.bf16 %v3472_v2, %v3468_v56  ;;  %v3509_v56 = vld [vmem:[#allocation13 + $0x398] sm:$0xff]  ;;  %v3506_v2 = vld [vmem:[#allocation13 + $0x380] sm:$0xff] }
0x109c   : > { %v4904_v18 = vpack.c.bf16 %v3479_v14, %v3475_v3  ;;  %v3510_v14 = vld [vmem:[#allocation13 + $0x3a0] sm:$0xff] }
0x109d   : > { %v3249_v5 = vrot.slane %v3241_v10, %v5988_v47  ;;  %v3256_v12 = vrot.slane %v3242_v11, %v5988_v47  ;;  %v3257_v13 = vcombine.low %v3225_v8, %v3240_v9  ;;  %v3258_v24 = vcombine.high %v3225_v8, %v3240_v9  ;;  %v3481_v8 = vld [vmem:[#allocation13 + $0x2b8] sm:$0xff]  ;;  %v3474_v9 = vld [vmem:[#allocation13 + $0x280] sm:$0xff] }
0x109e   : > { %v4936_v10 = vpack.c.bf16 %v3481_v8, %v3477_v6  ;;  %v3478_v11 = vld [vmem:[#allocation13 + $0x2a0] sm:$0xff]  ;;  %v4922_v6 = vpack.c.bf16 %v3510_v14, %v3506_v2  ;;  %v3515_v8 = vld [vmem:[#allocation13 + $0x3c8] sm:$0xff] }
0x109f   : > { %v3265_v16 = vrot.slane %v3257_v13, %v5988_v47  ;;  %v3272_v17 = vrot.slane %v3258_v24, %v5988_v47  ;;  %v3277_v28 = vcombine.low %v3249_v5, %v3256_v12  ;;  %v4185_v19 = vcombine.high %v3249_v5, %v3256_v12  ;;  %v3476_v5 = vld [vmem:[#allocation13 + $0x290] sm:$0xff]  ;;  %v3760_v14 = vld [vmem:[#allocation14 + $0x320] sm:$0xff] }
0x10a0   : > { %v3480_v12 = vld [vmem:[#allocation13 + $0x2b0] sm:$0xff]  ;;  %v4906_v13 = vpack.c.bf16 %v3478_v11, %v3474_v9  ;;  %v3519_v9 = vld [vmem:[#allocation13 + $0x3e8] sm:$0xff] }
0x10a1   : > { %v3284_v32 = vrot.slane %v3277_v28, %v5984_v43  ;;  %v3292_v20 = vrot.slane %v4185_v19, %v5984_v43  ;;  %v3293_v21 = vcombine.low %v3265_v16, %v3272_v17  ;;  %v4186_v22 = vcombine.high %v3265_v16, %v3272_v17 }
0x10a2   : > { %v4938_v24 = vpack.c.bf16 %v3480_v12, %v3476_v5  ;;  %v4924_v5 = vpack.c.bf16 %v3519_v9, %v3515_v8  ;;  %v3521_v12 = vld [vmem:[#allocation13 + $0x3f8] sm:$0xff]  ;;  %v3778_v9 = vld [vmem:[#allocation14 + $0x3b0] sm:$0xff] }
0x10a3   : > { %v3300_v23 = vrot.slane %v3293_v21, %v5984_v43  ;;  %v3308_v25 = vrot.slane %v4186_v22, %v5984_v43  ;;  %v3309_v30 = vcombine.low %v3284_v32, %v3292_v20  ;;  %v4188_v43 = vld [vmem:[%s6365_s7 + $0x1] ss:$0 sm:$0xff]  ;;  %v3485_v21 = vld [vmem:[#allocation13 + $0x2d8] sm:$0xff] }
0x10a4   : > { %v3483_v32 = vld [vmem:[#allocation13 + $0x2c8] sm:$0xff]  ;;  %v3747_v8 = vld [vmem:[#allocation14 + $0x2b8] sm:$0xff] }
0x10a5   : > { %v3317_v31 = vcombine.low %v3300_v23, %v3308_v25  ;;  %v3316_v33 = vrot.slane %v3309_v30, %v5988_v47  ;;  %v3487_v20 = vld [vmem:[#allocation13 + $0x2e8] sm:$0xff]  ;;  %v3489_v23 = vld [vmem:[#allocation13 + $0x2f8] sm:$0xff]  ;;  %v3482_v25 = vld [vmem:[#allocation13 + $0x2c0] sm:$0xff] }
0x10a6   : > { %v4908_v22 = vpack.c.bf16 %v3487_v20, %v3483_v32  ;;  %v3486_v30 = vld [vmem:[#allocation13 + $0x2e0] sm:$0xff] }
0x10a7   : > { %v3324_v34 = vrot.slane %v3317_v31, %v5988_v47  ;;  %v3459_v47 = vld [vmem:[#allocation13 + $0x208] sm:$0xff]  ;;  %v4940_v31 = vpack.c.bf16 %v3489_v23, %v3485_v21 }
0x10a8   : > { %v4896_v49 = vpack.c.bf16 %v3463_v46, %v3459_v47 }
0x10a9   : > { %v3326_v35 = vcombine.high %v3316_v33, %v3324_v34  ;;  %v3325_v36 = vcombine.low %v3316_v33, %v3324_v34  ;;  %v4910_v33 = vpack.c.bf16 %v3486_v30, %v3482_v25  ;;  %v3484_v34 = vld [vmem:[#allocation13 + $0x2d0] sm:$0xff]  ;;  %v4191_v30 = vld [vmem:[%s6366_s8 + $0x1] ss:$0 sm:$0xff] }
0x10aa   : > { %4897 = vmatprep.subr.bf16.mxu0 %v4896_v49  ;;  %v3496_v49 = vld [vmem:[#allocation13 + $0x330] sm:$0xff] }
0x10ab   : > { %3328 = vrot.lane.b32.xlu0 %v3326_v35, %s5524_s19  ;;  %4899 = vmatpush1.bf16.msra.mxu0 %v4898_v54  ;;  %v3488_v35 = vld [vmem:[#allocation13 + $0x2f0] sm:$0xff]  ;;  %v4946_v51 = vpack.c.bf16 %v3496_v49, %v3492_v48  ;;  %v3505_v54 = vld [vmem:[#allocation13 + $0x378] sm:$0xff]  ;;  %s5425_s19 = scalar_lea.vmem %s5424_s6, 256 }
0x10ac   : > { %v3742_v49 = vld [vmem:[#allocation14 + $0x290] sm:$0xff]  ;;  %p5427_p6 = scmp.lt.s32.totalorder %s5425_s19, %s5419_s20 }
0x10ae   : > { %p5428_p12 = por %p5427_p6, %p5426_p3 }
0x10b0   : > { %p5429_p8 = pnand %p5428_p12, %p5422_p7 }
0x111d   : > { %v3329_v37 = vpop.permute.xlu0 %3328 }
0x111e   : > { %v3331_v38 = vsel %vm1256_vm1, %v3325_v36, %v3329_v37  ;;  %v4942_v36 = vpack.c.bf16 %v3488_v35, %v3484_v34  ;;  %v3491_v37 = vld [vmem:[#allocation13 + $0x308] sm:$0xff] }
0x111f   : > { %4606 = vmatmul.mubr.f32.vlgmr.msra.gmra.mrb[16].mxu1 %v3331_v38  ;;  %v3495_v38 = vld [vmem:[#allocation13 + $0x328] sm:$0xff] }
0x1120   : > { %3680 = vmatprep.mubr.f32.mxu1 %v5522_v57  ;;  %v3460_v57 = vld [vmem:[#allocation13 + $0x210] sm:$0xff] }
0x1121   : > { %v4930_v59 = vpack.c.bf16 %v3464_v55, %v3460_v57  ;;  %v4916_v57 = vpack.c.bf16 %v3503_v52, %v3499_v50  ;;  %v4948_v55 = vpack.c.bf16 %v3505_v54, %v3501_v53  ;;  %v3743_v50 = vld [vmem:[#allocation14 + $0x298] sm:$0xff]  ;;  %v3726_v54 = vld [vmem:[#allocation14 + $0x210] sm:$0xff] }
0x1122   : > { %v4964_v52 = vpack.c.bf16 %v3743_v50, %v3742_v49  ;;  %v3775_v53 = vld [vmem:[#allocation14 + $0x398] sm:$0xff]  ;;  %v3752_v50 = vld [vmem:[#allocation14 + $0x2e0] sm:$0xff] }
0x1123   : > { %4931 = vmatpush1.bf16.msra.mxu1 %v4930_v59  ;;  %v3502_v59 = vld [vmem:[#allocation13 + $0x360] sm:$0xff]  ;;  %v3767_v49 = vld [vmem:[#allocation14 + $0x358] sm:$0xff] }
0x1124   : > { %4933 = vmatprep.subr.bf16.mxu1 %v4932_v63  ;;  %v3511_v63 = vld [vmem:[#allocation13 + $0x3a8] sm:$0xff] }
0x1127   : > { %4935 = vmatpush1.bf16.msra.mxu1 %v4934_v4  ;;  %v3508_v4 = vld [vmem:[#allocation13 + $0x390] sm:$0xff] }
0x1128   : > { %4937 = vmatprep.subr.bf16.mxu1 %v4936_v10  ;;  %v3517_v10 = vld [vmem:[#allocation13 + $0x3d8] sm:$0xff] }
0x112b   : > { %4939 = vmatpush1.bf16.msra.mxu1 %v4938_v24  ;;  %v3518_v24 = vld [vmem:[#allocation13 + $0x3e0] sm:$0xff] }
0x112c   : > { %4941 = vmatprep.subr.bf16.mxu1 %v4940_v31 }
0x112f   : > { %4943 = vmatpush1.bf16.msra.mxu1 %v4942_v36  ;;  %v3740_v36 = vld [vmem:[#allocation14 + $0x280] sm:$0xff] }
0x11f2   : > { %v3423_v40 = vpop.f32.mrb[16].mxu1 }
0x11f3   : > { %v3424_v42 = vadd.f32 %v4188_v43, %v3423_v40  ;;  %v4607_v44 = vpop.f32.mrb[17].mxu1  ;;  %v3493_v43 = vld [vmem:[#allocation13 + $0x318] sm:$0xff]  ;;  %v4912_v40 = vpack.c.bf16 %v3495_v38, %v3491_v37  ;;  %v3741_v37 = vld [vmem:[#allocation14 + $0x288] sm:$0xff]  ;;  %v3772_v38 = vld [vmem:[#allocation14 + $0x380] sm:$0xff] }
0x11f4   : > { %v3490_v44 = vld [vmem:[#allocation13 + $0x300] sm:$0xff] }
0x11f5   : > { %v3427_v45 = vadd.f32 %v3424_v42, %v6149_v15  ;;  %v4900_v15 = vpack.c.bf16 %v3471_v60, %v3467_v58  ;;  %v3497_v42 = vld [vmem:[#allocation13 + $0x338] sm:$0xff]  ;;  %v3498_v58 = vld [vmem:[#allocation13 + $0x340] sm:$0xff]  ;;  %v3500_v60 = vld [vmem:[#allocation13 + $0x350] sm:$0xff] }
0x11f6   : > { %v4944_v47 = vpack.c.bf16 %v3497_v42, %v3493_v43  ;;  %v4918_v61 = vpack.c.bf16 %v3502_v59, %v3498_v58  ;;  %v4950_v0 = vpack.c.bf16 %v3504_v62, %v3500_v60  ;;  %v4960_v43 = vpack.c.bf16 %v3741_v37, %v3740_v36  ;;  %v3724_v42 = vld [vmem:[#allocation14 + $0x200] sm:$0xff]  ;;  %v3758_v59 = vld [vmem:[#allocation14 + $0x310] sm:$0xff]  ;;  %v3759_v60 = vld [vmem:[#allocation14 + $0x318] sm:$0xff] }
0x11f7   : > { %3432 = vadd.xlane.f32.xlu1 %v3427_v45  ;;  %4901 = vmatprep.subr.bf16.mxu0 %v4900_v15  ;;  %v3507_v15 = vld [vmem:[#allocation13 + $0x388] sm:$0xff]  ;;  %v3744_v62 = vld [vmem:[#allocation14 + $0x2a0] sm:$0xff]  ;;  %v3750_v37 = vld [vmem:[#allocation14 + $0x2d0] sm:$0xff] }
0x11f8   : > { %4903 = vmatpush1.bf16.msra.mxu0 %v4902_v39  ;;  %4945 = vmatprep.subr.bf16.mxu1 %v4944_v47  ;;  %v4920_v1 = vpack.c.bf16 %v3511_v63, %v3507_v15  ;;  %v3513_v39 = vld [vmem:[#allocation13 + $0x3b8] sm:$0xff]  ;;  %v3756_v47 = vld [vmem:[#allocation14 + $0x300] sm:$0xff]  ;;  %v3745_v15 = vld [vmem:[#allocation14 + $0x2a8] sm:$0xff] }
0x11f9   : > { %4905 = vmatprep.subr.bf16.mxu0 %v4904_v18  ;;  %4947 = vmatpush1.bf16.msra.mxu1 %v4946_v51  ;;  %v4952_v3 = vpack.c.bf16 %v3513_v39, %v3509_v56  ;;  %v3512_v18 = vld [vmem:[#allocation13 + $0x3b0] sm:$0xff]  ;;  %v3776_v63 = vld [vmem:[#allocation14 + $0x3a0] sm:$0xff]  ;;  %v3729_v39 = vld [vmem:[#allocation14 + $0x228] sm:$0xff] }
0x11fa   : > { %4949 = vmatprep.subr.bf16.mxu1 %v4948_v55  ;;  %v4954_v11 = vpack.c.bf16 %v3512_v18, %v3508_v4  ;;  %v3774_v51 = vld [vmem:[#allocation14 + $0x390] sm:$0xff]  ;;  %v3728_v56 = vld [vmem:[#allocation14 + $0x220] sm:$0xff]  ;;  %v3761_v4 = vld [vmem:[#allocation14 + $0x328] sm:$0xff] }
0x11fb   : > { %v4996_v55 = vpack.c.bf16 %v3775_v53, %v3774_v51  ;;  %v5002_v18 = vpack.c.bf16 %v3761_v4, %v3760_v14  ;;  %v3765_v36 = vld [vmem:[#allocation14 + $0x348] sm:$0xff]  ;;  %v3770_v4 = vld [vmem:[#allocation14 + $0x370] sm:$0xff] }
0x11fc   : > { %4907 = vmatpush1.bf16.msra.mxu0 %v4906_v13  ;;  %v3514_v13 = vld [vmem:[#allocation13 + $0x3c0] sm:$0xff]  ;;  %v3753_v51 = vld [vmem:[#allocation14 + $0x2e8] sm:$0xff] }
0x11fd   : > { %4909 = vmatprep.subr.bf16.mxu0 %v4908_v22  ;;  %4951 = vmatpush1.bf16.msra.mxu1 %v4950_v0  ;;  %v4926_v32 = vpack.c.bf16 %v3518_v24, %v3514_v13  ;;  %v4968_v0 = vpack.c.bf16 %v3745_v15, %v3744_v62  ;;  %v4984_v53 = vpack.c.bf16 %v3753_v51, %v3752_v50  ;;  %v3754_v15 = vld [vmem:[#allocation14 + $0x2f0] sm:$0xff] }
0x11fe   : > { %4953 = vmatprep.subr.bf16.mxu1 %v4952_v3  ;;  %v4970_v3 = vpack.c.bf16 %v3729_v39, %v3728_v56  ;;  %v3787_v39 = vld [vmem:[#allocation14 + $0x3f8] sm:$0xff] }
0x1200   : > { %4911 = vmatpush1.bf16.msra.mxu0 %v4910_v33  ;;  %v4192_v33 = vld [vmem:[%s6367_s9 + $0x1] ss:$0 sm:$0xff] }
0x1201   : > { %4913 = vmatprep.subr.bf16.mxu0 %v4912_v40  ;;  %4955 = vmatpush1.bf16.msra.mxu1 %v4954_v11  ;;  %v3773_v40 = vld [vmem:[#allocation14 + $0x388] sm:$0xff]  ;;  %v3779_v11 = vld [vmem:[#allocation14 + $0x3b8] sm:$0xff] }
0x1202   : > { %v5004_v13 = vpack.c.bf16 %v3779_v11, %v3778_v9  ;;  %v4193_v9 = vld [vmem:[%s6428_s28 + $0x4] sm:$0xf] }
0x1203   : > { %v3536_v11 = vrot.slane %v4193_v9, %v6038_v7 }
0x1284   : > { %v3433_v16 = vpop.xlane.xlu1 %3432 }
0x1285   : > { %v3434_v17 = vmul.f32 0.0078125, %v3433_v16  ;;  %v4956_v16 = vpack.c.bf16 %v3521_v12, %v3517_v10  ;;  %v3731_v12 = vld [vmem:[#allocation14 + $0x238] sm:$0xff] }
0x1287   : > { %v6275_v28 = vsub.f32 %v3427_v45, %v3434_v17  ;;  %v3494_v45 = vld [vmem:[#allocation13 + $0x320] sm:$0xff]  ;;  %v3516_v17 = vld [vmem:[#allocation13 + $0x3d0] sm:$0xff]  ;;  %4957 = vmatprep.subr.bf16.mxu1 %v4956_v16 }
0x1288   : > { %v4914_v46 = vpack.c.bf16 %v3494_v45, %v3490_v44  ;;  %v3725_v44 = vld [vmem:[#allocation14 + $0x208] sm:$0xff]  ;;  %v4992_v45 = vpack.c.bf16 %v3773_v40, %v3772_v38  ;;  %v3762_v16 = vld [vmem:[#allocation14 + $0x330] sm:$0xff] }
0x1289   : > { %v3436_v19 = vmul.f32 %v6275_v28, %v6275_v28  ;;  %v3782_v40 = vld [vmem:[#allocation14 + $0x3d0] sm:$0xff] }
0x128a   : > { %4915 = vmatpush1.bf16.msra.mxu0 %v4914_v46  ;;  %v3757_v46 = vld [vmem:[#allocation14 + $0x308] sm:$0xff] }
0x128b   : > { %3437 = vadd.xlane.f32.xlu0 %v3436_v19  ;;  %4917 = vmatprep.subr.bf16.mxu0 %v4916_v57  ;;  %v3520_v19 = vld [vmem:[#allocation13 + $0x3f0] sm:$0xff]  ;;  %v4994_v48 = vpack.c.bf16 %v3757_v46, %v3756_v47  ;;  %v3727_v57 = vld [vmem:[#allocation14 + $0x218] sm:$0xff] }
0x128c   : > { %v4958_v20 = vpack.c.bf16 %v3520_v19, %v3516_v17  ;;  %v4966_v58 = vpack.c.bf16 %v3727_v57, %v3726_v54  ;;  %v3763_v17 = vld [vmem:[#allocation14 + $0x338] sm:$0xff]  ;;  %v3766_v46 = vld [vmem:[#allocation14 + $0x350] sm:$0xff]  ;;  %v3784_v54 = vld [vmem:[#allocation14 + $0x3e0] sm:$0xff] }
0x128d   : > { %v5006_v19 = vpack.c.bf16 %v3763_v17, %v3762_v16  ;;  %v3735_v47 = vld [vmem:[#allocation14 + $0x258] sm:$0xff]  ;;  %v3785_v57 = vld [vmem:[#allocation14 + $0x3e8] sm:$0xff] }
0x128e   : > { %4919 = vmatpush1.bf16.msra.mxu0 %v4918_v61  ;;  %4959 = vmatpush1.bf16.msra.mxu1 %v4958_v20  ;;  %v4998_v61 = vpack.c.bf16 %v3759_v60, %v3758_v59  ;;  %v3749_v20 = vld [vmem:[#allocation14 + $0x2c8] sm:$0xff]  ;;  %v3768_v60 = vld [vmem:[#allocation14 + $0x360] sm:$0xff] }
0x128f   : > { %4921 = vmatprep.subr.bf16.mxu0 %v4920_v1  ;;  %4993 = vmatprep.subr.bf16.mxu1 %v4992_v45  ;;  %v3777_v1 = vld [vmem:[#allocation14 + $0x3a8] sm:$0xff] }
0x1290   : > { %v5000_v2 = vpack.c.bf16 %v3777_v1, %v3776_v63  ;;  %v3737_v59 = vld [vmem:[#allocation14 + $0x268] sm:$0xff]  ;;  %v3755_v63 = vld [vmem:[#allocation14 + $0x2f8] sm:$0xff] }
0x1291   : > { %v4988_v56 = vpack.c.bf16 %v3755_v63, %v3754_v15  ;;  %v4195_v63 = vld [vmem:[%s6429_s0 + $0x1] ss:$0 sm:$0xff]  ;;  %s6314_s0 = scalar_lea.hbm %s6432_s13, %s4201_s10 }
0x1292   : > { %4923 = vmatpush1.bf16.msra.mxu0 %v4922_v6  ;;  %v3746_v6 = vld [vmem:[#allocation14 + $0x2b0] sm:$0xff] }
0x1293   : > { %4925 = vmatprep.subr.bf16.mxu0 %v4924_v5  ;;  %v4972_v10 = vpack.c.bf16 %v3747_v8, %v3746_v6  ;;  %v3730_v5 = vld [vmem:[#allocation14 + $0x230] sm:$0xff] }
0x1294   : > { %v4974_v24 = vpack.c.bf16 %v3731_v12, %v3730_v5  ;;  %v3532_v5 = vrot.slane %v4193_v9, %v5965_v27  ;;  %v3540_v12 = vrot.slane %v4193_v9, %v1900_v41 }
0x1296   : > { %4927 = vmatpush1.bf16.msra.mxu0 %v4926_v32  ;;  %v3748_v32 = vld [vmem:[#allocation14 + $0x2c0] sm:$0xff] }
0x1297   : > { %4961 = vmatprep.subr.bf16.mxu0 %v4960_v43  ;;  %v3751_v43 = vld [vmem:[#allocation14 + $0x2d8] sm:$0xff] }
0x1318   : > { %v3438_v21 = vpop.xlane.xlu0 %3437 }
0x1319   : > { %v3439_v22 = vmul.f32 0.0078125, %v3438_v21  ;;  %v3780_v21 = vld [vmem:[#allocation14 + $0x3c0] sm:$0xff] }
0x131b   : > { %v3440_v23 = vadd.f32 1e-12, %v3439_v22  ;;  %v4976_v22 = vpack.c.bf16 %v3749_v20, %v3748_v32 }
0x131d   : > { %5178 = vrsqrt.f32 %v3440_v23  ;;  %v3781_v23 = vld [vmem:[#allocation14 + $0x3c8] sm:$0xff] }
0x1327   : > { %v5179_v25 = vpop.eup %5178 }
0x1328   : > { %v3442_v31 = vmul.f32 %v5179_v25, %v6275_v28  ;;  %v4962_v28 = vpack.c.bf16 %v3725_v44, %v3724_v42  ;;  %v3732_v25 = vld [vmem:[#allocation14 + $0x240] sm:$0xff]  ;;  %v3783_v42 = vld [vmem:[#allocation14 + $0x3d8] sm:$0xff]  ;;  %v4980_v44 = vpack.c.bf16 %v3751_v43, %v3750_v37 }
0x1329   : > { %v5012_v45 = vpack.c.bf16 %v3783_v42, %v3782_v40 }
0x132a   : > { %v3449_v34 = vmul.f32 %v4191_v30, %v3442_v31  ;;  %v3733_v30 = vld [vmem:[#allocation14 + $0x248] sm:$0xff]  ;;  %v5008_v31 = vpack.c.bf16 %v3781_v23, %v3780_v21 }
0x132c   : > { %v6286_v35 = vadd.f32 %v4192_v33, %v3449_v34  ;;  %v4978_v33 = vpack.c.bf16 %v3733_v30, %v3732_v25  ;;  %v3764_v34 = vld [vmem:[#allocation14 + $0x340] sm:$0xff] }
0x132d   : > { %v5010_v38 = vpack.c.bf16 %v3765_v36, %v3764_v34 }
0x132e   : > { %3610 = vmatmul.mubr.f32.vlgmr.msra.gmra.mrb[18].mxu0 %v6286_v35  ;;  %3681 = vmatmul.mubr.f32.vlgmr.msra.gmra.mrb[18].mxu1 %v6286_v35 }
0x132f   : > { %4963 = vmatpush3.bf16.msra.mxu0 %v4962_v28  ;;  %4995 = vmatpush3.bf16.msra.mxu1 %v4994_v48  ;;  %v3734_v28 = vld [vmem:[#allocation14 + $0x250] sm:$0xff] }
0x1330   : > { %4965 = vmatprep.subr.bf16.mxu0 %v4964_v52  ;;  %4997 = vmatprep.subr.bf16.mxu1 %v4996_v55  ;;  %v4982_v48 = vpack.c.bf16 %v3735_v47, %v3734_v28  ;;  %v5014_v52 = vpack.c.bf16 %v3767_v49, %v3766_v46  ;;  %v3736_v55 = vld [vmem:[#allocation14 + $0x260] sm:$0xff] }
0x1331   : > { %v4986_v62 = vpack.c.bf16 %v3737_v59, %v3736_v55 }
0x1333   : > { %4967 = vmatpush3.bf16.msra.mxu0 %v4966_v58  ;;  %4999 = vmatpush3.bf16.msra.mxu1 %v4998_v61  ;;  %v5016_v58 = vpack.c.bf16 %v3785_v57, %v3784_v54  ;;  %v3769_v61 = vld [vmem:[#allocation14 + $0x368] sm:$0xff] }
0x1334   : > { %4969 = vmatprep.subr.bf16.mxu0 %v4968_v0  ;;  %5001 = vmatprep.subr.bf16.mxu1 %v5000_v2  ;;  %v3786_v0 = vld [vmem:[#allocation14 + $0x3f0] sm:$0xff]  ;;  %v5018_v1 = vpack.c.bf16 %v3769_v61, %v3768_v60 }
0x1335   : > { %v3738_v2 = vld [vmem:[#allocation14 + $0x270] sm:$0xff]  ;;  %v5020_v14 = vpack.c.bf16 %v3787_v39, %v3786_v0 }
0x1337   : > { %4971 = vmatpush3.bf16.msra.mxu0 %v4970_v3  ;;  %5003 = vmatpush3.bf16.msra.mxu1 %v5002_v18  ;;  %v3739_v3 = vld [vmem:[#allocation14 + $0x278] sm:$0xff] }
0x1338   : > { %4973 = vmatprep.subr.bf16.mxu0 %v4972_v10  ;;  %5005 = vmatprep.subr.bf16.mxu1 %v5004_v13  ;;  %v3771_v18 = vld [vmem:[#allocation14 + $0x378] sm:$0xff]  ;;  %v4990_v6 = vpack.c.bf16 %v3739_v3, %v3738_v2  ;;  %v3528_v10 = vrot.slane %v4193_v9, %v5973_v29 }
0x1339   : > { %v5022_v8 = vpack.c.bf16 %v3771_v18, %v3770_v4 }
0x133b   : > { %4975 = vmatpush3.bf16.msra.mxu0 %v4974_v24  ;;  %5007 = vmatpush3.bf16.msra.mxu1 %v5006_v19 }
0x133c   : > { %4977 = vmatprep.subr.bf16.mxu0 %v4976_v22  ;;  %5009 = vmatprep.subr.bf16.mxu1 %v5008_v31 }
0x133f   : > { %4979 = vmatpush3.bf16.msra.mxu0 %v4978_v33  ;;  %5011 = vmatpush3.bf16.msra.mxu1 %v5010_v38 }
0x1340   : > { %4981 = vmatprep.subr.bf16.mxu0 %v4980_v44  ;;  %5013 = vmatprep.subr.bf16.mxu1 %v5012_v45 }
0x1343   : > { %4983 = vmatpush3.bf16.msra.mxu0 %v4982_v48  ;;  %5015 = vmatpush3.bf16.msra.mxu1 %v5014_v52 }
0x1344   : > { %4985 = vmatprep.subr.bf16.mxu0 %v4984_v53  ;;  %5017 = vmatprep.subr.bf16.mxu1 %v5016_v58 }
0x1347   : > { %4987 = vmatpush3.bf16.msra.mxu0 %v4986_v62  ;;  %5019 = vmatpush3.bf16.msra.mxu1 %v5018_v1 }
0x1348   : > { %4989 = vmatprep.subr.bf16.mxu0 %v4988_v56  ;;  %5021 = vmatprep.subr.bf16.mxu1 %v5020_v14 }
0x134b   : > { %4991 = vmatpush3.bf16.msra.mxu0 %v4990_v6  ;;  %5023 = vmatpush3.bf16.msra.mxu1 %v5022_v8 }
0x1401   : > { %v3611_v13 = vpop.f32.mrb[18].mxu0  ;;  %v3682_v24 = vpop.f32.mrb[18].mxu1 }
0x1402   : > { %v3612_v16 = vadd.f32 %v3611_v13, %v3528_v10  ;;  %v3683_v17 = vadd.f32 %v3682_v24, %v3536_v11  ;;  %v3613_v19 = vpop.f32.mrb[19].mxu0  ;;  %v3684_v32 = vpop.f32.mrb[19].mxu1 }
0x1403   : > { %v3614_v20 = vadd.f32 %v3613_v19, %v3532_v5  ;;  %v3685_v21 = vadd.f32 %v3684_v32, %v3540_v12  ;;  %v4198_v12 = vld [vmem:[%s6430_s14 + $0x1] ss:$0 sm:$0xff] }
0x1404   : > { %v3687_v22 = vmul.f32 %v3612_v16, %v3612_v16  ;;  %v3689_v23 = vmul.f32 %v3683_v17, %v3683_v17 }
0x1405   : > { %v3688_v25 = vmul.f32 %v3614_v20, %v3614_v20  ;;  %v3690_v30 = vmul.f32 %v3685_v21, %v3685_v21 }
0x1406   : > { %v3691_v29 = vmul.f32 %v3687_v22, %v3612_v16  ;;  %v3693_v31 = vmul.f32 %v3689_v23, %v3683_v17 }
0x1407   : > { %v3692_v7 = vmul.f32 %v3688_v25, %v3614_v20  ;;  %v3694_v33 = vmul.f32 %v3690_v30, %v3685_v21 }
0x1408   : > { %v3695_v27 = vmul.f32 0.044715, %v3691_v29  ;;  %v3697_v34 = vmul.f32 0.044715, %v3693_v31 }
0x1409   : > { %v3696_v26 = vmul.f32 0.044715, %v3692_v7  ;;  %v3698_v41 = vmul.f32 0.044715, %v3694_v33 }
0x140a   : > { %v3699_v36 = vadd.f32 %v3695_v27, %v3612_v16  ;;  %v3701_v37 = vadd.f32 %v3697_v34, %v3683_v17 }
0x140b   : > { %v3700_v38 = vadd.f32 %v3696_v26, %v3614_v20  ;;  %v3702_v43 = vadd.f32 %v3698_v41, %v3685_v21 }
0x140c   : > { %v3703_v40 = vmul.f32 0.7978846, %v3699_v36  ;;  %v3705_v42 = vmul.f32 0.7978846, %v3701_v37 }
0x140d   : > { %v3704_v44 = vmul.f32 0.7978846, %v3700_v38  ;;  %v3706_v45 = vmul.f32 0.7978846, %v3702_v43 }
0x140e   : > { %5180 = vtanh.f32 %v3703_v40 }
0x140f   : > { %5182 = vtanh.f32 %v3705_v42 }
0x1410   : > { %5184 = vtanh.f32 %v3704_v44 }
0x1411   : > { %5186 = vtanh.f32 %v3706_v45 }
0x1418   : > { %v5181_v28 = vpop.eup %5180 }
0x1419   : > { %v5183_v47 = vpop.eup %5182  ;;  %v3711_v46 = vadd.f32 1.0, %v5181_v28 }
0x141a   : > { %v5185_v48 = vpop.eup %5184  ;;  %v3713_v49 = vadd.f32 1.0, %v5183_v47 }
0x141b   : > { %v5187_v50 = vpop.eup %5186  ;;  %v3712_v51 = vadd.f32 1.0, %v5185_v48  ;;  %v3715_v53 = vmul.f32 0.5, %v3711_v46 }
0x141c   : > { %v3714_v52 = vadd.f32 1.0, %v5187_v50  ;;  %v3717_v57 = vmul.f32 0.5, %v3713_v49 }
0x141d   : > { %v3716_v54 = vmul.f32 0.5, %v3712_v51  ;;  %v3719_v60 = vmul.f32 %v3715_v53, %v3612_v16 }
0x141e   : > { %v3718_v55 = vmul.f32 0.5, %v3714_v52  ;;  %v3721_v61 = vmul.f32 %v3717_v57, %v3683_v17 }
0x141f   : > { %v3720_v58 = vmul.f32 %v3716_v54, %v3614_v20 }
0x1420   : > { %v3722_v59 = vmul.f32 %v3718_v55, %v3685_v21 }
0x1421   : > { %3860 = vmatprep.mubr.f32.mxu0 %v3720_v58 }
0x1422   : > { %3930 = vmatprep.mubr.f32.mxu1 %v3722_v59  ;;  %3861 = vmatmul.mubr.f32.vlgmr.msra.gmra.mrb[20].mxu0 %v3719_v60 }
0x1423   : > { %3931 = vmatmul.mubr.f32.vlgmr.msra.gmra.mrb[20].mxu1 %v3721_v61 }
0x14f5   : > { %v4390_v62 = vpop.f32.mrb[20].mxu0 }
0x14f6   : > { %v4425_v15 = vpop.f32.mrb[20].mxu1  ;;  %v4391_v0 = vpop.f32.mrb[21].mxu0 }
0x14f7   : > { %v4392_v1 = vadd.f32 %v4391_v0, %v4390_v62  ;;  %v4426_v56 = vpop.f32.mrb[21].mxu1 }
0x14f8   : > { %v4427_v39 = vadd.f32 %v4426_v56, %v4425_v15 }
0x14f9   : > { %v3863_v2 = vadd.f32 %v4392_v1, %v4195_v63 }
0x14fb   : > { %v3933_v3 = vadd.f32 %v4427_v39, %v3863_v2 }
0x14fd   : > { %v3936_v14 = vadd.f32 %v3933_v3, %v6286_v35  ;;  %v4199_v35 = vld [vmem:[%s6431_s4 + $0x1] ss:$0 sm:$0xff] }
0x14ff   : > { %3941 = vadd.xlane.f32.xlu1 %v3936_v14 }
0x158c   : > { %v3942_v4 = vpop.xlane.xlu1 %3941 }
0x158d   : > { %v3943_v18 = vmul.f32 0.0078125, %v3942_v4 }
0x158f   : > { %v3944_v6 = vsub.f32 %v3936_v14, %v3943_v18 }
0x1591   : > { %v3945_v8 = vmul.f32 %v3944_v6, %v3944_v6 }
0x1593   : > { %3946 = vadd.xlane.f32.xlu1 %v3945_v8 }
0x1620   : > { %v3947_v9 = vpop.xlane.xlu1 %3946 }
0x1621   : > { %v3948_v10 = vmul.f32 0.0078125, %v3947_v9 }
0x1623   : > { %v3949_v11 = vadd.f32 1e-12, %v3948_v10 }
0x1625   : > { %5188 = vrsqrt.f32 %v3949_v11 }
0x162f   : > { %v5189_v5 = vpop.eup %5188 }
0x1630   : > { %v3951_v13 = vmul.f32 %v5189_v5, %v3944_v6 }
0x1632   : > { %v3958_v24 = vmul.f32 %v4198_v12, %v3951_v13 }
0x1634   : > { %v3965_v16 = vadd.f32 %v4199_v35, %v3958_v24 }
0x1636   : > { %3966 = vst [vmem:[%s653_s2] sm:$0xff] %v3965_v16 }
0x1637   : > { %5432 = shalt.err (!%p5429_p8)
}
0x1638   : > { %s5433_s11 = scalar_lea.hbm %s6314_s0, 128  ;;  %s5437_s2 = scalar_lea.hbm %s6432_s13, 256 }
0x1639   : > { %p5434_p9 = scmp.ne.s32.totalorder %s6314_s0, %s5433_s11  ;;  %p5438_p13 = scmp.lt.u32.totalorder %s6314_s0, %s6432_s13 }
0x163a   : > { %p5439_p0 = scmp.lt.u32.totalorder %s5437_s2, %s5433_s11  ;;  %p5441_p10 = scmp.lt.u32.totalorder %s5433_s11, %s6314_s0 }
0x163b   : > { %p5435_p4 = pnand %p5434_p9, %p6433_p11 }
0x163c   : > { %p5440_p2 = por %p5439_p0, %p5438_p13 }
0x163d   : > { %p5436_p1 = pneg %p5435_p4 }
0x163e   : > { %p5442_p5 = por %p5441_p10, %p5440_p2 }
0x1640   : > { %p5443_p7 = pnand %p5442_p5, %p5436_p1 }
0x1642   : > { %5446 = shalt.err (!%p5443_p7)
}
0x1643   : > { %5052 = dma.vmem_to_hbm [thread:$0]  (%p6433_p11), %s6316_s16, 128, %s6314_s0, %s3968_s18  }
0x1644 PF: > { %s3993_s20 = sand.u32 1, %s5493_s21   ;;  %p6434_p3 = scmp.ne.s32.totalorder %s6414_s17, 0 }
0x1645   : > { %p6435_p6 = scmp.ge.s32.totalorder %s5505_s24, 2  ;;  %s3994_s27 = scalar_lea.sflag [#allocation4], %s3993_s20 }
0x1647   : > { %p5081_p12 = pnand %p6435_p6, %p6434_p3 }
0x1649   : > { %5488 = dma.done.wait (!%p5081_p12), %s3994_s27, 128  }
0x164a   : > { %5490 = vsyncadd (!%p5081_p12), %s3994_s27, 4294967168  ;;  %p35_p8 = scmp.ge.s32.totalorder %s5797_s29, 4   ;;  %s6436_s21 = smov %s5497_s22 }
0x164b   : > { %s6437_s22 = smov %s5501_s23  ;;  %s6438_s23 = smov %s5808_s15 }
0x164c   : > { %s6439_s24 = smov %s5797_s29  ;;  %37 = sbr.rel (!%p35_p8) target bundleno = 22 (0x16), region = 178 }
0x1653   :  { %3999 = vsyncpa [#allocation3], 1 }
0x1654   :  { %4001 = vsyncpa [#allocation3 + $0x1], 1 }
0x1655   :  { %4002 = vsyncpa [#allocation6], 1 }
0x1656   :  { %4004 = vsyncpa [#allocation6 + $0x1], 1 }
0x1657   :  { %4005 = vsyncpa [#allocation9], 1 }
0x1658   :  { %4006 = vsyncpa [#allocation12], 1 }
0x1659   :  { %4007 = vsyncpa [#allocation15], 1 }
0x165a   :  { %4008 = vsyncpa [#allocation4], 1 }
0x165b   :  { %4010 = vsyncpa [#allocation4 + $0x1], 1 }

</bundles_post_ra>
